<compile_context>
chip_gen: v6e
topology: v6e:2x2x1
jax: 0.10.0
libtpu: 0.0.40
codegen_flags: <defaults>
</compile_context>

<pallas_src>
import jax
import jax.numpy as jnp
from jax.experimental import pallas as pl
from jax.experimental.pallas import tpu as pltpu


# Weight-slab slot indices (each slot is an (H, H) matrix).
W_Q_I2T, W_K_I2T, W_V_I2T, W_O_I2T = 0, 1, 2, 3
W_Q_T2I, W_K_T2I, W_V_T2I, W_O_T2I = 4, 5, 6, 7
W_GAMMA, W_BETA, W_FO, W_CLF = 8, 9, 10, 11
NUM_W_SLOTS = 12

# Bias-slab slot indices (each slot is an (H,) vector; classifier bias padded).
B_IP, B_TP = 0, 1
B_Q_I2T, B_K_I2T, B_V_I2T, B_O_I2T = 2, 3, 4, 5
B_Q_T2I, B_K_T2I, B_V_T2I, B_O_T2I = 6, 7, 8, 9
B_GAMMA, B_BETA, B_FO, B_CLF = 10, 11, 12, 13
NUM_B_SLOTS = 14


# ----------------------------------------------------------------------------
# Fused kernel: one grid step == `task_block` tasks' full forward passes.
# ----------------------------------------------------------------------------
def _make_kernel(batch, n_img, n_txt, heads, hidden, task_block):
    dh = hidden // heads
    scale = 1.0 / float(dh) ** 0.5
    f32 = jnp.float32
    bf16 = jnp.bfloat16

    def mm(x, w):
        # bf16 x bf16 MXU matmul, f32 accumulation.
        return jnp.dot(x.astype(bf16), w, preferred_element_type=f32)

    def kernel(img_ref, txt_ref, wip_ref, wtp_ref, w_ref, b_ref, out_ref):
        img = img_ref[...].astype(f32)          # (B*Ni, Di)
        txt = txt_ref[...].astype(f32)          # (B*Nt, Dt)

        for tb in range(task_block):            # static unroll over task block
            biases = b_ref[tb]                  # (14, H) f32

            def bias(i):
                return biases[i:i + 1]          # (1, H) — 2D broadcast-friendly

            def wmat(i):
                return w_ref[tb, i]             # (H, H) bf16, static ref index

            # Fate input projections.
            img_h = mm(img, wip_ref[tb]) + bias(B_IP)      # (B*Ni, H)
            txt_h = mm(txt, wtp_ref[tb]) + bias(B_TP)      # (B*Nt, H)

            def cross_attn(src, ctx, n_src, n_ctx, qi, ki, vi, oi,
                           bq, bk, bv, bo):
                """MHA of `src` over `ctx`; full-width QKV / out-proj matmuls;
                out-proj bias and identity residual folded into the return."""
                q = (mm(src, wmat(qi)) + bias(bq)).reshape(batch, n_src, hidden)
                k = (mm(ctx, wmat(ki)) + bias(bk)).reshape(batch, n_ctx, hidden)
                v = (mm(ctx, wmat(vi)) + bias(bv)).reshape(batch, n_ctx, hidden)

                head_outs = []
                for h in range(heads):           # per-head score/softmax/PV only
                    lo, hi = h * dh, (h + 1) * dh
                    qh, kh, vh = q[:, :, lo:hi], k[:, :, lo:hi], v[:, :, lo:hi]
                    s = jnp.einsum("bqd,bkd->bqk", qh, kh,
                                   preferred_element_type=f32) * scale
                    s = s - jnp.max(s, axis=-1, keepdims=True)
                    p = jnp.exp(s)
                    p = p * pl.reciprocal(jnp.sum(p, axis=-1, keepdims=True),
                                          approx=True)
                    head_outs.append(jnp.einsum("bqk,bkd->bqd", p, vh,
                                                preferred_element_type=f32))
                o = jnp.concatenate(head_outs, axis=-1)       # (B, n_src, H)
                o = o.reshape(batch * n_src, hidden)
                # single (B*N, H) @ (H, H) out-proj; bias + residual folded.
                return mm(o, wmat(oi)) + (bias(bo) + src)

            # img -> text and text -> img attention (residual_mode='identity',
            # eval-mode dropout == identity).
            i2t = cross_attn(img_h, txt_h, n_img, n_txt,
                             W_Q_I2T, W_K_I2T, W_V_I2T, W_O_I2T,
                             B_Q_I2T, B_K_I2T, B_V_I2T, B_O_I2T)
            t2i = cross_attn(txt_h, img_h, n_txt, n_img,
                             W_Q_T2I, W_K_T2I, W_V_T2I, W_O_T2I,
                             B_Q_T2I, B_K_T2I, B_V_T2I, B_O_T2I)
            # TODO(synk): DeepseekMoE_TaskSpecificExperts is undefined in the
            # reference and is None for default fusion_mode='identity'; treated
            # as zero so moe(x) + x == x.

            # ProposedFusionModule: mean-pool, FiLM, GELU, project.
            pa = jnp.mean(i2t.reshape(batch, n_img, hidden), axis=1)   # (B, H)
            pb = jnp.mean(t2i.reshape(batch, n_txt, hidden), axis=1)   # (B, H)
            gamma = mm(pb, wmat(W_GAMMA)) + bias(B_GAMMA)
            beta = mm(pb, wmat(W_BETA)) + bias(B_BETA)
            # TODO(synk): PyTorch nn.GELU() is exact erf; tanh approximation
            # used here for guaranteed Mosaic lowering (small systematic delta).
            fused = mm(jax.nn.gelu(gamma * pa + beta, approximate=True),
                       wmat(W_FO)) + bias(B_FO)                        # (B, H)

            # Binary classifier against the zero-padded (H, H) weight:
            # column 0 of z_full is the real logit (sigmoid in the wrapper).
            z_full = mm(fused, wmat(W_CLF)) + bias(B_CLF)              # (B, H)

            # Lane-dense packed output block: rows [:B]=fused, [B:]=z_full.
            out_ref[tb] = jnp.concatenate([fused, z_full],
                                          axis=0).astype(out_ref.dtype)

    return kernel


# ----------------------------------------------------------------------------
# Wrapper: single pallas_call over a task-block grid.
# ----------------------------------------------------------------------------
def multitask_forward(img_features, text_feats, params, task_block=None):
    """img_features: (B, Ni, Di), text_feats: (B, Nt, Dt)."""
    B, n_img, d_img = img_features.shape
    _, n_txt, d_txt = text_feats.shape
    heads = params["heads"]
    w_slab = params["w_slab"]
    num_tasks, _, hidden, _ = w_slab.shape

    if task_block is None:
        # Amortize per-step fixed cost but keep >=2 grid steps when possible
        # (so a v7x 2-TC "parallel" split still has work per core).
        task_block = 2 if num_tasks % 2 == 0 else 1
    assert num_tasks % task_block == 0
    grid = (num_tasks // task_block,)

    # Token-flattened activations (static wrapper-side reshape, free).
    img2 = img_features.reshape(B * n_img, d_img)
    txt2 = text_feats.reshape(B * n_txt, d_txt)

    in_specs = [
        pl.BlockSpec((B * n_img, d_img), lambda g: (0, 0)),
        pl.BlockSpec((B * n_txt, d_txt), lambda g: (0, 0)),
        pl.BlockSpec((task_block, d_img, hidden), lambda g: (g, 0, 0)),
        pl.BlockSpec((task_block, d_txt, hidden), lambda g: (g, 0, 0)),
        pl.BlockSpec((task_block, NUM_W_SLOTS, hidden, hidden),
                     lambda g: (g, 0, 0, 0)),
        pl.BlockSpec((task_block, NUM_B_SLOTS, hidden), lambda g: (g, 0, 0)),
    ]
    out_specs = pl.BlockSpec((task_block, 2 * B, hidden), lambda g: (g, 0, 0))
    out_shape = jax.ShapeDtypeStruct((num_tasks, 2 * B, hidden), jnp.float32)

    packed = pl.pallas_call(
        _make_kernel(B, n_img, n_txt, heads, hidden, task_block),
        out_shape=out_shape,
        grid=grid,
        in_specs=in_specs,
        out_specs=out_specs,
        compiler_params=pltpu.CompilerParams(
            dimension_semantics=("parallel",),   # task axis; 2-TC sharding on v7x
            vmem_limit_bytes=64 * 1024 * 1024),
    )(img2, txt2, params["w_ip"], params["w_tp"], params["w_slab"],
      params["b_slab"])

    fused = packed[:, :B, :]                     # (T, B, H)
    logits = packed[:, B:, 0:1]                  # (T, B, 1)
    probs = jax.nn.sigmoid(logits)               # tiny; done in the wrapper

    return {
        "logits": [logits[t] for t in range(num_tasks)],
        "probs": [probs[t] for t in range(num_tasks)],
        "task_feats": [fused[t] for t in range(num_tasks)],
    }


# ----------------------------------------------------------------------------
# Deterministic synthetic parameters, packed into per-task slabs.
#   w_ip : (T, Di, H)            bf16
#   w_tp : (T, Dt, H)            bf16
#   w_slab: (T, 12, H, H)        bf16  (slot 11 = classifier weight padded to
#                                       (H, H); only column 0 is non-zero)
#   b_slab: (T, 14, H)           f32   (slot 13 = padded classifier bias)
# ----------------------------------------------------------------------------
def init_params(key, num_tasks, img_dim, text_dim, hidden, heads):
    assert hidden % heads == 0
    k_ip, k_tp, k_sq, k_clf = jax.random.split(key, 4)

    def w(k, *shape):
        return jax.random.normal(k, shape, jnp.float32) * 0.02

    w_ip = w(k_ip, num_tasks, img_dim, hidden)
    w_tp = w(k_tp, num_tasks, text_dim, hidden)
    w_sq = w(k_sq, num_tasks, NUM_W_SLOTS - 1, hidden, hidden)   # 11 HxH mats
    w_clf = w(k_clf, num_tasks, hidden, 1)
    w_clf_pad = jnp.pad(w_clf, ((0, 0), (0, 0), (0, hidden - 1)))  # col0 = clf
    w_slab = jnp.concatenate([w_sq, w_clf_pad[:, None]], axis=1)   # (T,12,H,H)
    b_slab = jnp.zeros((num_tasks, NUM_B_SLOTS, hidden), jnp.float32)

    return {
        "heads": heads,
        "w_ip": w_ip.astype(jnp.bfloat16),
        "w_tp": w_tp.astype(jnp.bfloat16),
        "w_slab": w_slab.astype(jnp.bfloat16),
        "b_slab": b_slab,
    }


# ----------------------------------------------------------------------------
if __name__ == "__main__":
    B, N_IMG, N_TXT = 2, 8, 8
    IMG_DIM = TEXT_DIM = HIDDEN = 32
    HEADS = 4
    NUM_TASKS = 4

    key = jax.random.PRNGKey(0)
    k_img, k_txt, k_param = jax.random.split(key, 3)
    img_features = jax.random.normal(k_img, (B, N_IMG, IMG_DIM), jnp.float32)
    text_feats = jax.random.normal(k_txt, (B, N_TXT, TEXT_DIM), jnp.float32)

    params = init_params(k_param, NUM_TASKS, IMG_DIM, TEXT_DIM, HIDDEN, HEADS)
    out = multitask_forward(img_features, text_feats, params)
    jax.block_until_ready(out)

    assert len(out["logits"]) == NUM_TASKS
    assert out["logits"][0].shape == (B, 1)
    assert out["probs"][0].shape == (B, 1)
    assert out["task_feats"][0].shape == (B, HIDDEN)
    assert all(bool(jnp.all(jnp.isfinite(out["probs"][t])))
               for t in range(NUM_TASKS))
    print("KERNEL_OK")
</pallas_src>

<mosaic_0001>
module attributes {stable_mosaic.version = 11 : i64} {
  func.func @kernel(%arg0: i32, %arg1: memref<16x32xf32, #tpu.memory_space<vmem>>, %arg2: memref<16x32xf32, #tpu.memory_space<vmem>>, %arg3: memref<2x32x32xbf16, #tpu.memory_space<vmem>>, %arg4: memref<2x32x32xbf16, #tpu.memory_space<vmem>>, %arg5: memref<2x12x32x32xbf16, #tpu.memory_space<vmem>>, %arg6: memref<2x14x32xf32, #tpu.memory_space<vmem>>, %arg7: memref<2x4x32xf32, #tpu.memory_space<vmem>>) attributes {dimension_semantics = [#tpu.dimension_semantics<parallel>], iteration_bounds = array<i64: 2>, scalar_prefetch = 0 : i64, scratch_operands = 0 : i64, tpu.core_type = #tpu.core_type<tc>, window_params = [{pipeline_mode = #tpu.pipeline_mode<synchronous>, transform_indices = @transform_0, window_bounds = array<i64: 16, 32>}, {pipeline_mode = #tpu.pipeline_mode<synchronous>, transform_indices = @transform_1, window_bounds = array<i64: 16, 32>}, {transform_indices = @transform_2, window_bounds = array<i64: 2, 32, 32>}, {transform_indices = @transform_3, window_bounds = array<i64: 2, 32, 32>}, {transform_indices = @transform_4, window_bounds = array<i64: 2, 12, 32, 32>}, {transform_indices = @transform_5, window_bounds = array<i64: 2, 14, 32>}, {transform_indices = @transform_6, window_bounds = array<i64: 2, 4, 32>}]} {
    %c0 = arith.constant 0 : index
    %c0_0 = arith.constant 0 : index
    %0 = vector.load %arg1[%c0, %c0_0] : memref<16x32xf32, #tpu.memory_space<vmem>>, vector<16x32xf32>
    %c0_1 = arith.constant 0 : index
    %c0_2 = arith.constant 0 : index
    %1 = vector.load %arg2[%c0_1, %c0_2] : memref<16x32xf32, #tpu.memory_space<vmem>>, vector<16x32xf32>
    %c0_3 = arith.constant 0 : index
    %c0_4 = arith.constant 0 : index
    %c0_5 = arith.constant 0 : index
    %2 = vector.load %arg6[%c0_3, %c0_4, %c0_5] : memref<2x14x32xf32, #tpu.memory_space<vmem>>, vector<1x14x32xf32>
    %3 = vector.shape_cast %2 : vector<1x14x32xf32> to vector<14x32xf32>
    %c0_6 = arith.constant 0 : index
    %c0_7 = arith.constant 0 : index
    %c0_8 = arith.constant 0 : index
    %4 = vector.load %arg3[%c0_6, %c0_7, %c0_8] : memref<2x32x32xbf16, #tpu.memory_space<vmem>>, vector<1x32x32xbf16>
    %5 = vector.shape_cast %4 : vector<1x32x32xbf16> to vector<32x32xbf16>
    %6 = arith.truncf %0 : vector<16x32xf32> to vector<16x32xbf16>
    %cst = arith.constant dense<0.000000e+00> : vector<16x32xf32>
    %7 = tpu.matmul %6, %5, %cst {dimension_numbers = #tpu.dot_dimension_numbers<[1], [0], [0], [1], [0, 0, 1, 1], [], []>} : vector<16x32xbf16>, vector<32x32xbf16>, vector<16x32xf32> -> vector<16x32xf32>
    %8 = vector.extract_strided_slice %3 {offsets = [0, 0], sizes = [1, 32], strides = [1, 1]} : vector<14x32xf32> to vector<1x32xf32>
    %9 = vector.broadcast %8 : vector<1x32xf32> to vector<16x32xf32>
    %10 = arith.addf %7, %9 : vector<16x32xf32>
    %c0_9 = arith.constant 0 : index
    %c0_10 = arith.constant 0 : index
    %c0_11 = arith.constant 0 : index
    %11 = vector.load %arg4[%c0_9, %c0_10, %c0_11] : memref<2x32x32xbf16, #tpu.memory_space<vmem>>, vector<1x32x32xbf16>
    %12 = vector.shape_cast %11 : vector<1x32x32xbf16> to vector<32x32xbf16>
    %13 = arith.truncf %1 : vector<16x32xf32> to vector<16x32xbf16>
    %cst_12 = arith.constant dense<0.000000e+00> : vector<16x32xf32>
    %14 = tpu.matmul %13, %12, %cst_12 {dimension_numbers = #tpu.dot_dimension_numbers<[1], [0], [0], [1], [0, 0, 1, 1], [], []>} : vector<16x32xbf16>, vector<32x32xbf16>, vector<16x32xf32> -> vector<16x32xf32>
    %15 = vector.extract_strided_slice %3 {offsets = [1, 0], sizes = [1, 32], strides = [1, 1]} : vector<14x32xf32> to vector<1x32xf32>
    %16 = vector.broadcast %15 : vector<1x32xf32> to vector<16x32xf32>
    %17 = arith.addf %14, %16 : vector<16x32xf32>
    %c0_13 = arith.constant 0 : index
    %c0_14 = arith.constant 0 : index
    %c0_15 = arith.constant 0 : index
    %c0_16 = arith.constant 0 : index
    %18 = vector.load %arg5[%c0_13, %c0_14, %c0_15, %c0_16] : memref<2x12x32x32xbf16, #tpu.memory_space<vmem>>, vector<1x1x32x32xbf16>
    %19 = vector.shape_cast %18 : vector<1x1x32x32xbf16> to vector<32x32xbf16>
    %20 = arith.truncf %10 : vector<16x32xf32> to vector<16x32xbf16>
    %cst_17 = arith.constant dense<0.000000e+00> : vector<16x32xf32>
    %21 = tpu.matmul %20, %19, %cst_17 {dimension_numbers = #tpu.dot_dimension_numbers<[1], [0], [0], [1], [0, 0, 1, 1], [], []>} : vector<16x32xbf16>, vector<32x32xbf16>, vector<16x32xf32> -> vector<16x32xf32>
    %22 = vector.extract_strided_slice %3 {offsets = [2, 0], sizes = [1, 32], strides = [1, 1]} : vector<14x32xf32> to vector<1x32xf32>
    %23 = vector.broadcast %22 : vector<1x32xf32> to vector<16x32xf32>
    %24 = arith.addf %21, %23 : vector<16x32xf32>
    %25 = vector.shape_cast %24 : vector<16x32xf32> to vector<2x8x32xf32>
    %c0_18 = arith.constant 0 : index
    %c1 = arith.constant 1 : index
    %c0_19 = arith.constant 0 : index
    %c0_20 = arith.constant 0 : index
    %26 = vector.load %arg5[%c0_18, %c1, %c0_19, %c0_20] : memref<2x12x32x32xbf16, #tpu.memory_space<vmem>>, vector<1x1x32x32xbf16>
    %27 = vector.shape_cast %26 : vector<1x1x32x32xbf16> to vector<32x32xbf16>
    %28 = arith.truncf %17 : vector<16x32xf32> to vector<16x32xbf16>
    %cst_21 = arith.constant dense<0.000000e+00> : vector<16x32xf32>
    %29 = tpu.matmul %28, %27, %cst_21 {dimension_numbers = #tpu.dot_dimension_numbers<[1], [0], [0], [1], [0, 0, 1, 1], [], []>} : vector<16x32xbf16>, vector<32x32xbf16>, vector<16x32xf32> -> vector<16x32xf32>
    %30 = vector.extract_strided_slice %3 {offsets = [3, 0], sizes = [1, 32], strides = [1, 1]} : vector<14x32xf32> to vector<1x32xf32>
    %31 = vector.broadcast %30 : vector<1x32xf32> to vector<16x32xf32>
    %32 = arith.addf %29, %31 : vector<16x32xf32>
    %33 = vector.shape_cast %32 : vector<16x32xf32> to vector<2x8x32xf32>
    %c0_22 = arith.constant 0 : index
    %c2 = arith.constant 2 : index
    %c0_23 = arith.constant 0 : index
    %c0_24 = arith.constant 0 : index
    %34 = vector.load %arg5[%c0_22, %c2, %c0_23, %c0_24] : memref<2x12x32x32xbf16, #tpu.memory_space<vmem>>, vector<1x1x32x32xbf16>
    %35 = vector.shape_cast %34 : vector<1x1x32x32xbf16> to vector<32x32xbf16>
    %36 = arith.truncf %17 : vector<16x32xf32> to vector<16x32xbf16>
    %cst_25 = arith.constant dense<0.000000e+00> : vector<16x32xf32>
    %37 = tpu.matmul %36, %35, %cst_25 {dimension_numbers = #tpu.dot_dimension_numbers<[1], [0], [0], [1], [0, 0, 1, 1], [], []>} : vector<16x32xbf16>, vector<32x32xbf16>, vector<16x32xf32> -> vector<16x32xf32>
    %38 = vector.extract_strided_slice %3 {offsets = [4, 0], sizes = [1, 32], strides = [1, 1]} : vector<14x32xf32> to vector<1x32xf32>
    %39 = vector.broadcast %38 : vector<1x32xf32> to vector<16x32xf32>
    %40 = arith.addf %37, %39 : vector<16x32xf32>
    %41 = vector.shape_cast %40 : vector<16x32xf32> to vector<2x8x32xf32>
    %42 = vector.extract_strided_slice %25 {offsets = [0, 0, 0], sizes = [2, 8, 8], strides = [1, 1, 1]} : vector<2x8x32xf32> to vector<2x8x8xf32>
    %43 = vector.extract_strided_slice %33 {offsets = [0, 0, 0], sizes = [2, 8, 8], strides = [1, 1, 1]} : vector<2x8x32xf32> to vector<2x8x8xf32>
    %44 = vector.extract_strided_slice %41 {offsets = [0, 0, 0], sizes = [2, 8, 8], strides = [1, 1, 1]} : vector<2x8x32xf32> to vector<2x8x8xf32>
    "tpu.trace_start"() <{level = 10 : i32, message = "bqd,bkd->bqk"}> : () -> ()
    %cst_26 = arith.constant dense<0.000000e+00> : vector<2x8x8xf32>
    %45 = tpu.matmul %42, %43, %cst_26 {dimension_numbers = #tpu.dot_dimension_numbers<[2], [2], [1], [1], [0, 0, 0, 1, 1, 1], [0], [0]>} : vector<2x8x8xf32>, vector<2x8x8xf32>, vector<2x8x8xf32> -> vector<2x8x8xf32>
    "tpu.trace_stop"() : () -> ()
    %cst_27 = arith.constant 0.353553385 : f32
    %46 = vector.broadcast %cst_27 : f32 to vector<2x8x8xf32>
    %47 = arith.mulf %45, %46 : vector<2x8x8xf32>
    %cst_28 = arith.constant dense<0xFF800000> : vector<2x8xf32>
    %48 = vector.multi_reduction <maximumf>, %47, %cst_28 [2] : vector<2x8x8xf32> to vector<2x8xf32>
    %49 = vector.shape_cast %48 : vector<2x8xf32> to vector<2x8x1xf32>
    %50 = vector.broadcast %49 : vector<2x8x1xf32> to vector<2x8x8xf32>
    %51 = arith.subf %47, %50 : vector<2x8x8xf32>
    %52 = math.exp %51 : vector<2x8x8xf32>
    %cst_29 = arith.constant dense<0.000000e+00> : vector<2x8xf32>
    %53 = vector.multi_reduction <add>, %52, %cst_29 [2] : vector<2x8x8xf32> to vector<2x8xf32>
    %54 = vector.shape_cast %53 : vector<2x8xf32> to vector<2x8x1xf32>
    %55 = tpu.reciprocal %54 {approx = true} : vector<2x8x1xf32> -> vector<2x8x1xf32>
    %56 = vector.broadcast %55 : vector<2x8x1xf32> to vector<2x8x8xf32>
    %57 = arith.mulf %52, %56 : vector<2x8x8xf32>
    "tpu.trace_start"() <{level = 10 : i32, message = "bqk,bkd->bqd"}> : () -> ()
    %cst_30 = arith.constant dense<0.000000e+00> : vector<2x8x8xf32>
    %58 = tpu.matmul %57, %44, %cst_30 {dimension_numbers = #tpu.dot_dimension_numbers<[2], [1], [1], [2], [0, 0, 0, 1, 1, 2], [0], [0]>} : vector<2x8x8xf32>, vector<2x8x8xf32>, vector<2x8x8xf32> -> vector<2x8x8xf32>
    "tpu.trace_stop"() : () -> ()
    %59 = vector.extract_strided_slice %25 {offsets = [0, 0, 8], sizes = [2, 8, 8], strides = [1, 1, 1]} : vector<2x8x32xf32> to vector<2x8x8xf32>
    %60 = vector.extract_strided_slice %33 {offsets = [0, 0, 8], sizes = [2, 8, 8], strides = [1, 1, 1]} : vector<2x8x32xf32> to vector<2x8x8xf32>
    %61 = vector.extract_strided_slice %41 {offsets = [0, 0, 8], sizes = [2, 8, 8], strides = [1, 1, 1]} : vector<2x8x32xf32> to vector<2x8x8xf32>
    "tpu.trace_start"() <{level = 10 : i32, message = "bqd,bkd->bqk"}> : () -> ()
    %cst_31 = arith.constant dense<0.000000e+00> : vector<2x8x8xf32>
    %62 = tpu.matmul %59, %60, %cst_31 {dimension_numbers = #tpu.dot_dimension_numbers<[2], [2], [1], [1], [0, 0, 0, 1, 1, 1], [0], [0]>} : vector<2x8x8xf32>, vector<2x8x8xf32>, vector<2x8x8xf32> -> vector<2x8x8xf32>
    "tpu.trace_stop"() : () -> ()
    %cst_32 = arith.constant 0.353553385 : f32
    %63 = vector.broadcast %cst_32 : f32 to vector<2x8x8xf32>
    %64 = arith.mulf %62, %63 : vector<2x8x8xf32>
    %cst_33 = arith.constant dense<0xFF800000> : vector<2x8xf32>
    %65 = vector.multi_reduction <maximumf>, %64, %cst_33 [2] : vector<2x8x8xf32> to vector<2x8xf32>
    %66 = vector.shape_cast %65 : vector<2x8xf32> to vector<2x8x1xf32>
    %67 = vector.broadcast %66 : vector<2x8x1xf32> to vector<2x8x8xf32>
    %68 = arith.subf %64, %67 : vector<2x8x8xf32>
    %69 = math.exp %68 : vector<2x8x8xf32>
    %cst_34 = arith.constant dense<0.000000e+00> : vector<2x8xf32>
    %70 = vector.multi_reduction <add>, %69, %cst_34 [2] : vector<2x8x8xf32> to vector<2x8xf32>
    %71 = vector.shape_cast %70 : vector<2x8xf32> to vector<2x8x1xf32>
    %72 = tpu.reciprocal %71 {approx = true} : vector<2x8x1xf32> -> vector<2x8x1xf32>
    %73 = vector.broadcast %72 : vector<2x8x1xf32> to vector<2x8x8xf32>
    %74 = arith.mulf %69, %73 : vector<2x8x8xf32>
    "tpu.trace_start"() <{level = 10 : i32, message = "bqk,bkd->bqd"}> : () -> ()
    %cst_35 = arith.constant dense<0.000000e+00> : vector<2x8x8xf32>
    %75 = tpu.matmul %74, %61, %cst_35 {dimension_numbers = #tpu.dot_dimension_numbers<[2], [1], [1], [2], [0, 0, 0, 1, 1, 2], [0], [0]>} : vector<2x8x8xf32>, vector<2x8x8xf32>, vector<2x8x8xf32> -> vector<2x8x8xf32>
    "tpu.trace_stop"() : () -> ()
    %76 = vector.extract_strided_slice %25 {offsets = [0, 0, 16], sizes = [2, 8, 8], strides = [1, 1, 1]} : vector<2x8x32xf32> to vector<2x8x8xf32>
    %77 = vector.extract_strided_slice %33 {offsets = [0, 0, 16], sizes = [2, 8, 8], strides = [1, 1, 1]} : vector<2x8x32xf32> to vector<2x8x8xf32>
    %78 = vector.extract_strided_slice %41 {offsets = [0, 0, 16], sizes = [2, 8, 8], strides = [1, 1, 1]} : vector<2x8x32xf32> to vector<2x8x8xf32>
    "tpu.trace_start"() <{level = 10 : i32, message = "bqd,bkd->bqk"}> : () -> ()
    %cst_36 = arith.constant dense<0.000000e+00> : vector<2x8x8xf32>
    %79 = tpu.matmul %76, %77, %cst_36 {dimension_numbers = #tpu.dot_dimension_numbers<[2], [2], [1], [1], [0, 0, 0, 1, 1, 1], [0], [0]>} : vector<2x8x8xf32>, vector<2x8x8xf32>, vector<2x8x8xf32> -> vector<2x8x8xf32>
    "tpu.trace_stop"() : () -> ()
    %cst_37 = arith.constant 0.353553385 : f32
    %80 = vector.broadcast %cst_37 : f32 to vector<2x8x8xf32>
    %81 = arith.mulf %79, %80 : vector<2x8x8xf32>
    %cst_38 = arith.constant dense<0xFF800000> : vector<2x8xf32>
    %82 = vector.multi_reduction <maximumf>, %81, %cst_38 [2] : vector<2x8x8xf32> to vector<2x8xf32>
    %83 = vector.shape_cast %82 : vector<2x8xf32> to vector<2x8x1xf32>
    %84 = vector.broadcast %83 : vector<2x8x1xf32> to vector<2x8x8xf32>
    %85 = arith.subf %81, %84 : vector<2x8x8xf32>
    %86 = math.exp %85 : vector<2x8x8xf32>
    %cst_39 = arith.constant dense<0.000000e+00> : vector<2x8xf32>
    %87 = vector.multi_reduction <add>, %86, %cst_39 [2] : vector<2x8x8xf32> to vector<2x8xf32>
    %88 = vector.shape_cast %87 : vector<2x8xf32> to vector<2x8x1xf32>
    %89 = tpu.reciprocal %88 {approx = true} : vector<2x8x1xf32> -> vector<2x8x1xf32>
    %90 = vector.broadcast %89 : vector<2x8x1xf32> to vector<2x8x8xf32>
    %91 = arith.mulf %86, %90 : vector<2x8x8xf32>
    "tpu.trace_start"() <{level = 10 : i32, message = "bqk,bkd->bqd"}> : () -> ()
    %cst_40 = arith.constant dense<0.000000e+00> : vector<2x8x8xf32>
    %92 = tpu.matmul %91, %78, %cst_40 {dimension_numbers = #tpu.dot_dimension_numbers<[2], [1], [1], [2], [0, 0, 0, 1, 1, 2], [0], [0]>} : vector<2x8x8xf32>, vector<2x8x8xf32>, vector<2x8x8xf32> -> vector<2x8x8xf32>
    "tpu.trace_stop"() : () -> ()
    %93 = vector.extract_strided_slice %25 {offsets = [0, 0, 24], sizes = [2, 8, 8], strides = [1, 1, 1]} : vector<2x8x32xf32> to vector<2x8x8xf32>
    %94 = vector.extract_strided_slice %33 {offsets = [0, 0, 24], sizes = [2, 8, 8], strides = [1, 1, 1]} : vector<2x8x32xf32> to vector<2x8x8xf32>
    %95 = vector.extract_strided_slice %41 {offsets = [0, 0, 24], sizes = [2, 8, 8], strides = [1, 1, 1]} : vector<2x8x32xf32> to vector<2x8x8xf32>
    "tpu.trace_start"() <{level = 10 : i32, message = "bqd,bkd->bqk"}> : () -> ()
    %cst_41 = arith.constant dense<0.000000e+00> : vector<2x8x8xf32>
    %96 = tpu.matmul %93, %94, %cst_41 {dimension_numbers = #tpu.dot_dimension_numbers<[2], [2], [1], [1], [0, 0, 0, 1, 1, 1], [0], [0]>} : vector<2x8x8xf32>, vector<2x8x8xf32>, vector<2x8x8xf32> -> vector<2x8x8xf32>
    "tpu.trace_stop"() : () -> ()
    %cst_42 = arith.constant 0.353553385 : f32
    %97 = vector.broadcast %cst_42 : f32 to vector<2x8x8xf32>
    %98 = arith.mulf %96, %97 : vector<2x8x8xf32>
    %cst_43 = arith.constant dense<0xFF800000> : vector<2x8xf32>
    %99 = vector.multi_reduction <maximumf>, %98, %cst_43 [2] : vector<2x8x8xf32> to vector<2x8xf32>
    %100 = vector.shape_cast %99 : vector<2x8xf32> to vector<2x8x1xf32>
    %101 = vector.broadcast %100 : vector<2x8x1xf32> to vector<2x8x8xf32>
    %102 = arith.subf %98, %101 : vector<2x8x8xf32>
    %103 = math.exp %102 : vector<2x8x8xf32>
    %cst_44 = arith.constant dense<0.000000e+00> : vector<2x8xf32>
    %104 = vector.multi_reduction <add>, %103, %cst_44 [2] : vector<2x8x8xf32> to vector<2x8xf32>
    %105 = vector.shape_cast %104 : vector<2x8xf32> to vector<2x8x1xf32>
    %106 = tpu.reciprocal %105 {approx = true} : vector<2x8x1xf32> -> vector<2x8x1xf32>
    %107 = vector.broadcast %106 : vector<2x8x1xf32> to vector<2x8x8xf32>
    %108 = arith.mulf %103, %107 : vector<2x8x8xf32>
    "tpu.trace_start"() <{level = 10 : i32, message = "bqk,bkd->bqd"}> : () -> ()
    %cst_45 = arith.constant dense<0.000000e+00> : vector<2x8x8xf32>
    %109 = tpu.matmul %108, %95, %cst_45 {dimension_numbers = #tpu.dot_dimension_numbers<[2], [1], [1], [2], [0, 0, 0, 1, 1, 2], [0], [0]>} : vector<2x8x8xf32>, vector<2x8x8xf32>, vector<2x8x8xf32> -> vector<2x8x8xf32>
    "tpu.trace_stop"() : () -> ()
    %110 = tpu.concatenate %58, %75, %92, %109 in 2 : vector<2x8x8xf32>, vector<2x8x8xf32>, vector<2x8x8xf32>, vector<2x8x8xf32> -> vector<2x8x32xf32>
    %111 = vector.shape_cast %110 : vector<2x8x32xf32> to vector<16x32xf32>
    %c0_46 = arith.constant 0 : index
    %c3 = arith.constant 3 : index
    %c0_47 = arith.constant 0 : index
    %c0_48 = arith.constant 0 : index
    %112 = vector.load %arg5[%c0_46, %c3, %c0_47, %c0_48] : memref<2x12x32x32xbf16, #tpu.memory_space<vmem>>, vector<1x1x32x32xbf16>
    %113 = vector.shape_cast %112 : vector<1x1x32x32xbf16> to vector<32x32xbf16>
    %114 = arith.truncf %111 : vector<16x32xf32> to vector<16x32xbf16>
    %cst_49 = arith.constant dense<0.000000e+00> : vector<16x32xf32>
    %115 = tpu.matmul %114, %113, %cst_49 {dimension_numbers = #tpu.dot_dimension_numbers<[1], [0], [0], [1], [0, 0, 1, 1], [], []>} : vector<16x32xbf16>, vector<32x32xbf16>, vector<16x32xf32> -> vector<16x32xf32>
    %116 = vector.extract_strided_slice %3 {offsets = [5, 0], sizes = [1, 32], strides = [1, 1]} : vector<14x32xf32> to vector<1x32xf32>
    %117 = vector.broadcast %116 : vector<1x32xf32> to vector<16x32xf32>
    %118 = arith.addf %117, %10 : vector<16x32xf32>
    %119 = arith.addf %115, %118 : vector<16x32xf32>
    %c0_50 = arith.constant 0 : index
    %c4 = arith.constant 4 : index
    %c0_51 = arith.constant 0 : index
    %c0_52 = arith.constant 0 : index
    %120 = vector.load %arg5[%c0_50, %c4, %c0_51, %c0_52] : memref<2x12x32x32xbf16, #tpu.memory_space<vmem>>, vector<1x1x32x32xbf16>
    %121 = vector.shape_cast %120 : vector<1x1x32x32xbf16> to vector<32x32xbf16>
    %122 = arith.truncf %17 : vector<16x32xf32> to vector<16x32xbf16>
    %cst_53 = arith.constant dense<0.000000e+00> : vector<16x32xf32>
    %123 = tpu.matmul %122, %121, %cst_53 {dimension_numbers = #tpu.dot_dimension_numbers<[1], [0], [0], [1], [0, 0, 1, 1], [], []>} : vector<16x32xbf16>, vector<32x32xbf16>, vector<16x32xf32> -> vector<16x32xf32>
    %124 = vector.extract_strided_slice %3 {offsets = [6, 0], sizes = [1, 32], strides = [1, 1]} : vector<14x32xf32> to vector<1x32xf32>
    %125 = vector.broadcast %124 : vector<1x32xf32> to vector<16x32xf32>
    %126 = arith.addf %123, %125 : vector<16x32xf32>
    %127 = vector.shape_cast %126 : vector<16x32xf32> to vector<2x8x32xf32>
    %c0_54 = arith.constant 0 : index
    %c5 = arith.constant 5 : index
    %c0_55 = arith.constant 0 : index
    %c0_56 = arith.constant 0 : index
    %128 = vector.load %arg5[%c0_54, %c5, %c0_55, %c0_56] : memref<2x12x32x32xbf16, #tpu.memory_space<vmem>>, vector<1x1x32x32xbf16>
    %129 = vector.shape_cast %128 : vector<1x1x32x32xbf16> to vector<32x32xbf16>
    %130 = arith.truncf %10 : vector<16x32xf32> to vector<16x32xbf16>
    %cst_57 = arith.constant dense<0.000000e+00> : vector<16x32xf32>
    %131 = tpu.matmul %130, %129, %cst_57 {dimension_numbers = #tpu.dot_dimension_numbers<[1], [0], [0], [1], [0, 0, 1, 1], [], []>} : vector<16x32xbf16>, vector<32x32xbf16>, vector<16x32xf32> -> vector<16x32xf32>
    %132 = vector.extract_strided_slice %3 {offsets = [7, 0], sizes = [1, 32], strides = [1, 1]} : vector<14x32xf32> to vector<1x32xf32>
    %133 = vector.broadcast %132 : vector<1x32xf32> to vector<16x32xf32>
    %134 = arith.addf %131, %133 : vector<16x32xf32>
    %135 = vector.shape_cast %134 : vector<16x32xf32> to vector<2x8x32xf32>
    %c0_58 = arith.constant 0 : index
    %c6 = arith.constant 6 : index
    %c0_59 = arith.constant 0 : index
    %c0_60 = arith.constant 0 : index
    %136 = vector.load %arg5[%c0_58, %c6, %c0_59, %c0_60] : memref<2x12x32x32xbf16, #tpu.memory_space<vmem>>, vector<1x1x32x32xbf16>
    %137 = vector.shape_cast %136 : vector<1x1x32x32xbf16> to vector<32x32xbf16>
    %138 = arith.truncf %10 : vector<16x32xf32> to vector<16x32xbf16>
    %cst_61 = arith.constant dense<0.000000e+00> : vector<16x32xf32>
    %139 = tpu.matmul %138, %137, %cst_61 {dimension_numbers = #tpu.dot_dimension_numbers<[1], [0], [0], [1], [0, 0, 1, 1], [], []>} : vector<16x32xbf16>, vector<32x32xbf16>, vector<16x32xf32> -> vector<16x32xf32>
    %140 = vector.extract_strided_slice %3 {offsets = [8, 0], sizes = [1, 32], strides = [1, 1]} : vector<14x32xf32> to vector<1x32xf32>
    %141 = vector.broadcast %140 : vector<1x32xf32> to vector<16x32xf32>
    %142 = arith.addf %139, %141 : vector<16x32xf32>
    %143 = vector.shape_cast %142 : vector<16x32xf32> to vector<2x8x32xf32>
    %144 = vector.extract_strided_slice %127 {offsets = [0, 0, 0], sizes = [2, 8, 8], strides = [1, 1, 1]} : vector<2x8x32xf32> to vector<2x8x8xf32>
    %145 = vector.extract_strided_slice %135 {offsets = [0, 0, 0], sizes = [2, 8, 8], strides = [1, 1, 1]} : vector<2x8x32xf32> to vector<2x8x8xf32>
    %146 = vector.extract_strided_slice %143 {offsets = [0, 0, 0], sizes = [2, 8, 8], strides = [1, 1, 1]} : vector<2x8x32xf32> to vector<2x8x8xf32>
    "tpu.trace_start"() <{level = 10 : i32, message = "bqd,bkd->bqk"}> : () -> ()
    %cst_62 = arith.constant dense<0.000000e+00> : vector<2x8x8xf32>
    %147 = tpu.matmul %144, %145, %cst_62 {dimension_numbers = #tpu.dot_dimension_numbers<[2], [2], [1], [1], [0, 0, 0, 1, 1, 1], [0], [0]>} : vector<2x8x8xf32>, vector<2x8x8xf32>, vector<2x8x8xf32> -> vector<2x8x8xf32>
    "tpu.trace_stop"() : () -> ()
    %cst_63 = arith.constant 0.353553385 : f32
    %148 = vector.broadcast %cst_63 : f32 to vector<2x8x8xf32>
    %149 = arith.mulf %147, %148 : vector<2x8x8xf32>
    %cst_64 = arith.constant dense<0xFF800000> : vector<2x8xf32>
    %150 = vector.multi_reduction <maximumf>, %149, %cst_64 [2] : vector<2x8x8xf32> to vector<2x8xf32>
    %151 = vector.shape_cast %150 : vector<2x8xf32> to vector<2x8x1xf32>
    %152 = vector.broadcast %151 : vector<2x8x1xf32> to vector<2x8x8xf32>
    %153 = arith.subf %149, %152 : vector<2x8x8xf32>
    %154 = math.exp %153 : vector<2x8x8xf32>
    %cst_65 = arith.constant dense<0.000000e+00> : vector<2x8xf32>
    %155 = vector.multi_reduction <add>, %154, %cst_65 [2] : vector<2x8x8xf32> to vector<2x8xf32>
    %156 = vector.shape_cast %155 : vector<2x8xf32> to vector<2x8x1xf32>
    %157 = tpu.reciprocal %156 {approx = true} : vector<2x8x1xf32> -> vector<2x8x1xf32>
    %158 = vector.broadcast %157 : vector<2x8x1xf32> to vector<2x8x8xf32>
    %159 = arith.mulf %154, %158 : vector<2x8x8xf32>
    "tpu.trace_start"() <{level = 10 : i32, message = "bqk,bkd->bqd"}> : () -> ()
    %cst_66 = arith.constant dense<0.000000e+00> : vector<2x8x8xf32>
    %160 = tpu.matmul %159, %146, %cst_66 {dimension_numbers = #tpu.dot_dimension_numbers<[2], [1], [1], [2], [0, 0, 0, 1, 1, 2], [0], [0]>} : vector<2x8x8xf32>, vector<2x8x8xf32>, vector<2x8x8xf32> -> vector<2x8x8xf32>
    "tpu.trace_stop"() : () -> ()
    %161 = vector.extract_strided_slice %127 {offsets = [0, 0, 8], sizes = [2, 8, 8], strides = [1, 1, 1]} : vector<2x8x32xf32> to vector<2x8x8xf32>
    %162 = vector.extract_strided_slice %135 {offsets = [0, 0, 8], sizes = [2, 8, 8], strides = [1, 1, 1]} : vector<2x8x32xf32> to vector<2x8x8xf32>
    %163 = vector.extract_strided_slice %143 {offsets = [0, 0, 8], sizes = [2, 8, 8], strides = [1, 1, 1]} : vector<2x8x32xf32> to vector<2x8x8xf32>
    "tpu.trace_start"() <{level = 10 : i32, message = "bqd,bkd->bqk"}> : () -> ()
    %cst_67 = arith.constant dense<0.000000e+00> : vector<2x8x8xf32>
    %164 = tpu.matmul %161, %162, %cst_67 {dimension_numbers = #tpu.dot_dimension_numbers<[2], [2], [1], [1], [0, 0, 0, 1, 1, 1], [0], [0]>} : vector<2x8x8xf32>, vector<2x8x8xf32>, vector<2x8x8xf32> -> vector<2x8x8xf32>
    "tpu.trace_stop"() : () -> ()
    %cst_68 = arith.constant 0.353553385 : f32
    %165 = vector.broadcast %cst_68 : f32 to vector<2x8x8xf32>
    %166 = arith.mulf %164, %165 : vector<2x8x8xf32>
    %cst_69 = arith.constant dense<0xFF800000> : vector<2x8xf32>
    %167 = vector.multi_reduction <maximumf>, %166, %cst_69 [2] : vector<2x8x8xf32> to vector<2x8xf32>
    %168 = vector.shape_cast %167 : vector<2x8xf32> to vector<2x8x1xf32>
    %169 = vector.broadcast %168 : vector<2x8x1xf32> to vector<2x8x8xf32>
    %170 = arith.subf %166, %169 : vector<2x8x8xf32>
    %171 = math.exp %170 : vector<2x8x8xf32>
    %cst_70 = arith.constant dense<0.000000e+00> : vector<2x8xf32>
    %172 = vector.multi_reduction <add>, %171, %cst_70 [2] : vector<2x8x8xf32> to vector<2x8xf32>
    %173 = vector.shape_cast %172 : vector<2x8xf32> to vector<2x8x1xf32>
    %174 = tpu.reciprocal %173 {approx = true} : vector<2x8x1xf32> -> vector<2x8x1xf32>
    %175 = vector.broadcast %174 : vector<2x8x1xf32> to vector<2x8x8xf32>
    %176 = arith.mulf %171, %175 : vector<2x8x8xf32>
    "tpu.trace_start"() <{level = 10 : i32, message = "bqk,bkd->bqd"}> : () -> ()
    %cst_71 = arith.constant dense<0.000000e+00> : vector<2x8x8xf32>
    %177 = tpu.matmul %176, %163, %cst_71 {dimension_numbers = #tpu.dot_dimension_numbers<[2], [1], [1], [2], [0, 0, 0, 1, 1, 2], [0], [0]>} : vector<2x8x8xf32>, vector<2x8x8xf32>, vector<2x8x8xf32> -> vector<2x8x8xf32>
    "tpu.trace_stop"() : () -> ()
    %178 = vector.extract_strided_slice %127 {offsets = [0, 0, 16], sizes = [2, 8, 8], strides = [1, 1, 1]} : vector<2x8x32xf32> to vector<2x8x8xf32>
    %179 = vector.extract_strided_slice %135 {offsets = [0, 0, 16], sizes = [2, 8, 8], strides = [1, 1, 1]} : vector<2x8x32xf32> to vector<2x8x8xf32>
    %180 = vector.extract_strided_slice %143 {offsets = [0, 0, 16], sizes = [2, 8, 8], strides = [1, 1, 1]} : vector<2x8x32xf32> to vector<2x8x8xf32>
    "tpu.trace_start"() <{level = 10 : i32, message = "bqd,bkd->bqk"}> : () -> ()
    %cst_72 = arith.constant dense<0.000000e+00> : vector<2x8x8xf32>
    %181 = tpu.matmul %178, %179, %cst_72 {dimension_numbers = #tpu.dot_dimension_numbers<[2], [2], [1], [1], [0, 0, 0, 1, 1, 1], [0], [0]>} : vector<2x8x8xf32>, vector<2x8x8xf32>, vector<2x8x8xf32> -> vector<2x8x8xf32>
    "tpu.trace_stop"() : () -> ()
    %cst_73 = arith.constant 0.353553385 : f32
    %182 = vector.broadcast %cst_73 : f32 to vector<2x8x8xf32>
    %183 = arith.mulf %181, %182 : vector<2x8x8xf32>
    %cst_74 = arith.constant dense<0xFF800000> : vector<2x8xf32>
    %184 = vector.multi_reduction <maximumf>, %183, %cst_74 [2] : vector<2x8x8xf32> to vector<2x8xf32>
    %185 = vector.shape_cast %184 : vector<2x8xf32> to vector<2x8x1xf32>
    %186 = vector.broadcast %185 : vector<2x8x1xf32> to vector<2x8x8xf32>
    %187 = arith.subf %183, %186 : vector<2x8x8xf32>
    %188 = math.exp %187 : vector<2x8x8xf32>
    %cst_75 = arith.constant dense<0.000000e+00> : vector<2x8xf32>
    %189 = vector.multi_reduction <add>, %188, %cst_75 [2] : vector<2x8x8xf32> to vector<2x8xf32>
    %190 = vector.shape_cast %189 : vector<2x8xf32> to vector<2x8x1xf32>
    %191 = tpu.reciprocal %190 {approx = true} : vector<2x8x1xf32> -> vector<2x8x1xf32>
    %192 = vector.broadcast %191 : vector<2x8x1xf32> to vector<2x8x8xf32>
    %193 = arith.mulf %188, %192 : vector<2x8x8xf32>
    "tpu.trace_start"() <{level = 10 : i32, message = "bqk,bkd->bqd"}> : () -> ()
    %cst_76 = arith.constant dense<0.000000e+00> : vector<2x8x8xf32>
    %194 = tpu.matmul %193, %180, %cst_76 {dimension_numbers = #tpu.dot_dimension_numbers<[2], [1], [1], [2], [0, 0, 0, 1, 1, 2], [0], [0]>} : vector<2x8x8xf32>, vector<2x8x8xf32>, vector<2x8x8xf32> -> vector<2x8x8xf32>
    "tpu.trace_stop"() : () -> ()
    %195 = vector.extract_strided_slice %127 {offsets = [0, 0, 24], sizes = [2, 8, 8], strides = [1, 1, 1]} : vector<2x8x32xf32> to vector<2x8x8xf32>
    %196 = vector.extract_strided_slice %135 {offsets = [0, 0, 24], sizes = [2, 8, 8], strides = [1, 1, 1]} : vector<2x8x32xf32> to vector<2x8x8xf32>
    %197 = vector.extract_strided_slice %143 {offsets = [0, 0, 24], sizes = [2, 8, 8], strides = [1, 1, 1]} : vector<2x8x32xf32> to vector<2x8x8xf32>
    "tpu.trace_start"() <{level = 10 : i32, message = "bqd,bkd->bqk"}> : () -> ()
    %cst_77 = arith.constant dense<0.000000e+00> : vector<2x8x8xf32>
    %198 = tpu.matmul %195, %196, %cst_77 {dimension_numbers = #tpu.dot_dimension_numbers<[2], [2], [1], [1], [0, 0, 0, 1, 1, 1], [0], [0]>} : vector<2x8x8xf32>, vector<2x8x8xf32>, vector<2x8x8xf32> -> vector<2x8x8xf32>
    "tpu.trace_stop"() : () -> ()
    %cst_78 = arith.constant 0.353553385 : f32
    %199 = vector.broadcast %cst_78 : f32 to vector<2x8x8xf32>
    %200 = arith.mulf %198, %199 : vector<2x8x8xf32>
    %cst_79 = arith.constant dense<0xFF800000> : vector<2x8xf32>
    %201 = vector.multi_reduction <maximumf>, %200, %cst_79 [2] : vector<2x8x8xf32> to vector<2x8xf32>
    %202 = vector.shape_cast %201 : vector<2x8xf32> to vector<2x8x1xf32>
    %203 = vector.broadcast %202 : vector<2x8x1xf32> to vector<2x8x8xf32>
    %204 = arith.subf %200, %203 : vector<2x8x8xf32>
    %205 = math.exp %204 : vector<2x8x8xf32>
    %cst_80 = arith.constant dense<0.000000e+00> : vector<2x8xf32>
    %206 = vector.multi_reduction <add>, %205, %cst_80 [2] : vector<2x8x8xf32> to vector<2x8xf32>
    %207 = vector.shape_cast %206 : vector<2x8xf32> to vector<2x8x1xf32>
    %208 = tpu.reciprocal %207 {approx = true} : vector<2x8x1xf32> -> vector<2x8x1xf32>
    %209 = vector.broadcast %208 : vector<2x8x1xf32> to vector<2x8x8xf32>
    %210 = arith.mulf %205, %209 : vector<2x8x8xf32>
    "tpu.trace_start"() <{level = 10 : i32, message = "bqk,bkd->bqd"}> : () -> ()
    %cst_81 = arith.constant dense<0.000000e+00> : vector<2x8x8xf32>
    %211 = tpu.matmul %210, %197, %cst_81 {dimension_numbers = #tpu.dot_dimension_numbers<[2], [1], [1], [2], [0, 0, 0, 1, 1, 2], [0], [0]>} : vector<2x8x8xf32>, vector<2x8x8xf32>, vector<2x8x8xf32> -> vector<2x8x8xf32>
    "tpu.trace_stop"() : () -> ()
    %212 = tpu.concatenate %160, %177, %194, %211 in 2 : vector<2x8x8xf32>, vector<2x8x8xf32>, vector<2x8x8xf32>, vector<2x8x8xf32> -> vector<2x8x32xf32>
    %213 = vector.shape_cast %212 : vector<2x8x32xf32> to vector<16x32xf32>
    %c0_82 = arith.constant 0 : index
    %c7 = arith.constant 7 : index
    %c0_83 = arith.constant 0 : index
    %c0_84 = arith.constant 0 : index
    %214 = vector.load %arg5[%c0_82, %c7, %c0_83, %c0_84] : memref<2x12x32x32xbf16, #tpu.memory_space<vmem>>, vector<1x1x32x32xbf16>
    %215 = vector.shape_cast %214 : vector<1x1x32x32xbf16> to vector<32x32xbf16>
    %216 = arith.truncf %213 : vector<16x32xf32> to vector<16x32xbf16>
    %cst_85 = arith.constant dense<0.000000e+00> : vector<16x32xf32>
    %217 = tpu.matmul %216, %215, %cst_85 {dimension_numbers = #tpu.dot_dimension_numbers<[1], [0], [0], [1], [0, 0, 1, 1], [], []>} : vector<16x32xbf16>, vector<32x32xbf16>, vector<16x32xf32> -> vector<16x32xf32>
    %218 = vector.extract_strided_slice %3 {offsets = [9, 0], sizes = [1, 32], strides = [1, 1]} : vector<14x32xf32> to vector<1x32xf32>
    %219 = vector.broadcast %218 : vector<1x32xf32> to vector<16x32xf32>
    %220 = arith.addf %219, %17 : vector<16x32xf32>
    %221 = arith.addf %217, %220 : vector<16x32xf32>
    %222 = vector.shape_cast %119 : vector<16x32xf32> to vector<2x8x32xf32>
    %cst_86 = arith.constant dense<0.000000e+00> : vector<2x32xf32>
    %223 = vector.multi_reduction <add>, %222, %cst_86 [1] : vector<2x8x32xf32> to vector<2x32xf32>
    %cst_87 = arith.constant 8.000000e+00 : f32
    %224 = vector.broadcast %cst_87 : f32 to vector<2x32xf32>
    %225 = arith.divf %223, %224 : vector<2x32xf32>
    %226 = vector.shape_cast %221 : vector<16x32xf32> to vector<2x8x32xf32>
    %cst_88 = arith.constant dense<0.000000e+00> : vector<2x32xf32>
    %227 = vector.multi_reduction <add>, %226, %cst_88 [1] : vector<2x8x32xf32> to vector<2x32xf32>
    %cst_89 = arith.constant 8.000000e+00 : f32
    %228 = vector.broadcast %cst_89 : f32 to vector<2x32xf32>
    %229 = arith.divf %227, %228 : vector<2x32xf32>
    %c0_90 = arith.constant 0 : index
    %c8 = arith.constant 8 : index
    %c0_91 = arith.constant 0 : index
    %c0_92 = arith.constant 0 : index
    %230 = vector.load %arg5[%c0_90, %c8, %c0_91, %c0_92] : memref<2x12x32x32xbf16, #tpu.memory_space<vmem>>, vector<1x1x32x32xbf16>
    %231 = vector.shape_cast %230 : vector<1x1x32x32xbf16> to vector<32x32xbf16>
    %232 = arith.truncf %229 : vector<2x32xf32> to vector<2x32xbf16>
    %cst_93 = arith.constant dense<0.000000e+00> : vector<2x32xf32>
    %233 = tpu.matmul %232, %231, %cst_93 {dimension_numbers = #tpu.dot_dimension_numbers<[1], [0], [0], [1], [0, 0, 1, 1], [], []>} : vector<2x32xbf16>, vector<32x32xbf16>, vector<2x32xf32> -> vector<2x32xf32>
    %234 = vector.extract_strided_slice %3 {offsets = [10, 0], sizes = [1, 32], strides = [1, 1]} : vector<14x32xf32> to vector<1x32xf32>
    %235 = vector.broadcast %234 : vector<1x32xf32> to vector<2x32xf32>
    %236 = arith.addf %233, %235 : vector<2x32xf32>
    %c0_94 = arith.constant 0 : index
    %c9 = arith.constant 9 : index
    %c0_95 = arith.constant 0 : index
    %c0_96 = arith.constant 0 : index
    %237 = vector.load %arg5[%c0_94, %c9, %c0_95, %c0_96] : memref<2x12x32x32xbf16, #tpu.memory_space<vmem>>, vector<1x1x32x32xbf16>
    %238 = vector.shape_cast %237 : vector<1x1x32x32xbf16> to vector<32x32xbf16>
    %239 = arith.truncf %229 : vector<2x32xf32> to vector<2x32xbf16>
    %cst_97 = arith.constant dense<0.000000e+00> : vector<2x32xf32>
    %240 = tpu.matmul %239, %238, %cst_97 {dimension_numbers = #tpu.dot_dimension_numbers<[1], [0], [0], [1], [0, 0, 1, 1], [], []>} : vector<2x32xbf16>, vector<32x32xbf16>, vector<2x32xf32> -> vector<2x32xf32>
    %241 = vector.extract_strided_slice %3 {offsets = [11, 0], sizes = [1, 32], strides = [1, 1]} : vector<14x32xf32> to vector<1x32xf32>
    %242 = vector.broadcast %241 : vector<1x32xf32> to vector<2x32xf32>
    %243 = arith.addf %240, %242 : vector<2x32xf32>
    %244 = arith.mulf %236, %225 : vector<2x32xf32>
    %245 = arith.addf %244, %243 : vector<2x32xf32>
    %246 = arith.mulf %245, %245 : vector<2x32xf32>
    %247 = arith.mulf %245, %246 : vector<2x32xf32>
    %cst_98 = arith.constant 4.471500e-02 : f32
    %248 = vector.broadcast %cst_98 : f32 to vector<2x32xf32>
    %249 = arith.mulf %248, %247 : vector<2x32xf32>
    %250 = arith.addf %245, %249 : vector<2x32xf32>
    %cst_99 = arith.constant 0.797884583 : f32
    %251 = vector.broadcast %cst_99 : f32 to vector<2x32xf32>
    %252 = arith.mulf %251, %250 : vector<2x32xf32>
    %253 = math.tanh %252 : vector<2x32xf32>
    %cst_100 = arith.constant 1.000000e+00 : f32
    %254 = vector.broadcast %cst_100 : f32 to vector<2x32xf32>
    %255 = arith.addf %254, %253 : vector<2x32xf32>
    %cst_101 = arith.constant 5.000000e-01 : f32
    %256 = vector.broadcast %cst_101 : f32 to vector<2x32xf32>
    %257 = arith.mulf %256, %255 : vector<2x32xf32>
    %258 = arith.mulf %245, %257 : vector<2x32xf32>
    %c0_102 = arith.constant 0 : index
    %c10 = arith.constant 10 : index
    %c0_103 = arith.constant 0 : index
    %c0_104 = arith.constant 0 : index
    %259 = vector.load %arg5[%c0_102, %c10, %c0_103, %c0_104] : memref<2x12x32x32xbf16, #tpu.memory_space<vmem>>, vector<1x1x32x32xbf16>
    %260 = vector.shape_cast %259 : vector<1x1x32x32xbf16> to vector<32x32xbf16>
    %261 = arith.truncf %258 : vector<2x32xf32> to vector<2x32xbf16>
    %cst_105 = arith.constant dense<0.000000e+00> : vector<2x32xf32>
    %262 = tpu.matmul %261, %260, %cst_105 {dimension_numbers = #tpu.dot_dimension_numbers<[1], [0], [0], [1], [0, 0, 1, 1], [], []>} : vector<2x32xbf16>, vector<32x32xbf16>, vector<2x32xf32> -> vector<2x32xf32>
    %263 = vector.extract_strided_slice %3 {offsets = [12, 0], sizes = [1, 32], strides = [1, 1]} : vector<14x32xf32> to vector<1x32xf32>
    %264 = vector.broadcast %263 : vector<1x32xf32> to vector<2x32xf32>
    %265 = arith.addf %262, %264 : vector<2x32xf32>
    %c0_106 = arith.constant 0 : index
    %c11 = arith.constant 11 : index
    %c0_107 = arith.constant 0 : index
    %c0_108 = arith.constant 0 : index
    %266 = vector.load %arg5[%c0_106, %c11, %c0_107, %c0_108] : memref<2x12x32x32xbf16, #tpu.memory_space<vmem>>, vector<1x1x32x32xbf16>
    %267 = vector.shape_cast %266 : vector<1x1x32x32xbf16> to vector<32x32xbf16>
    %268 = arith.truncf %265 : vector<2x32xf32> to vector<2x32xbf16>
    %cst_109 = arith.constant dense<0.000000e+00> : vector<2x32xf32>
    %269 = tpu.matmul %268, %267, %cst_109 {dimension_numbers = #tpu.dot_dimension_numbers<[1], [0], [0], [1], [0, 0, 1, 1], [], []>} : vector<2x32xbf16>, vector<32x32xbf16>, vector<2x32xf32> -> vector<2x32xf32>
    %270 = vector.extract_strided_slice %3 {offsets = [13, 0], sizes = [1, 32], strides = [1, 1]} : vector<14x32xf32> to vector<1x32xf32>
    %271 = vector.broadcast %270 : vector<1x32xf32> to vector<2x32xf32>
    %272 = arith.addf %269, %271 : vector<2x32xf32>
    %273 = tpu.concatenate %265, %272 in 0 : vector<2x32xf32>, vector<2x32xf32> -> vector<4x32xf32>
    %c0_110 = arith.constant 0 : index
    %c0_111 = arith.constant 0 : index
    %c0_112 = arith.constant 0 : index
    %274 = vector.load %arg7[%c0_110, %c0_111, %c0_112] : memref<2x4x32xf32, #tpu.memory_space<vmem>>, vector<1x4x32xf32>
    %275 = vector.shape_cast %274 : vector<1x4x32xf32> to vector<4x32xf32>
    %276 = vector.shape_cast %273 : vector<4x32xf32> to vector<1x4x32xf32>
    tpu.vector_store %arg7[%c0_110, %c0_111, %c0_112], %276 {strides = array<i32>} : memref<2x4x32xf32, #tpu.memory_space<vmem>>, vector<1x4x32xf32>,
    %c1_113 = arith.constant 1 : index
    %c0_114 = arith.constant 0 : index
    %c0_115 = arith.constant 0 : index
    %277 = vector.load %arg6[%c1_113, %c0_114, %c0_115] : memref<2x14x32xf32, #tpu.memory_space<vmem>>, vector<1x14x32xf32>
    %278 = vector.shape_cast %277 : vector<1x14x32xf32> to vector<14x32xf32>
    %c1_116 = arith.constant 1 : index
    %c0_117 = arith.constant 0 : index
    %c0_118 = arith.constant 0 : index
    %279 = vector.load %arg3[%c1_116, %c0_117, %c0_118] : memref<2x32x32xbf16, #tpu.memory_space<vmem>>, vector<1x32x32xbf16>
    %280 = vector.shape_cast %279 : vector<1x32x32xbf16> to vector<32x32xbf16>
    %281 = arith.truncf %0 : vector<16x32xf32> to vector<16x32xbf16>
    %cst_119 = arith.constant dense<0.000000e+00> : vector<16x32xf32>
    %282 = tpu.matmul %281, %280, %cst_119 {dimension_numbers = #tpu.dot_dimension_numbers<[1], [0], [0], [1], [0, 0, 1, 1], [], []>} : vector<16x32xbf16>, vector<32x32xbf16>, vector<16x32xf32> -> vector<16x32xf32>
    %283 = vector.extract_strided_slice %278 {offsets = [0, 0], sizes = [1, 32], strides = [1, 1]} : vector<14x32xf32> to vector<1x32xf32>
    %284 = vector.broadcast %283 : vector<1x32xf32> to vector<16x32xf32>
    %285 = arith.addf %282, %284 : vector<16x32xf32>
    %c1_120 = arith.constant 1 : index
    %c0_121 = arith.constant 0 : index
    %c0_122 = arith.constant 0 : index
    %286 = vector.load %arg4[%c1_120, %c0_121, %c0_122] : memref<2x32x32xbf16, #tpu.memory_space<vmem>>, vector<1x32x32xbf16>
    %287 = vector.shape_cast %286 : vector<1x32x32xbf16> to vector<32x32xbf16>
    %288 = arith.truncf %1 : vector<16x32xf32> to vector<16x32xbf16>
    %cst_123 = arith.constant dense<0.000000e+00> : vector<16x32xf32>
    %289 = tpu.matmul %288, %287, %cst_123 {dimension_numbers = #tpu.dot_dimension_numbers<[1], [0], [0], [1], [0, 0, 1, 1], [], []>} : vector<16x32xbf16>, vector<32x32xbf16>, vector<16x32xf32> -> vector<16x32xf32>
    %290 = vector.extract_strided_slice %278 {offsets = [1, 0], sizes = [1, 32], strides = [1, 1]} : vector<14x32xf32> to vector<1x32xf32>
    %291 = vector.broadcast %290 : vector<1x32xf32> to vector<16x32xf32>
    %292 = arith.addf %289, %291 : vector<16x32xf32>
    %c1_124 = arith.constant 1 : index
    %c0_125 = arith.constant 0 : index
    %c0_126 = arith.constant 0 : index
    %c0_127 = arith.constant 0 : index
    %293 = vector.load %arg5[%c1_124, %c0_125, %c0_126, %c0_127] : memref<2x12x32x32xbf16, #tpu.memory_space<vmem>>, vector<1x1x32x32xbf16>
    %294 = vector.shape_cast %293 : vector<1x1x32x32xbf16> to vector<32x32xbf16>
    %295 = arith.truncf %285 : vector<16x32xf32> to vector<16x32xbf16>
    %cst_128 = arith.constant dense<0.000000e+00> : vector<16x32xf32>
    %296 = tpu.matmul %295, %294, %cst_128 {dimension_numbers = #tpu.dot_dimension_numbers<[1], [0], [0], [1], [0, 0, 1, 1], [], []>} : vector<16x32xbf16>, vector<32x32xbf16>, vector<16x32xf32> -> vector<16x32xf32>
    %297 = vector.extract_strided_slice %278 {offsets = [2, 0], sizes = [1, 32], strides = [1, 1]} : vector<14x32xf32> to vector<1x32xf32>
    %298 = vector.broadcast %297 : vector<1x32xf32> to vector<16x32xf32>
    %299 = arith.addf %296, %298 : vector<16x32xf32>
    %300 = vector.shape_cast %299 : vector<16x32xf32> to vector<2x8x32xf32>
    %c1_129 = arith.constant 1 : index
    %c1_130 = arith.constant 1 : index
    %c0_131 = arith.constant 0 : index
    %c0_132 = arith.constant 0 : index
    %301 = vector.load %arg5[%c1_129, %c1_130, %c0_131, %c0_132] : memref<2x12x32x32xbf16, #tpu.memory_space<vmem>>, vector<1x1x32x32xbf16>
    %302 = vector.shape_cast %301 : vector<1x1x32x32xbf16> to vector<32x32xbf16>
    %303 = arith.truncf %292 : vector<16x32xf32> to vector<16x32xbf16>
    %cst_133 = arith.constant dense<0.000000e+00> : vector<16x32xf32>
    %304 = tpu.matmul %303, %302, %cst_133 {dimension_numbers = #tpu.dot_dimension_numbers<[1], [0], [0], [1], [0, 0, 1, 1], [], []>} : vector<16x32xbf16>, vector<32x32xbf16>, vector<16x32xf32> -> vector<16x32xf32>
    %305 = vector.extract_strided_slice %278 {offsets = [3, 0], sizes = [1, 32], strides = [1, 1]} : vector<14x32xf32> to vector<1x32xf32>
    %306 = vector.broadcast %305 : vector<1x32xf32> to vector<16x32xf32>
    %307 = arith.addf %304, %306 : vector<16x32xf32>
    %308 = vector.shape_cast %307 : vector<16x32xf32> to vector<2x8x32xf32>
    %c1_134 = arith.constant 1 : index
    %c2_135 = arith.constant 2 : index
    %c0_136 = arith.constant 0 : index
    %c0_137 = arith.constant 0 : index
    %309 = vector.load %arg5[%c1_134, %c2_135, %c0_136, %c0_137] : memref<2x12x32x32xbf16, #tpu.memory_space<vmem>>, vector<1x1x32x32xbf16>
    %310 = vector.shape_cast %309 : vector<1x1x32x32xbf16> to vector<32x32xbf16>
    %311 = arith.truncf %292 : vector<16x32xf32> to vector<16x32xbf16>
    %cst_138 = arith.constant dense<0.000000e+00> : vector<16x32xf32>
    %312 = tpu.matmul %311, %310, %cst_138 {dimension_numbers = #tpu.dot_dimension_numbers<[1], [0], [0], [1], [0, 0, 1, 1], [], []>} : vector<16x32xbf16>, vector<32x32xbf16>, vector<16x32xf32> -> vector<16x32xf32>
    %313 = vector.extract_strided_slice %278 {offsets = [4, 0], sizes = [1, 32], strides = [1, 1]} : vector<14x32xf32> to vector<1x32xf32>
    %314 = vector.broadcast %313 : vector<1x32xf32> to vector<16x32xf32>
    %315 = arith.addf %312, %314 : vector<16x32xf32>
    %316 = vector.shape_cast %315 : vector<16x32xf32> to vector<2x8x32xf32>
    %317 = vector.extract_strided_slice %300 {offsets = [0, 0, 0], sizes = [2, 8, 8], strides = [1, 1, 1]} : vector<2x8x32xf32> to vector<2x8x8xf32>
    %318 = vector.extract_strided_slice %308 {offsets = [0, 0, 0], sizes = [2, 8, 8], strides = [1, 1, 1]} : vector<2x8x32xf32> to vector<2x8x8xf32>
    %319 = vector.extract_strided_slice %316 {offsets = [0, 0, 0], sizes = [2, 8, 8], strides = [1, 1, 1]} : vector<2x8x32xf32> to vector<2x8x8xf32>
    "tpu.trace_start"() <{level = 10 : i32, message = "bqd,bkd->bqk"}> : () -> ()
    %cst_139 = arith.constant dense<0.000000e+00> : vector<2x8x8xf32>
    %320 = tpu.matmul %317, %318, %cst_139 {dimension_numbers = #tpu.dot_dimension_numbers<[2], [2], [1], [1], [0, 0, 0, 1, 1, 1], [0], [0]>} : vector<2x8x8xf32>, vector<2x8x8xf32>, vector<2x8x8xf32> -> vector<2x8x8xf32>
    "tpu.trace_stop"() : () -> ()
    %cst_140 = arith.constant 0.353553385 : f32
    %321 = vector.broadcast %cst_140 : f32 to vector<2x8x8xf32>
    %322 = arith.mulf %320, %321 : vector<2x8x8xf32>
    %cst_141 = arith.constant dense<0xFF800000> : vector<2x8xf32>
    %323 = vector.multi_reduction <maximumf>, %322, %cst_141 [2] : vector<2x8x8xf32> to vector<2x8xf32>
    %324 = vector.shape_cast %323 : vector<2x8xf32> to vector<2x8x1xf32>
    %325 = vector.broadcast %324 : vector<2x8x1xf32> to vector<2x8x8xf32>
    %326 = arith.subf %322, %325 : vector<2x8x8xf32>
    %327 = math.exp %326 : vector<2x8x8xf32>
    %cst_142 = arith.constant dense<0.000000e+00> : vector<2x8xf32>
    %328 = vector.multi_reduction <add>, %327, %cst_142 [2] : vector<2x8x8xf32> to vector<2x8xf32>
    %329 = vector.shape_cast %328 : vector<2x8xf32> to vector<2x8x1xf32>
    %330 = tpu.reciprocal %329 {approx = true} : vector<2x8x1xf32> -> vector<2x8x1xf32>
    %331 = vector.broadcast %330 : vector<2x8x1xf32> to vector<2x8x8xf32>
    %332 = arith.mulf %327, %331 : vector<2x8x8xf32>
    "tpu.trace_start"() <{level = 10 : i32, message = "bqk,bkd->bqd"}> : () -> ()
    %cst_143 = arith.constant dense<0.000000e+00> : vector<2x8x8xf32>
    %333 = tpu.matmul %332, %319, %cst_143 {dimension_numbers = #tpu.dot_dimension_numbers<[2], [1], [1], [2], [0, 0, 0, 1, 1, 2], [0], [0]>} : vector<2x8x8xf32>, vector<2x8x8xf32>, vector<2x8x8xf32> -> vector<2x8x8xf32>
    "tpu.trace_stop"() : () -> ()
    %334 = vector.extract_strided_slice %300 {offsets = [0, 0, 8], sizes = [2, 8, 8], strides = [1, 1, 1]} : vector<2x8x32xf32> to vector<2x8x8xf32>
    %335 = vector.extract_strided_slice %308 {offsets = [0, 0, 8], sizes = [2, 8, 8], strides = [1, 1, 1]} : vector<2x8x32xf32> to vector<2x8x8xf32>
    %336 = vector.extract_strided_slice %316 {offsets = [0, 0, 8], sizes = [2, 8, 8], strides = [1, 1, 1]} : vector<2x8x32xf32> to vector<2x8x8xf32>
    "tpu.trace_start"() <{level = 10 : i32, message = "bqd,bkd->bqk"}> : () -> ()
    %cst_144 = arith.constant dense<0.000000e+00> : vector<2x8x8xf32>
    %337 = tpu.matmul %334, %335, %cst_144 {dimension_numbers = #tpu.dot_dimension_numbers<[2], [2], [1], [1], [0, 0, 0, 1, 1, 1], [0], [0]>} : vector<2x8x8xf32>, vector<2x8x8xf32>, vector<2x8x8xf32> -> vector<2x8x8xf32>
    "tpu.trace_stop"() : () -> ()
    %cst_145 = arith.constant 0.353553385 : f32
    %338 = vector.broadcast %cst_145 : f32 to vector<2x8x8xf32>
    %339 = arith.mulf %337, %338 : vector<2x8x8xf32>
    %cst_146 = arith.constant dense<0xFF800000> : vector<2x8xf32>
    %340 = vector.multi_reduction <maximumf>, %339, %cst_146 [2] : vector<2x8x8xf32> to vector<2x8xf32>
    %341 = vector.shape_cast %340 : vector<2x8xf32> to vector<2x8x1xf32>
    %342 = vector.broadcast %341 : vector<2x8x1xf32> to vector<2x8x8xf32>
    %343 = arith.subf %339, %342 : vector<2x8x8xf32>
    %344 = math.exp %343 : vector<2x8x8xf32>
    %cst_147 = arith.constant dense<0.000000e+00> : vector<2x8xf32>
    %345 = vector.multi_reduction <add>, %344, %cst_147 [2] : vector<2x8x8xf32> to vector<2x8xf32>
    %346 = vector.shape_cast %345 : vector<2x8xf32> to vector<2x8x1xf32>
    %347 = tpu.reciprocal %346 {approx = true} : vector<2x8x1xf32> -> vector<2x8x1xf32>
    %348 = vector.broadcast %347 : vector<2x8x1xf32> to vector<2x8x8xf32>
    %349 = arith.mulf %344, %348 : vector<2x8x8xf32>
    "tpu.trace_start"() <{level = 10 : i32, message = "bqk,bkd->bqd"}> : () -> ()
    %cst_148 = arith.constant dense<0.000000e+00> : vector<2x8x8xf32>
    %350 = tpu.matmul %349, %336, %cst_148 {dimension_numbers = #tpu.dot_dimension_numbers<[2], [1], [1], [2], [0, 0, 0, 1, 1, 2], [0], [0]>} : vector<2x8x8xf32>, vector<2x8x8xf32>, vector<2x8x8xf32> -> vector<2x8x8xf32>
    "tpu.trace_stop"() : () -> ()
    %351 = vector.extract_strided_slice %300 {offsets = [0, 0, 16], sizes = [2, 8, 8], strides = [1, 1, 1]} : vector<2x8x32xf32> to vector<2x8x8xf32>
    %352 = vector.extract_strided_slice %308 {offsets = [0, 0, 16], sizes = [2, 8, 8], strides = [1, 1, 1]} : vector<2x8x32xf32> to vector<2x8x8xf32>
    %353 = vector.extract_strided_slice %316 {offsets = [0, 0, 16], sizes = [2, 8, 8], strides = [1, 1, 1]} : vector<2x8x32xf32> to vector<2x8x8xf32>
    "tpu.trace_start"() <{level = 10 : i32, message = "bqd,bkd->bqk"}> : () -> ()
    %cst_149 = arith.constant dense<0.000000e+00> : vector<2x8x8xf32>
    %354 = tpu.matmul %351, %352, %cst_149 {dimension_numbers = #tpu.dot_dimension_numbers<[2], [2], [1], [1], [0, 0, 0, 1, 1, 1], [0], [0]>} : vector<2x8x8xf32>, vector<2x8x8xf32>, vector<2x8x8xf32> -> vector<2x8x8xf32>
    "tpu.trace_stop"() : () -> ()
    %cst_150 = arith.constant 0.353553385 : f32
    %355 = vector.broadcast %cst_150 : f32 to vector<2x8x8xf32>
    %356 = arith.mulf %354, %355 : vector<2x8x8xf32>
    %cst_151 = arith.constant dense<0xFF800000> : vector<2x8xf32>
    %357 = vector.multi_reduction <maximumf>, %356, %cst_151 [2] : vector<2x8x8xf32> to vector<2x8xf32>
    %358 = vector.shape_cast %357 : vector<2x8xf32> to vector<2x8x1xf32>
    %359 = vector.broadcast %358 : vector<2x8x1xf32> to vector<2x8x8xf32>
    %360 = arith.subf %356, %359 : vector<2x8x8xf32>
    %361 = math.exp %360 : vector<2x8x8xf32>
    %cst_152 = arith.constant dense<0.000000e+00> : vector<2x8xf32>
    %362 = vector.multi_reduction <add>, %361, %cst_152 [2] : vector<2x8x8xf32> to vector<2x8xf32>
    %363 = vector.shape_cast %362 : vector<2x8xf32> to vector<2x8x1xf32>
    %364 = tpu.reciprocal %363 {approx = true} : vector<2x8x1xf32> -> vector<2x8x1xf32>
    %365 = vector.broadcast %364 : vector<2x8x1xf32> to vector<2x8x8xf32>
    %366 = arith.mulf %361, %365 : vector<2x8x8xf32>
    "tpu.trace_start"() <{level = 10 : i32, message = "bqk,bkd->bqd"}> : () -> ()
    %cst_153 = arith.constant dense<0.000000e+00> : vector<2x8x8xf32>
    %367 = tpu.matmul %366, %353, %cst_153 {dimension_numbers = #tpu.dot_dimension_numbers<[2], [1], [1], [2], [0, 0, 0, 1, 1, 2], [0], [0]>} : vector<2x8x8xf32>, vector<2x8x8xf32>, vector<2x8x8xf32> -> vector<2x8x8xf32>
    "tpu.trace_stop"() : () -> ()
    %368 = vector.extract_strided_slice %300 {offsets = [0, 0, 24], sizes = [2, 8, 8], strides = [1, 1, 1]} : vector<2x8x32xf32> to vector<2x8x8xf32>
    %369 = vector.extract_strided_slice %308 {offsets = [0, 0, 24], sizes = [2, 8, 8], strides = [1, 1, 1]} : vector<2x8x32xf32> to vector<2x8x8xf32>
    %370 = vector.extract_strided_slice %316 {offsets = [0, 0, 24], sizes = [2, 8, 8], strides = [1, 1, 1]} : vector<2x8x32xf32> to vector<2x8x8xf32>
    "tpu.trace_start"() <{level = 10 : i32, message = "bqd,bkd->bqk"}> : () -> ()
    %cst_154 = arith.constant dense<0.000000e+00> : vector<2x8x8xf32>
    %371 = tpu.matmul %368, %369, %cst_154 {dimension_numbers = #tpu.dot_dimension_numbers<[2], [2], [1], [1], [0, 0, 0, 1, 1, 1], [0], [0]>} : vector<2x8x8xf32>, vector<2x8x8xf32>, vector<2x8x8xf32> -> vector<2x8x8xf32>
    "tpu.trace_stop"() : () -> ()
    %cst_155 = arith.constant 0.353553385 : f32
    %372 = vector.broadcast %cst_155 : f32 to vector<2x8x8xf32>
    %373 = arith.mulf %371, %372 : vector<2x8x8xf32>
    %cst_156 = arith.constant dense<0xFF800000> : vector<2x8xf32>
    %374 = vector.multi_reduction <maximumf>, %373, %cst_156 [2] : vector<2x8x8xf32> to vector<2x8xf32>
    %375 = vector.shape_cast %374 : vector<2x8xf32> to vector<2x8x1xf32>
    %376 = vector.broadcast %375 : vector<2x8x1xf32> to vector<2x8x8xf32>
    %377 = arith.subf %373, %376 : vector<2x8x8xf32>
    %378 = math.exp %377 : vector<2x8x8xf32>
    %cst_157 = arith.constant dense<0.000000e+00> : vector<2x8xf32>
    %379 = vector.multi_reduction <add>, %378, %cst_157 [2] : vector<2x8x8xf32> to vector<2x8xf32>
    %380 = vector.shape_cast %379 : vector<2x8xf32> to vector<2x8x1xf32>
    %381 = tpu.reciprocal %380 {approx = true} : vector<2x8x1xf32> -> vector<2x8x1xf32>
    %382 = vector.broadcast %381 : vector<2x8x1xf32> to vector<2x8x8xf32>
    %383 = arith.mulf %378, %382 : vector<2x8x8xf32>
    "tpu.trace_start"() <{level = 10 : i32, message = "bqk,bkd->bqd"}> : () -> ()
    %cst_158 = arith.constant dense<0.000000e+00> : vector<2x8x8xf32>
    %384 = tpu.matmul %383, %370, %cst_158 {dimension_numbers = #tpu.dot_dimension_numbers<[2], [1], [1], [2], [0, 0, 0, 1, 1, 2], [0], [0]>} : vector<2x8x8xf32>, vector<2x8x8xf32>, vector<2x8x8xf32> -> vector<2x8x8xf32>
    "tpu.trace_stop"() : () -> ()
    %385 = tpu.concatenate %333, %350, %367, %384 in 2 : vector<2x8x8xf32>, vector<2x8x8xf32>, vector<2x8x8xf32>, vector<2x8x8xf32> -> vector<2x8x32xf32>
    %386 = vector.shape_cast %385 : vector<2x8x32xf32> to vector<16x32xf32>
    %c1_159 = arith.constant 1 : index
    %c3_160 = arith.constant 3 : index
    %c0_161 = arith.constant 0 : index
    %c0_162 = arith.constant 0 : index
    %387 = vector.load %arg5[%c1_159, %c3_160, %c0_161, %c0_162] : memref<2x12x32x32xbf16, #tpu.memory_space<vmem>>, vector<1x1x32x32xbf16>
    %388 = vector.shape_cast %387 : vector<1x1x32x32xbf16> to vector<32x32xbf16>
    %389 = arith.truncf %386 : vector<16x32xf32> to vector<16x32xbf16>
    %cst_163 = arith.constant dense<0.000000e+00> : vector<16x32xf32>
    %390 = tpu.matmul %389, %388, %cst_163 {dimension_numbers = #tpu.dot_dimension_numbers<[1], [0], [0], [1], [0, 0, 1, 1], [], []>} : vector<16x32xbf16>, vector<32x32xbf16>, vector<16x32xf32> -> vector<16x32xf32>
    %391 = vector.extract_strided_slice %278 {offsets = [5, 0], sizes = [1, 32], strides = [1, 1]} : vector<14x32xf32> to vector<1x32xf32>
    %392 = vector.broadcast %391 : vector<1x32xf32> to vector<16x32xf32>
    %393 = arith.addf %392, %285 : vector<16x32xf32>
    %394 = arith.addf %390, %393 : vector<16x32xf32>
    %c1_164 = arith.constant 1 : index
    %c4_165 = arith.constant 4 : index
    %c0_166 = arith.constant 0 : index
    %c0_167 = arith.constant 0 : index
    %395 = vector.load %arg5[%c1_164, %c4_165, %c0_166, %c0_167] : memref<2x12x32x32xbf16, #tpu.memory_space<vmem>>, vector<1x1x32x32xbf16>
    %396 = vector.shape_cast %395 : vector<1x1x32x32xbf16> to vector<32x32xbf16>
    %397 = arith.truncf %292 : vector<16x32xf32> to vector<16x32xbf16>
    %cst_168 = arith.constant dense<0.000000e+00> : vector<16x32xf32>
    %398 = tpu.matmul %397, %396, %cst_168 {dimension_numbers = #tpu.dot_dimension_numbers<[1], [0], [0], [1], [0, 0, 1, 1], [], []>} : vector<16x32xbf16>, vector<32x32xbf16>, vector<16x32xf32> -> vector<16x32xf32>
    %399 = vector.extract_strided_slice %278 {offsets = [6, 0], sizes = [1, 32], strides = [1, 1]} : vector<14x32xf32> to vector<1x32xf32>
    %400 = vector.broadcast %399 : vector<1x32xf32> to vector<16x32xf32>
    %401 = arith.addf %398, %400 : vector<16x32xf32>
    %402 = vector.shape_cast %401 : vector<16x32xf32> to vector<2x8x32xf32>
    %c1_169 = arith.constant 1 : index
    %c5_170 = arith.constant 5 : index
    %c0_171 = arith.constant 0 : index
    %c0_172 = arith.constant 0 : index
    %403 = vector.load %arg5[%c1_169, %c5_170, %c0_171, %c0_172] : memref<2x12x32x32xbf16, #tpu.memory_space<vmem>>, vector<1x1x32x32xbf16>
    %404 = vector.shape_cast %403 : vector<1x1x32x32xbf16> to vector<32x32xbf16>
    %405 = arith.truncf %285 : vector<16x32xf32> to vector<16x32xbf16>
    %cst_173 = arith.constant dense<0.000000e+00> : vector<16x32xf32>
    %406 = tpu.matmul %405, %404, %cst_173 {dimension_numbers = #tpu.dot_dimension_numbers<[1], [0], [0], [1], [0, 0, 1, 1], [], []>} : vector<16x32xbf16>, vector<32x32xbf16>, vector<16x32xf32> -> vector<16x32xf32>
    %407 = vector.extract_strided_slice %278 {offsets = [7, 0], sizes = [1, 32], strides = [1, 1]} : vector<14x32xf32> to vector<1x32xf32>
    %408 = vector.broadcast %407 : vector<1x32xf32> to vector<16x32xf32>
    %409 = arith.addf %406, %408 : vector<16x32xf32>
    %410 = vector.shape_cast %409 : vector<16x32xf32> to vector<2x8x32xf32>
    %c1_174 = arith.constant 1 : index
    %c6_175 = arith.constant 6 : index
    %c0_176 = arith.constant 0 : index
    %c0_177 = arith.constant 0 : index
    %411 = vector.load %arg5[%c1_174, %c6_175, %c0_176, %c0_177] : memref<2x12x32x32xbf16, #tpu.memory_space<vmem>>, vector<1x1x32x32xbf16>
    %412 = vector.shape_cast %411 : vector<1x1x32x32xbf16> to vector<32x32xbf16>
    %413 = arith.truncf %285 : vector<16x32xf32> to vector<16x32xbf16>
    %cst_178 = arith.constant dense<0.000000e+00> : vector<16x32xf32>
    %414 = tpu.matmul %413, %412, %cst_178 {dimension_numbers = #tpu.dot_dimension_numbers<[1], [0], [0], [1], [0, 0, 1, 1], [], []>} : vector<16x32xbf16>, vector<32x32xbf16>, vector<16x32xf32> -> vector<16x32xf32>
    %415 = vector.extract_strided_slice %278 {offsets = [8, 0], sizes = [1, 32], strides = [1, 1]} : vector<14x32xf32> to vector<1x32xf32>
    %416 = vector.broadcast %415 : vector<1x32xf32> to vector<16x32xf32>
    %417 = arith.addf %414, %416 : vector<16x32xf32>
    %418 = vector.shape_cast %417 : vector<16x32xf32> to vector<2x8x32xf32>
    %419 = vector.extract_strided_slice %402 {offsets = [0, 0, 0], sizes = [2, 8, 8], strides = [1, 1, 1]} : vector<2x8x32xf32> to vector<2x8x8xf32>
    %420 = vector.extract_strided_slice %410 {offsets = [0, 0, 0], sizes = [2, 8, 8], strides = [1, 1, 1]} : vector<2x8x32xf32> to vector<2x8x8xf32>
    %421 = vector.extract_strided_slice %418 {offsets = [0, 0, 0], sizes = [2, 8, 8], strides = [1, 1, 1]} : vector<2x8x32xf32> to vector<2x8x8xf32>
    "tpu.trace_start"() <{level = 10 : i32, message = "bqd,bkd->bqk"}> : () -> ()
    %cst_179 = arith.constant dense<0.000000e+00> : vector<2x8x8xf32>
    %422 = tpu.matmul %419, %420, %cst_179 {dimension_numbers = #tpu.dot_dimension_numbers<[2], [2], [1], [1], [0, 0, 0, 1, 1, 1], [0], [0]>} : vector<2x8x8xf32>, vector<2x8x8xf32>, vector<2x8x8xf32> -> vector<2x8x8xf32>
    "tpu.trace_stop"() : () -> ()
    %cst_180 = arith.constant 0.353553385 : f32
    %423 = vector.broadcast %cst_180 : f32 to vector<2x8x8xf32>
    %424 = arith.mulf %422, %423 : vector<2x8x8xf32>
    %cst_181 = arith.constant dense<0xFF800000> : vector<2x8xf32>
    %425 = vector.multi_reduction <maximumf>, %424, %cst_181 [2] : vector<2x8x8xf32> to vector<2x8xf32>
    %426 = vector.shape_cast %425 : vector<2x8xf32> to vector<2x8x1xf32>
    %427 = vector.broadcast %426 : vector<2x8x1xf32> to vector<2x8x8xf32>
    %428 = arith.subf %424, %427 : vector<2x8x8xf32>
    %429 = math.exp %428 : vector<2x8x8xf32>
    %cst_182 = arith.constant dense<0.000000e+00> : vector<2x8xf32>
    %430 = vector.multi_reduction <add>, %429, %cst_182 [2] : vector<2x8x8xf32> to vector<2x8xf32>
    %431 = vector.shape_cast %430 : vector<2x8xf32> to vector<2x8x1xf32>
    %432 = tpu.reciprocal %431 {approx = true} : vector<2x8x1xf32> -> vector<2x8x1xf32>
    %433 = vector.broadcast %432 : vector<2x8x1xf32> to vector<2x8x8xf32>
    %434 = arith.mulf %429, %433 : vector<2x8x8xf32>
    "tpu.trace_start"() <{level = 10 : i32, message = "bqk,bkd->bqd"}> : () -> ()
    %cst_183 = arith.constant dense<0.000000e+00> : vector<2x8x8xf32>
    %435 = tpu.matmul %434, %421, %cst_183 {dimension_numbers = #tpu.dot_dimension_numbers<[2], [1], [1], [2], [0, 0, 0, 1, 1, 2], [0], [0]>} : vector<2x8x8xf32>, vector<2x8x8xf32>, vector<2x8x8xf32> -> vector<2x8x8xf32>
    "tpu.trace_stop"() : () -> ()
    %436 = vector.extract_strided_slice %402 {offsets = [0, 0, 8], sizes = [2, 8, 8], strides = [1, 1, 1]} : vector<2x8x32xf32> to vector<2x8x8xf32>
    %437 = vector.extract_strided_slice %410 {offsets = [0, 0, 8], sizes = [2, 8, 8], strides = [1, 1, 1]} : vector<2x8x32xf32> to vector<2x8x8xf32>
    %438 = vector.extract_strided_slice %418 {offsets = [0, 0, 8], sizes = [2, 8, 8], strides = [1, 1, 1]} : vector<2x8x32xf32> to vector<2x8x8xf32>
    "tpu.trace_start"() <{level = 10 : i32, message = "bqd,bkd->bqk"}> : () -> ()
    %cst_184 = arith.constant dense<0.000000e+00> : vector<2x8x8xf32>
    %439 = tpu.matmul %436, %437, %cst_184 {dimension_numbers = #tpu.dot_dimension_numbers<[2], [2], [1], [1], [0, 0, 0, 1, 1, 1], [0], [0]>} : vector<2x8x8xf32>, vector<2x8x8xf32>, vector<2x8x8xf32> -> vector<2x8x8xf32>
    "tpu.trace_stop"() : () -> ()
    %cst_185 = arith.constant 0.353553385 : f32
    %440 = vector.broadcast %cst_185 : f32 to vector<2x8x8xf32>
    %441 = arith.mulf %439, %440 : vector<2x8x8xf32>
    %cst_186 = arith.constant dense<0xFF800000> : vector<2x8xf32>
    %442 = vector.multi_reduction <maximumf>, %441, %cst_186 [2] : vector<2x8x8xf32> to vector<2x8xf32>
    %443 = vector.shape_cast %442 : vector<2x8xf32> to vector<2x8x1xf32>
    %444 = vector.broadcast %443 : vector<2x8x1xf32> to vector<2x8x8xf32>
    %445 = arith.subf %441, %444 : vector<2x8x8xf32>
    %446 = math.exp %445 : vector<2x8x8xf32>
    %cst_187 = arith.constant dense<0.000000e+00> : vector<2x8xf32>
    %447 = vector.multi_reduction <add>, %446, %cst_187 [2] : vector<2x8x8xf32> to vector<2x8xf32>
    %448 = vector.shape_cast %447 : vector<2x8xf32> to vector<2x8x1xf32>
    %449 = tpu.reciprocal %448 {approx = true} : vector<2x8x1xf32> -> vector<2x8x1xf32>
    %450 = vector.broadcast %449 : vector<2x8x1xf32> to vector<2x8x8xf32>
    %451 = arith.mulf %446, %450 : vector<2x8x8xf32>
    "tpu.trace_start"() <{level = 10 : i32, message = "bqk,bkd->bqd"}> : () -> ()
    %cst_188 = arith.constant dense<0.000000e+00> : vector<2x8x8xf32>
    %452 = tpu.matmul %451, %438, %cst_188 {dimension_numbers = #tpu.dot_dimension_numbers<[2], [1], [1], [2], [0, 0, 0, 1, 1, 2], [0], [0]>} : vector<2x8x8xf32>, vector<2x8x8xf32>, vector<2x8x8xf32> -> vector<2x8x8xf32>
    "tpu.trace_stop"() : () -> ()
    %453 = vector.extract_strided_slice %402 {offsets = [0, 0, 16], sizes = [2, 8, 8], strides = [1, 1, 1]} : vector<2x8x32xf32> to vector<2x8x8xf32>
    %454 = vector.extract_strided_slice %410 {offsets = [0, 0, 16], sizes = [2, 8, 8], strides = [1, 1, 1]} : vector<2x8x32xf32> to vector<2x8x8xf32>
    %455 = vector.extract_strided_slice %418 {offsets = [0, 0, 16], sizes = [2, 8, 8], strides = [1, 1, 1]} : vector<2x8x32xf32> to vector<2x8x8xf32>
    "tpu.trace_start"() <{level = 10 : i32, message = "bqd,bkd->bqk"}> : () -> ()
    %cst_189 = arith.constant dense<0.000000e+00> : vector<2x8x8xf32>
    %456 = tpu.matmul %453, %454, %cst_189 {dimension_numbers = #tpu.dot_dimension_numbers<[2], [2], [1], [1], [0, 0, 0, 1, 1, 1], [0], [0]>} : vector<2x8x8xf32>, vector<2x8x8xf32>, vector<2x8x8xf32> -> vector<2x8x8xf32>
    "tpu.trace_stop"() : () -> ()
    %cst_190 = arith.constant 0.353553385 : f32
    %457 = vector.broadcast %cst_190 : f32 to vector<2x8x8xf32>
    %458 = arith.mulf %456, %457 : vector<2x8x8xf32>
    %cst_191 = arith.constant dense<0xFF800000> : vector<2x8xf32>
    %459 = vector.multi_reduction <maximumf>, %458, %cst_191 [2] : vector<2x8x8xf32> to vector<2x8xf32>
    %460 = vector.shape_cast %459 : vector<2x8xf32> to vector<2x8x1xf32>
    %461 = vector.broadcast %460 : vector<2x8x1xf32> to vector<2x8x8xf32>
    %462 = arith.subf %458, %461 : vector<2x8x8xf32>
    %463 = math.exp %462 : vector<2x8x8xf32>
    %cst_192 = arith.constant dense<0.000000e+00> : vector<2x8xf32>
    %464 = vector.multi_reduction <add>, %463, %cst_192 [2] : vector<2x8x8xf32> to vector<2x8xf32>
    %465 = vector.shape_cast %464 : vector<2x8xf32> to vector<2x8x1xf32>
    %466 = tpu.reciprocal %465 {approx = true} : vector<2x8x1xf32> -> vector<2x8x1xf32>
    %467 = vector.broadcast %466 : vector<2x8x1xf32> to vector<2x8x8xf32>
    %468 = arith.mulf %463, %467 : vector<2x8x8xf32>
    "tpu.trace_start"() <{level = 10 : i32, message = "bqk,bkd->bqd"}> : () -> ()
    %cst_193 = arith.constant dense<0.000000e+00> : vector<2x8x8xf32>
    %469 = tpu.matmul %468, %455, %cst_193 {dimension_numbers = #tpu.dot_dimension_numbers<[2], [1], [1], [2], [0, 0, 0, 1, 1, 2], [0], [0]>} : vector<2x8x8xf32>, vector<2x8x8xf32>, vector<2x8x8xf32> -> vector<2x8x8xf32>
    "tpu.trace_stop"() : () -> ()
    %470 = vector.extract_strided_slice %402 {offsets = [0, 0, 24], sizes = [2, 8, 8], strides = [1, 1, 1]} : vector<2x8x32xf32> to vector<2x8x8xf32>
    %471 = vector.extract_strided_slice %410 {offsets = [0, 0, 24], sizes = [2, 8, 8], strides = [1, 1, 1]} : vector<2x8x32xf32> to vector<2x8x8xf32>
    %472 = vector.extract_strided_slice %418 {offsets = [0, 0, 24], sizes = [2, 8, 8], strides = [1, 1, 1]} : vector<2x8x32xf32> to vector<2x8x8xf32>
    "tpu.trace_start"() <{level = 10 : i32, message = "bqd,bkd->bqk"}> : () -> ()
    %cst_194 = arith.constant dense<0.000000e+00> : vector<2x8x8xf32>
    %473 = tpu.matmul %470, %471, %cst_194 {dimension_numbers = #tpu.dot_dimension_numbers<[2], [2], [1], [1], [0, 0, 0, 1, 1, 1], [0], [0]>} : vector<2x8x8xf32>, vector<2x8x8xf32>, vector<2x8x8xf32> -> vector<2x8x8xf32>
    "tpu.trace_stop"() : () -> ()
    %cst_195 = arith.constant 0.353553385 : f32
    %474 = vector.broadcast %cst_195 : f32 to vector<2x8x8xf32>
    %475 = arith.mulf %473, %474 : vector<2x8x8xf32>
    %cst_196 = arith.constant dense<0xFF800000> : vector<2x8xf32>
    %476 = vector.multi_reduction <maximumf>, %475, %cst_196 [2] : vector<2x8x8xf32> to vector<2x8xf32>
    %477 = vector.shape_cast %476 : vector<2x8xf32> to vector<2x8x1xf32>
    %478 = vector.broadcast %477 : vector<2x8x1xf32> to vector<2x8x8xf32>
    %479 = arith.subf %475, %478 : vector<2x8x8xf32>
    %480 = math.exp %479 : vector<2x8x8xf32>
    %cst_197 = arith.constant dense<0.000000e+00> : vector<2x8xf32>
    %481 = vector.multi_reduction <add>, %480, %cst_197 [2] : vector<2x8x8xf32> to vector<2x8xf32>
    %482 = vector.shape_cast %481 : vector<2x8xf32> to vector<2x8x1xf32>
    %483 = tpu.reciprocal %482 {approx = true} : vector<2x8x1xf32> -> vector<2x8x1xf32>
    %484 = vector.broadcast %483 : vector<2x8x1xf32> to vector<2x8x8xf32>
    %485 = arith.mulf %480, %484 : vector<2x8x8xf32>
    "tpu.trace_start"() <{level = 10 : i32, message = "bqk,bkd->bqd"}> : () -> ()
    %cst_198 = arith.constant dense<0.000000e+00> : vector<2x8x8xf32>
    %486 = tpu.matmul %485, %472, %cst_198 {dimension_numbers = #tpu.dot_dimension_numbers<[2], [1], [1], [2], [0, 0, 0, 1, 1, 2], [0], [0]>} : vector<2x8x8xf32>, vector<2x8x8xf32>, vector<2x8x8xf32> -> vector<2x8x8xf32>
    "tpu.trace_stop"() : () -> ()
    %487 = tpu.concatenate %435, %452, %469, %486 in 2 : vector<2x8x8xf32>, vector<2x8x8xf32>, vector<2x8x8xf32>, vector<2x8x8xf32> -> vector<2x8x32xf32>
    %488 = vector.shape_cast %487 : vector<2x8x32xf32> to vector<16x32xf32>
    %c1_199 = arith.constant 1 : index
    %c7_200 = arith.constant 7 : index
    %c0_201 = arith.constant 0 : index
    %c0_202 = arith.constant 0 : index
    %489 = vector.load %arg5[%c1_199, %c7_200, %c0_201, %c0_202] : memref<2x12x32x32xbf16, #tpu.memory_space<vmem>>, vector<1x1x32x32xbf16>
    %490 = vector.shape_cast %489 : vector<1x1x32x32xbf16> to vector<32x32xbf16>
    %491 = arith.truncf %488 : vector<16x32xf32> to vector<16x32xbf16>
    %cst_203 = arith.constant dense<0.000000e+00> : vector<16x32xf32>
    %492 = tpu.matmul %491, %490, %cst_203 {dimension_numbers = #tpu.dot_dimension_numbers<[1], [0], [0], [1], [0, 0, 1, 1], [], []>} : vector<16x32xbf16>, vector<32x32xbf16>, vector<16x32xf32> -> vector<16x32xf32>
    %493 = vector.extract_strided_slice %278 {offsets = [9, 0], sizes = [1, 32], strides = [1, 1]} : vector<14x32xf32> to vector<1x32xf32>
    %494 = vector.broadcast %493 : vector<1x32xf32> to vector<16x32xf32>
    %495 = arith.addf %494, %292 : vector<16x32xf32>
    %496 = arith.addf %492, %495 : vector<16x32xf32>
    %497 = vector.shape_cast %394 : vector<16x32xf32> to vector<2x8x32xf32>
    %cst_204 = arith.constant dense<0.000000e+00> : vector<2x32xf32>
    %498 = vector.multi_reduction <add>, %497, %cst_204 [1] : vector<2x8x32xf32> to vector<2x32xf32>
    %cst_205 = arith.constant 8.000000e+00 : f32
    %499 = vector.broadcast %cst_205 : f32 to vector<2x32xf32>
    %500 = arith.divf %498, %499 : vector<2x32xf32>
    %501 = vector.shape_cast %496 : vector<16x32xf32> to vector<2x8x32xf32>
    %cst_206 = arith.constant dense<0.000000e+00> : vector<2x32xf32>
    %502 = vector.multi_reduction <add>, %501, %cst_206 [1] : vector<2x8x32xf32> to vector<2x32xf32>
    %cst_207 = arith.constant 8.000000e+00 : f32
    %503 = vector.broadcast %cst_207 : f32 to vector<2x32xf32>
    %504 = arith.divf %502, %503 : vector<2x32xf32>
    %c1_208 = arith.constant 1 : index
    %c8_209 = arith.constant 8 : index
    %c0_210 = arith.constant 0 : index
    %c0_211 = arith.constant 0 : index
    %505 = vector.load %arg5[%c1_208, %c8_209, %c0_210, %c0_211] : memref<2x12x32x32xbf16, #tpu.memory_space<vmem>>, vector<1x1x32x32xbf16>
    %506 = vector.shape_cast %505 : vector<1x1x32x32xbf16> to vector<32x32xbf16>
    %507 = arith.truncf %504 : vector<2x32xf32> to vector<2x32xbf16>
    %cst_212 = arith.constant dense<0.000000e+00> : vector<2x32xf32>
    %508 = tpu.matmul %507, %506, %cst_212 {dimension_numbers = #tpu.dot_dimension_numbers<[1], [0], [0], [1], [0, 0, 1, 1], [], []>} : vector<2x32xbf16>, vector<32x32xbf16>, vector<2x32xf32> -> vector<2x32xf32>
    %509 = vector.extract_strided_slice %278 {offsets = [10, 0], sizes = [1, 32], strides = [1, 1]} : vector<14x32xf32> to vector<1x32xf32>
    %510 = vector.broadcast %509 : vector<1x32xf32> to vector<2x32xf32>
    %511 = arith.addf %508, %510 : vector<2x32xf32>
    %c1_213 = arith.constant 1 : index
    %c9_214 = arith.constant 9 : index
    %c0_215 = arith.constant 0 : index
    %c0_216 = arith.constant 0 : index
    %512 = vector.load %arg5[%c1_213, %c9_214, %c0_215, %c0_216] : memref<2x12x32x32xbf16, #tpu.memory_space<vmem>>, vector<1x1x32x32xbf16>
    %513 = vector.shape_cast %512 : vector<1x1x32x32xbf16> to vector<32x32xbf16>
    %514 = arith.truncf %504 : vector<2x32xf32> to vector<2x32xbf16>
    %cst_217 = arith.constant dense<0.000000e+00> : vector<2x32xf32>
    %515 = tpu.matmul %514, %513, %cst_217 {dimension_numbers = #tpu.dot_dimension_numbers<[1], [0], [0], [1], [0, 0, 1, 1], [], []>} : vector<2x32xbf16>, vector<32x32xbf16>, vector<2x32xf32> -> vector<2x32xf32>
    %516 = vector.extract_strided_slice %278 {offsets = [11, 0], sizes = [1, 32], strides = [1, 1]} : vector<14x32xf32> to vector<1x32xf32>
    %517 = vector.broadcast %516 : vector<1x32xf32> to vector<2x32xf32>
    %518 = arith.addf %515, %517 : vector<2x32xf32>
    %519 = arith.mulf %511, %500 : vector<2x32xf32>
    %520 = arith.addf %519, %518 : vector<2x32xf32>
    %521 = arith.mulf %520, %520 : vector<2x32xf32>
    %522 = arith.mulf %520, %521 : vector<2x32xf32>
    %cst_218 = arith.constant 4.471500e-02 : f32
    %523 = vector.broadcast %cst_218 : f32 to vector<2x32xf32>
    %524 = arith.mulf %523, %522 : vector<2x32xf32>
    %525 = arith.addf %520, %524 : vector<2x32xf32>
    %cst_219 = arith.constant 0.797884583 : f32
    %526 = vector.broadcast %cst_219 : f32 to vector<2x32xf32>
    %527 = arith.mulf %526, %525 : vector<2x32xf32>
    %528 = math.tanh %527 : vector<2x32xf32>
    %cst_220 = arith.constant 1.000000e+00 : f32
    %529 = vector.broadcast %cst_220 : f32 to vector<2x32xf32>
    %530 = arith.addf %529, %528 : vector<2x32xf32>
    %cst_221 = arith.constant 5.000000e-01 : f32
    %531 = vector.broadcast %cst_221 : f32 to vector<2x32xf32>
    %532 = arith.mulf %531, %530 : vector<2x32xf32>
    %533 = arith.mulf %520, %532 : vector<2x32xf32>
    %c1_222 = arith.constant 1 : index
    %c10_223 = arith.constant 10 : index
    %c0_224 = arith.constant 0 : index
    %c0_225 = arith.constant 0 : index
    %534 = vector.load %arg5[%c1_222, %c10_223, %c0_224, %c0_225] : memref<2x12x32x32xbf16, #tpu.memory_space<vmem>>, vector<1x1x32x32xbf16>
    %535 = vector.shape_cast %534 : vector<1x1x32x32xbf16> to vector<32x32xbf16>
    %536 = arith.truncf %533 : vector<2x32xf32> to vector<2x32xbf16>
    %cst_226 = arith.constant dense<0.000000e+00> : vector<2x32xf32>
    %537 = tpu.matmul %536, %535, %cst_226 {dimension_numbers = #tpu.dot_dimension_numbers<[1], [0], [0], [1], [0, 0, 1, 1], [], []>} : vector<2x32xbf16>, vector<32x32xbf16>, vector<2x32xf32> -> vector<2x32xf32>
    %538 = vector.extract_strided_slice %278 {offsets = [12, 0], sizes = [1, 32], strides = [1, 1]} : vector<14x32xf32> to vector<1x32xf32>
    %539 = vector.broadcast %538 : vector<1x32xf32> to vector<2x32xf32>
    %540 = arith.addf %537, %539 : vector<2x32xf32>
    %c1_227 = arith.constant 1 : index
    %c11_228 = arith.constant 11 : index
    %c0_229 = arith.constant 0 : index
    %c0_230 = arith.constant 0 : index
    %541 = vector.load %arg5[%c1_227, %c11_228, %c0_229, %c0_230] : memref<2x12x32x32xbf16, #tpu.memory_space<vmem>>, vector<1x1x32x32xbf16>
    %542 = vector.shape_cast %541 : vector<1x1x32x32xbf16> to vector<32x32xbf16>
    %543 = arith.truncf %540 : vector<2x32xf32> to vector<2x32xbf16>
    %cst_231 = arith.constant dense<0.000000e+00> : vector<2x32xf32>
    %544 = tpu.matmul %543, %542, %cst_231 {dimension_numbers = #tpu.dot_dimension_numbers<[1], [0], [0], [1], [0, 0, 1, 1], [], []>} : vector<2x32xbf16>, vector<32x32xbf16>, vector<2x32xf32> -> vector<2x32xf32>
    %545 = vector.extract_strided_slice %278 {offsets = [13, 0], sizes = [1, 32], strides = [1, 1]} : vector<14x32xf32> to vector<1x32xf32>
    %546 = vector.broadcast %545 : vector<1x32xf32> to vector<2x32xf32>
    %547 = arith.addf %544, %546 : vector<2x32xf32>
    %548 = tpu.concatenate %540, %547 in 0 : vector<2x32xf32>, vector<2x32xf32> -> vector<4x32xf32>
    %c1_232 = arith.constant 1 : index
    %c0_233 = arith.constant 0 : index
    %c0_234 = arith.constant 0 : index
    %549 = vector.load %arg7[%c1_232, %c0_233, %c0_234] : memref<2x4x32xf32, #tpu.memory_space<vmem>>, vector<1x4x32xf32>
    %550 = vector.shape_cast %549 : vector<1x4x32xf32> to vector<4x32xf32>
    %551 = vector.shape_cast %548 : vector<4x32xf32> to vector<1x4x32xf32>
    tpu.vector_store %arg7[%c1_232, %c0_233, %c0_234], %551 {strides = array<i32>} : memref<2x4x32xf32, #tpu.memory_space<vmem>>, vector<1x4x32xf32>,
    return
  }
  func.func @transform_0(%arg0: i32) -> (i32, i32) {
    %c0_i32 = arith.constant 0 : i32
    %c0_i32_0 = arith.constant 0 : i32
    %c0_i32_1 = arith.constant 0 : i32
    return %c0_i32, %c0_i32_0 : i32, i32
  }
  func.func @transform_1(%arg0: i32) -> (i32, i32) {
    %c0_i32 = arith.constant 0 : i32
    %c0_i32_0 = arith.constant 0 : i32
    %c0_i32_1 = arith.constant 0 : i32
    return %c0_i32, %c0_i32_0 : i32, i32
  }
  func.func @transform_2(%arg0: i32) -> (i32, i32, i32) {
    %c0_i32 = arith.constant 0 : i32
    %c0_i32_0 = arith.constant 0 : i32
    %c0_i32_1 = arith.constant 0 : i32
    return %arg0, %c0_i32, %c0_i32_0 : i32, i32, i32
  }
  func.func @transform_3(%arg0: i32) -> (i32, i32, i32) {
    %c0_i32 = arith.constant 0 : i32
    %c0_i32_0 = arith.constant 0 : i32
    %c0_i32_1 = arith.constant 0 : i32
    return %arg0, %c0_i32, %c0_i32_0 : i32, i32, i32
  }
  func.func @transform_4(%arg0: i32) -> (i32, i32, i32, i32) {
    %c0_i32 = arith.constant 0 : i32
    %c0_i32_0 = arith.constant 0 : i32
    %c0_i32_1 = arith.constant 0 : i32
    %c0_i32_2 = arith.constant 0 : i32
    return %arg0, %c0_i32, %c0_i32_0, %c0_i32_1 : i32, i32, i32, i32
  }
  func.func @transform_5(%arg0: i32) -> (i32, i32, i32) {
    %c0_i32 = arith.constant 0 : i32
    %c0_i32_0 = arith.constant 0 : i32
    %c0_i32_1 = arith.constant 0 : i32
    return %arg0, %c0_i32, %c0_i32_0 : i32, i32, i32
  }
  func.func @transform_6(%arg0: i32) -> (i32, i32, i32) {
    %c0_i32 = arith.constant 0 : i32
    %c0_i32_0 = arith.constant 0 : i32
    %c0_i32_1 = arith.constant 0 : i32
    return %arg0, %c0_i32, %c0_i32_0 : i32, i32, i32
  }
}

</mosaic_0001>

<bundles_post_ra>
// kernel: tpu_custom_call.1
= control target key start
LH: loop header
LB: loop body
LE: loop exit
PB: predicated region body
PF: predicated region fallthrough
CT: control target
= control target key end

     0   :  { %s10698_s0 = inlined_call_operand.vmem [shape: f32[16,32], index: 0, kind: input, shape index: {}]   ;;  %s10699_s1 = inlined_call_operand.vmem [shape: f32[16,32], index: 1, kind: input, shape index: {}]   ;;  %s10700_s2 = inlined_call_operand.vmem [shape: bf16[4,32,32], index: 2, kind: input, shape index: {}]   ;;  %s10701_s3 = inlined_call_operand.hbm [shape: bf16[4,32,32], index: 3, kind: input, shape index: {}]   ;;  %s10702_s4 = inlined_call_operand.hbm [shape: bf16[4,12,32,32], index: 4, kind: input, shape index: {}]   ;;  %s10703_s5 = inlined_call_operand.vmem [shape: f32[4,14,32], index: 5, kind: input, shape index: {}]   ;;  %s10704_s6 = inlined_call_operand.hbm [shape: f32[4,4,32], index: 6, kind: output, shape index: {}]  }
   0x1   :  { %10708 = sst [smem:[#allocation11_spill]] %s10701_s3 }
   0x2   :  { %11 = vsyncpa [#allocation3], 0 }
   0x3   :  { %13 = vsyncpa [#allocation3 + $0x1], 0 }
   0x4   :  { %14 = vsyncpa [#allocation6], 0 }
   0x5   :  { %16 = vsyncpa [#allocation6 + $0x1], 0 }
   0x6   :  { %17 = vsyncpa [#allocation4], 0 }
   0x7   :  { %19 = vsyncpa [#allocation4 + $0x1], 0  ;;  %s9391_s21 = smov 0   ;;  %s9393_s22 = smov 0  }
   0x8   :  { %s9395_s23 = smov 0   ;;  %s9397_s24 = smov 0  }
   0x9 LB: > { %s9412_s25 = sadd.s32 4294967295, %s9339_s24   ;;  %s7833_s26 = sadd.s32 4294967294, %s9339_s24   ;;  %s9339_s24 = sphi %s9397_s24, %s10724_s24   ;;  %s9335_s23 = sphi %s9395_s23, %s10723_s23   ;;  %s9331_s22 = sphi %s9393_s22, %s10722_s22   ;;  %s9327_s21 = sphi %s9391_s21, %s10721_s21  }
   0xa   : > { %s9416_s27 = sadd.s32 1, %s9339_s24   ;;  %s100_s28 = sadd.s32 1, %s9335_s23 }
   0xb   : > { %s97_s29 = ssub.s32 %s9339_s24, %s9416_s27  ;;  %p107_p0 = scmp.ne.s32.totalorder %s9335_s23, %s9331_s22 }
   0xc   : > { %p98_p1 = scmp.eq.s32.totalorder %s97_s29, 0  ;;  %p108_p2 = scmp.eq.s32.totalorder %s9339_s24, 0 }
   0xd   : > { %p113_p3 = scmp.ne.s32.totalorder %s9331_s22, %s9327_s21  ;;  %p114_p4 = scmp.eq.s32.totalorder %s9412_s25, 0 }
   0xe   : > { %s9428_s30 = scalar_select %p98_p1, %s9335_s23, %s100_s28  }
   0xf   : > { %p9430_p5 = por %p108_p2, %p107_p0  ;;  %p9434_p6 = por %p114_p4, %p113_p3 }
  0x10   : > { %p189_p7 = scmp.eq.s32.totalorder %s9412_s25, 1  ;;  %p195_p8 = scmp.eq.s32.totalorder %s7833_s26, 1 }
  0x11   : > { %s10710_s8 = scalar_select %p9434_p6, 1, 0 }
  0x12   : > { %p8921_p10 = scmp.lt.s32.totalorder %s9339_s24, 2  ;;  %p9441_p11 = por %p189_p7, %p107_p0 }
  0x13   : > { %p9445_p12 = por %p195_p8, %p113_p3  ;;  %s9450_s11 = sand.u32 1, %s9335_s23  }
  0x14   : > { %s10711_s9 = scalar_select %p9441_p11, 1, 0 }
  0x15   : > { %s10712_s10 = scalar_select %p9445_p12, 1, 0 }
  0x16   : > { %s8141_s12 = sshll.u32 %s9339_s24, 9  ;;  %s7836_s13 = sshll.u32 %s9450_s11, 5 }
  0x17   : > { %s10713_s3 = sld [smem:[#allocation11_spill]]  ;;  %s235_s17 = scalar_lea.vmem [#allocation2], %s7836_s13 }
  0x18   : > { %s243_s18 = sshll.u32 %s235_s17, 4  ;;  %p9461_p13 = pnand %p8921_p10, %p9430_p5  ;;  %s9465_s18 = int_to_ptr.vmem [resolvable:$true] %s243_s18 }
  0x19   : > { %s232_s20 = scalar_lea.sflag [#allocation3], %s9450_s11 }
  0x1a   : > { %p9217_p1 = pneg %p9461_p13 }
  0x1d   : > { %s9457_s16 = scalar_lea.hbm %s10713_s3, %s8141_s12  ;;  %s9220_s7 = scalar_lea.hbm %s10713_s3, 1024 }
  0x1e   : > { %s9215_s26 = scalar_lea.hbm %s9457_s16, 512  ;;  %p9221_p4 = scmp.lt.s32.totalorder %s9457_s16, %s10713_s3 }
  0x1f   : > { %p9216_p0 = scmp.ne.s32.totalorder %s9457_s16, %s9215_s26  ;;  %p9222_p5 = scmp.lt.s32.totalorder %s9220_s7, %s9215_s26 }
  0x21   : > { %p9218_p2 = pnand %p9217_p1, %p9216_p0  ;;  %p9223_p7 = por %p9222_p5, %p9221_p4 }
  0x23   : > { %p9219_p3 = pneg %p9218_p2 }
  0x25   : > { %p9224_p8 = pnand %p9223_p7, %p9219_p3 }
  0x27   : > { %9227 = shalt.err (!%p9224_p8)
}
  0x28   : > { %s9228_s14 = scalar_lea.vmem %s9465_s18, 512  ;;  %s9341_s15 = smov [#allocation2]  }
  0x29   : > { %p9229_p10 = scmp.ne.s32.totalorder %s9465_s18, %s9228_s14  ;;  %s9233_s17 = sshll.u32 %s9341_s15, 4  ;;  %s9234_s17 = int_to_ptr.vmem [resolvable:$false] %s9233_s17 }
  0x2a   : > { %s9235_s28 = scalar_lea.vmem %s9234_s17, 1024  ;;  %p9236_p9 = scmp.lt.s32.totalorder %s9465_s18, %s9234_s17 }
  0x2b   : > { %p9231_p0 = pnand %p9229_p10, %p9217_p1  ;;  %p9237_p12 = scmp.lt.s32.totalorder %s9235_s28, %s9228_s14 }
  0x2d   : > { %p9232_p2 = pneg %p9231_p0  ;;  %p9238_p11 = por %p9237_p12, %p9236_p9 }
  0x2f   : > { %p9239_p4 = pnand %p9238_p11, %p9232_p2 }
  0x31   : > { %9242 = shalt.err (!%p9239_p4)
}
  0x32   : > { %s10706_s26 = smov 64   ;;  %s9343_s29 = smov 4  }
  0x33   : > { %8913 = dma.hbm_to_vmem [thread:$0]  (!%p9461_p13), %s9457_s16, 512, %s9465_s18, %s232_s20, %s10706_s26, %s10706_s26, %s9343_s29  }
  0x34   : > { %p7843_p9 = scmp.ge.s32.totalorder %s9339_s24, 1  ;;  %p283_p11 = scmp.lt.s32.totalorder %s9339_s24, 3 }
  0x35   : > { %s8901_s7 = smul.u32 384, %s9450_s11  ;;  %s254_s16 = scalar_lea.sflag [#allocation6], %s9450_s11 }
  0x36   : > { %p9500_p12 = pnand %p7843_p9, %p283_p11  ;;  %s8902_s13 = smul.u32 6144, %s9339_s24 }
  0x37   : > { %s257_s28 = scalar_lea.vmem [#allocation5], %s8901_s7  ;;  %s9248_s14 = scalar_lea.hbm %s10702_s4, 12288 }
  0x38   : > { %s9508_s17 = scalar_lea.hbm %s10702_s4, %s8902_s13  ;;  %s265_s3 = sshll.u32 %s257_s28, 4  ;;  %s9510_s3 = int_to_ptr.vmem [resolvable:$true] %s265_s3 }
  0x39   : > { %s9243_s18 = scalar_lea.hbm %s9508_s17, 6144  ;;  %p9249_p8 = scmp.lt.s32.totalorder %s9508_s17, %s10702_s4 }
  0x3a   : > { %p9244_p3 = scmp.ne.s32.totalorder %s9508_s17, %s9243_s18  ;;  %p9250_p10 = scmp.lt.s32.totalorder %s9248_s14, %s9243_s18 }
  0x3c   : > { %p9246_p5 = pnand %p9244_p3, %p9217_p1  ;;  %p9251_p0 = por %p9250_p10, %p9249_p8 }
  0x3e   : > { %p9247_p7 = pneg %p9246_p5 }
  0x40   : > { %p9252_p2 = pnand %p9251_p0, %p9247_p7 }
  0x42   : > { %9255 = shalt.err (!%p9252_p2)
}
  0x43   : > { %s9256_s11 = scalar_lea.vmem %s9510_s3, 6144  ;;  %s9344_s26 = smov [#allocation5]  }
  0x44   : > { %p9257_p4 = scmp.ne.s32.totalorder %s9510_s3, %s9256_s11  ;;  %s9261_s7 = sshll.u32 %s9344_s26, 4  ;;  %s9262_s7 = int_to_ptr.vmem [resolvable:$false] %s9261_s7 }
  0x45   : > { %s9263_s28 = scalar_lea.vmem %s9262_s7, 12288  ;;  %p9264_p3 = scmp.lt.s32.totalorder %s9510_s3, %s9262_s7 }
  0x46   : > { %p9259_p9 = pnand %p9257_p4, %p9217_p1  ;;  %p9265_p5 = scmp.lt.s32.totalorder %s9263_s28, %s9256_s11 }
  0x48   : > { %p9260_p11 = pneg %p9259_p9  ;;  %p9266_p6 = por %p9265_p5, %p9264_p3 }
  0x4a   : > { %p9267_p8 = pnand %p9266_p6, %p9260_p11 }
  0x4c   : > { %9270 = shalt.err (!%p9267_p8)
}
  0x4d   : > { %s10716_s18 = smov 64   ;;  %287 = sbr.rel (%p9500_p12) target bundleno = 12262 (0x2fe6), region = 44 }
  0x4e   : > { %8916 = dma.hbm_to_vmem [thread:$0]  (!%p9461_p13), %s9508_s17, 6144, %s9510_s3, %s254_s16, %s10716_s18, %s10716_s18, %s9343_s29  }
  0x4f   : > { %s9541_s20 = sand.u32 (!%p9500_p12), 1, %s9331_s22   ;;  %p10717_p6 = scmp.ne.s32.totalorder (!%p9500_p12), %s10710_s8, 0 }
  0x50   : > { %s7844_s14 = sshll.u32 (!%p9500_p12), %s9541_s20, 5  ;;  %s290_s13 = scalar_lea.sflag (!%p9500_p12), [#allocation3], %s9541_s20 }
  0x51   : > { %s9545_s15 = scalar_lea.vmem (!%p9500_p12), [#allocation2], %s7844_s14 }
  0x52   : > { %9314 = dma.done.wait (%p10717_p6), %s290_s13, 512  }
  0x53   : > { %9316 = vsyncadd (%p10717_p6), %s290_s13, 4294966784  ;;  %s8903_s3 = smul.u32 384, %s9541_s20  ;;  %s299_s19 = scalar_lea.sflag [#allocation6], %s9541_s20 }
  0x55   : > { %s9553_s29 = scalar_lea.vmem [#allocation5], %s8903_s3 }
  0x56   : > { %9318 = dma.done.wait (%p10717_p6), %s299_s19, 6144  }
  0x57   : > { %9320 = vsyncadd (%p10717_p6), %s299_s19, 4294961152  ;;  %s7846_s12 = sshll.u32 %s9412_s25, 1  ;;  %v9345_v0 = vmov 0.0   ;;  %vm9346_vm0 = vmmov 0   ;;  %v9028_v2 = vld [vmem:[%s9545_s15 + $0x8] sm:$0xff]   ;;  %v9030_v4 = vld [vmem:[%s9545_s15] sm:$0xff]   ;;  %v377_v15 = vlaneseq }
  0x58   : > { %8357 = vmatprep.subr.bf16.mxu0 %v9345_v0  ;;  %8365 = vmatprep.subr.bf16.mxu1 %v9345_v0  ;;  %p349_p13 = scmp.lt.s32.totalorder %s7846_s12, 3  ;;  %v366_v5 = vld [vmem:[%s10698_s0] sm:$0xff]  ;;  %v367_v6 = vld [vmem:[%s10698_s0 + $0x8] sm:$0xff]  ;;  %vm393_vm1 = vcmask 261120   ;;  %v9032_v12 = vld [vmem:[%s9553_s29 + $0x18] sm:$0xff]   ;;  %vm696_vm2 = vcmask 64512  }
  0x59   : > { %8361 = vmatprep.mubr.msk.bf16.mxu0 %vm9346_vm0, %v9345_v0  ;;  %8369 = vmatprep.mubr.msk.bf16.mxu1 %vm9346_vm0, %v9345_v0  ;;  %v368_v7 = vld [vmem:[%s10699_s1] sm:$0xff]  ;;  %v9591_v8 = vpack.c.bf16 %v367_v6, %v366_v5  ;;  %v369_v9 = vld [vmem:[%s10699_s1 + $0x8] sm:$0xff]  ;;  %v9034_v14 = vld [vmem:[%s9553_s29 + $0x10] sm:$0xff]   ;;  %v9616_v16 = vshrl.u32 %v377_v15, 7  ;;  %s9349_s7 = smov 104   ;;  %s9350_s28 = smov 8  }
  0x5a   : > { %s10726_s12 = smov (!%p349_p13, %s7846_s12), 3  ;;  %8366 = vmatpush3.bf16.msra.mxu1 %v9028_v2  ;;  %v9596_v10 = vpack.c.bf16 %v369_v9, %v368_v7  ;;  %v9031_v11 = vld [vmem:[%s9553_s29 + $0x8] sm:$0xff]   ;;  %v9033_v13 = vld [vmem:[%s9553_s29] sm:$0xff]   ;;  %s9351_s18 = smov 16   ;;  %vm2043_vm3 = vcmask 130048   ;;  %vm2046_vm4 = vcmask 195584  }
  0x5b   : > { %s8142_s8 = sshll.u32 %s10726_s12, 4  ;;  %8367 = vmatprep.subr.bf16.mxu1 %v9345_v0  ;;  %v9626_v17 = vsub.s32 0, %v9616_v16  ;;  %v9632_v19 = vsub.s32 1, %v9616_v16  ;;  %v9035_v33 = vld [vmem:[%s9553_s29 + $0x28] sm:$0xff]   ;;  %v9036_v37 = vld [vmem:[%s9553_s29 + $0x20] sm:$0xff]   ;;  %v9671_v38 = vsub.s32 3, %v9616_v16 }
  0x5c   : > { %s9574_s11 = scalar_lea.vmem %s10700_s2, %s8142_s8  ;;  %s9623_s26 = scalar_lea.vmem %s10703_s5, %s8142_s8  ;;  %v9674_v39 = vsub.s32 2, %v9616_v16  ;;  %v9681_v44 = vsub.s32 4, %v9616_v16  ;;  %vm3769_vm5 = vcmask 1041409   ;;  %vm4036_vm6 = vcmask 1041408  }
  0x5d   : > { %v9027_v1 = vld [vmem:[%s9574_s11 + $0x8] sm:$0xff]   ;;  %v9029_v3 = vld [vmem:[%s9574_s11] sm:$0xff]   ;;  %s9347_s12 = smov 120   ;;  %s9348_s8 = smov 112   ;;  %vm4038_vm7 = vcmask 257024  }
  0x5e   : > { %8358 = vmatpush3.bf16.msra.mxu0 %v9027_v1  ;;  %8368 = vmatpush3.bf16.msra.mxu1 %v9030_v4  ;;  %v9629_v18 = vld [vmem:[%s9623_s26] sm:$0xff]  ;;  %s9352_s14 = smov 24   ;;  %p10718_p12 = scmp.ne.s32.totalorder %s10711_s9, 0 }
  0x5f   : > { %8359 = vmatprep.subr.bf16.mxu0 %v9345_v0  ;;  %8381 = vmatprep.subr.bf16.mxu1 %v9345_v0  ;;  %v380_v20 = vrot.slane %v9629_v18, %v9626_v17  ;;  %v446_v23 = vrot.slane %v9629_v18, %v9632_v19  ;;  %v577_v40 = vrot.slane %v9629_v18, %v9671_v38 }
  0x60   : > { %v511_v42 = vrot.slane %v9629_v18, %v9674_v39  ;;  %v642_v51 = vrot.slane %v9629_v18, %v9681_v44 }
  0x61   : > { %8370 = vmatmul.mubr.msk.bf16.vlgmr.msra.gmra.mxu1 %vm393_vm1, %v9596_v10 }
  0x62   : > { %8360 = vmatpush3.bf16.msra.mxu0 %v9029_v3  ;;  %8385 = vmatprep.mubr.msk.bf16.mxu1 %vm9346_vm0, %v9345_v0 }
  0x63   : > { %8373 = vmatprep.subr.bf16.mxu0 %v9345_v0  ;;  %8382 = vmatpush3.bf16.msra.mxu1 %v9032_v12 }
  0x64   : > { %8383 = vmatprep.subr.bf16.mxu1 %v9345_v0 }
  0x65   : > { %8362 = vmatmul.mubr.msk.bf16.vlgmr.msra.gmra.mxu0 %vm393_vm1, %v9591_v8 }
  0x66   : > { %8377 = vmatprep.mubr.msk.bf16.mxu0 %vm9346_vm0, %v9345_v0  ;;  %8374 = vmatpush3.bf16.msra.mxu0 %v9031_v11 }
  0x67   : > { %8375 = vmatprep.subr.bf16.mxu0 %v9345_v0  ;;  %8384 = vmatpush3.bf16.msra.mxu1 %v9034_v14 }
  0x68   : > { %8397 = vmatprep.subr.mxu1 %v9345_v0 }
  0x6a   : > { %8376 = vmatpush3.bf16.msra.mxu0 %v9033_v13 }
  0x6b   : > { %8389 = vmatprep.subr.bf16.mxu0 %v9345_v0 }
 0x121   : > { %v496_v22 = vpop.f32.mrf.mxu1 }
 0x122   : > { %v9642_v30 = vadd.f32 %v496_v22, %v446_v23 }
 0x123   : > { %v8371_v26 = vpop.f32.mrf.mxu1 }
 0x125   : > { %v431_v21 = vpop.f32.mrf.mxu0  ;;  %v499_v29 = vpop.f32.mrf.mxu1 }
 0x126   : > { %v9638_v25 = vadd.f32 %v431_v21, %v380_v20  ;;  %v9644_v31 = vadd.f32 %v499_v29, %v446_v23 }
 0x127   : > { %v8363_v24 = vpop.f32.mrf.mxu0  ;;  %v8372_v35 = vpop.f32.mrf.mxu1 }
 0x128   : > { %v9653_v36 = vpack.c.bf16 %v9644_v31, %v9642_v30 }
 0x129   : > { %v434_v27 = vpop.f32.mrf.mxu0 }
 0x12a   : > { %v9640_v28 = vadd.f32 %v434_v27, %v380_v20  ;;  %8386 = vmatmul.mubr.msk.bf16.vlgmr.msra.gmra.mxu1 %vm393_vm1, %v9653_v36 }
 0x12b   : > { %v8364_v32 = vpop.f32.mrf.mxu0  ;;  %8399 = vmatprep.mubr.msk.f32.mxu1 %vm9346_vm0, %v9345_v0 }
 0x12c   : > { %v9649_v34 = vpack.c.bf16 %v9640_v28, %v9638_v25 }
 0x12e   : > { %8378 = vmatmul.mubr.msk.bf16.vlgmr.msra.gmra.mxu0 %vm393_vm1, %v9649_v34 }
 0x12f   : > { %8390 = vmatpush3.bf16.msra.mxu0 %v9035_v33  ;;  %8393 = vmatprep.mubr.msk.bf16.mxu0 %vm9346_vm0, %v9345_v0 }
 0x130   : > { %8391 = vmatprep.subr.bf16.mxu0 %v9345_v0 }
 0x133   : > { %8392 = vmatpush3.bf16.msra.mxu0 %v9036_v37 }
 0x134   : > { %8417 = vmatprep.subr.mxu0 %v9345_v0 }
 0x136   : > { %8394 = vmatmul.mubr.msk.bf16.vlgmr.msra.gmra.mxu0 %vm393_vm1, %v9653_v36 }
 0x137   : > { %8419 = vmatprep.mubr.msk.f32.mxu0 %vm9346_vm0, %v9345_v0 }
 0x1ea   : > { %v627_v43 = vpop.f32.mrf.mxu1 }
 0x1eb   : > { %v9683_v45 = vadd.f32 %v627_v43, %v577_v40 }
 0x1ec   : > { %v8387_v47 = vpop.f32.mrf.mxu1 }
 0x1ed   : > { %8398 = vmatpush3.xpose.msk.msra.mxu1 %vm696_vm2, %v9683_v45 }
 0x1ee   : > { %v561_v41 = vpop.f32.mrf.mxu0  ;;  %v630_v50 = vpop.f32.mrf.mxu1  ;;  %8402 = vmatprep.subr.mxu1 %v9345_v0 }
 0x1ef   : > { %v9687_v49 = vadd.f32 %v561_v41, %v511_v42  ;;  %v9692_v52 = vadd.f32 %v630_v50, %v577_v40 }
 0x1f0   : > { %v8379_v46 = vpop.f32.mrf.mxu0  ;;  %v8388_v54 = vpop.f32.mrf.mxu1 }
 0x1f1   : > { %8400 = vmatmul.mubr.msk.f32.vlgmr.msra.gmra.mxu1 %vm696_vm2, %v9687_v49  ;;  %1099 = vrot.lane.b32.xlu1 %v9692_v52, %s9347_s12 }
 0x1f2   : > { %v564_v48 = vpop.f32.mrf.mxu0  ;;  %8403 = vmatpush3.xpose.msk.msra.mxu1 %vm696_vm2, %v9692_v52  ;;  %8404 = vmatprep.mubr.msk.f32.mxu1 %vm9346_vm0, %v9345_v0 }
 0x1f3   : > { %v9700_v56 = vadd.f32 %v564_v48, %v511_v42  ;;  %8407 = vmatprep.subr.mxu1 %v9345_v0 }
 0x1f4   : > { %v8380_v53 = vpop.f32.mrf.mxu0 }
 0x1f5   : > { %8405 = vmatmul.mubr.msk.f32.vlgmr.msra.gmra.mxu1 %vm696_vm2, %v9700_v56  ;;  %1019 = vrot.lane.b32.xlu1 %v9687_v49, %s9347_s12 }
 0x1f6   : > { %v689_v55 = vpop.f32.mrf.mxu0  ;;  %8409 = vmatprep.mubr.msk.f32.mxu1 %vm9346_vm0, %v9345_v0 }
 0x1f7   : > { %v9702_v57 = vadd.f32 %v689_v55, %v642_v51 }
 0x1f8   : > { %v8395_v58 = vpop.f32.mrf.mxu0 }
 0x1f9   : > { %8408 = vmatpush3.msra.mxu1 %v9702_v57 }
 0x1fa   : > { %v692_v59 = vpop.f32.mrf.mxu0  ;;  %8412 = vmatprep.subr.mxu1 %v9345_v0 }
 0x1fb   : > { %v9712_v60 = vadd.f32 %v692_v59, %v642_v51 }
 0x1fc   : > { %v8396_v61 = vpop.f32.mrf.mxu0 }
 0x263   : > { %v1100_v13 = vpop.permute.xlu1 %1099 }
 0x267   : > { %v1020_v21 = vpop.permute.xlu1 %1019 }
 0x2b1   : > { %v769_v62 = vpop.f32.mrf.mxu1 }
 0x2b2   : > { %v849_v63 = vmul.f32 0.35355338, %v769_v62 }
 0x2b3   : > { %v8401_v1 = vpop.f32.mrf.mxu1 }
 0x2b4   : > { %v851_v2 = vsel %vm696_vm2, %v849_v63, -inf }
 0x2b5   : > { %852 = vmax.xlane.f32.xlu0 %v851_v2  ;;  %v845_v3 = vpop.f32.mrf.mxu1 }
 0x2b6   : > { %v850_v4 = vmul.f32 0.35355338, %v845_v3 }
 0x2b7   : > { %v8406_v5 = vpop.f32.mrf.mxu1 }
 0x2b8   : > { %v854_v6 = vsel %vm696_vm2, %v850_v4, -inf }
 0x2b9   : > { %855 = vmax.xlane.f32.xlu0 %v854_v6 }
 0x2cf   : > { %1021 = vrot.lane.b32.xlu0 %v9683_v45, %s9347_s12 }
 0x33e   : > { %v853_v7 = vpop.xlane.xlu0 %852 }
 0x33f   : > { %v857_v9 = vsub.f32 %v849_v63, %v853_v7 }
 0x341   : > { %v859_v11 = vmul.f32 1.442695, %v857_v9 }
 0x342   : > { %v856_v12 = vpop.xlane.xlu0 %855 }
 0x343   : > { %9083 = vpow2.f32 %v859_v11  ;;  %v858_v14 = vsub.f32 %v850_v4, %v856_v12 }
 0x345   : > { %v861_v15 = vmul.f32 1.442695, %v858_v14 }
 0x346   : > { %v1022_v20 = vpop.permute.xlu0 %1021 }
 0x347   : > { %9085 = vpow2.f32 %v861_v15  ;;  %8418 = vmatpush3.xpose.msk.msra.mxu0 %vm696_vm2, %v1022_v20 }
 0x348   : > { %8427 = vmatprep.subr.mxu0 %v9345_v0 }
 0x34a   : > { %8420 = vmatmul.mubr.msk.f32.vlgmr.msra.gmra.mxu0 %vm696_vm2, %v1020_v21 }
 0x34b   : > { %8429 = vmatprep.mubr.msk.f32.mxu0 %vm9346_vm0, %v9345_v0 }
 0x350   : > { %v9084_v22 = vpop.eup %9083 }
 0x351   : > { %v863_v23 = vsel %vm696_vm2, %v9084_v22, 0.0 }
 0x352   : > { %864 = vadd.xlane.f32.xlu1 %v863_v23 }
 0x354   : > { %v9086_v24 = vpop.eup %9085 }
 0x355   : > { %v866_v26 = vsel %vm696_vm2, %v9086_v24, 0.0 }
 0x356   : > { %867 = vadd.xlane.f32.xlu1 %v866_v26 }
 0x367   : > { %1097 = vrot.lane.b32.xlu1 %v9700_v56, %s9347_s12 }
 0x3db   : > { %v865_v27 = vpop.xlane.xlu1 %864 }
 0x3dc   : > { %9087 = vrcp.f32 %v865_v27 }
 0x3df   : > { %v868_v29 = vpop.xlane.xlu1 %867 }
 0x3e0   : > { %9089 = vrcp.f32 %v868_v29 }
 0x3e3   : > { %v1098_v40 = vpop.permute.xlu1 %1097 }
 0x3e9   : > { %v9088_v32 = vpop.eup %9087 }
 0x3ea   : > { %v871_v33 = vmul.f32 %v9088_v32, %v9084_v22 }
 0x3ec   : > { %8410 = vmatmul.mubr.msk.f32.vlgmr.msra.gmra.mxu1 %vm696_vm2, %v871_v33 }
 0x3ed   : > { %v9090_v35 = vpop.eup %9089  ;;  %8413 = vmatpush3.msra.mxu1 %v9712_v60  ;;  %8414 = vmatprep.mubr.msk.f32.mxu1 %vm9346_vm0, %v9345_v0 }
 0x3ee   : > { %8422 = vmatprep.subr.mxu1 %v9345_v0  ;;  %v872_v37 = vmul.f32 %v9090_v35, %v9086_v24 }
 0x3f0   : > { %8415 = vmatmul.mubr.msk.f32.vlgmr.msra.gmra.mxu1 %vm696_vm2, %v872_v37 }
 0x3f1   : > { %8423 = vmatpush3.xpose.msk.msra.mxu1 %vm696_vm2, %v1100_v13  ;;  %8424 = vmatprep.mubr.msk.f32.mxu1 %vm9346_vm0, %v9345_v0 }
 0x3f2   : > { %8432 = vmatprep.subr.mxu1 %v9345_v0 }
 0x3f4   : > { %8425 = vmatmul.mubr.msk.f32.vlgmr.msra.gmra.mxu1 %vm696_vm2, %v1098_v40 }
 0x3f5   : > { %8434 = vmatprep.mubr.msk.f32.mxu1 %vm9346_vm0, %v9345_v0 }
 0x40a   : > { %v1093_v41 = vpop.f32.mrf.mxu0 }
 0x40b   : > { %v1175_v42 = vmul.f32 0.35355338, %v1093_v41 }
 0x40c   : > { %v8421_v43 = vpop.f32.mrf.mxu0 }
 0x40d   : > { %v1177_v46 = vsel %vm696_vm2, %v1175_v42, -inf }
 0x40e   : > { %1178 = vmax.xlane.f32.xlu0 %v1177_v46 }
 0x497   : > { %v1179_v47 = vpop.xlane.xlu0 %1178 }
 0x498   : > { %v1183_v48 = vsub.f32 %v1175_v42, %v1179_v47 }
 0x49a   : > { %v1185_v50 = vmul.f32 1.442695, %v1183_v48 }
 0x49c   : > { %9091 = vpow2.f32 %v1185_v50 }
 0x4a9   : > { %v9092_v51 = vpop.eup %9091 }
 0x4aa   : > { %v1189_v53 = vsel %vm696_vm2, %v9092_v51, 0.0 }
 0x4ab   : > { %1190 = vadd.xlane.f32.xlu0 %v1189_v53 }
 0x4ac   : > { %v9745_v54 = vpop.f32.mrf.mxu1 }
 0x4ae   : > { %v8411_v55 = vpop.f32.mrf.mxu1 }
 0x4b0   : > { %v9747_v58 = vpop.f32.mrf.mxu1 }
 0x4b2   : > { %v8416_v59 = vpop.f32.mrf.mxu1 }
 0x4b4   : > { %v1171_v61 = vpop.f32.mrf.mxu1 }
 0x4b5   : > { %v1176_v62 = vmul.f32 0.35355338, %v1171_v61 }
 0x4b6   : > { %v8426_v63 = vpop.f32.mrf.mxu1 }
 0x4b7   : > { %v1180_v1 = vsel %vm696_vm2, %v1176_v62, -inf }
 0x4b8   : > { %1181 = vmax.xlane.f32.xlu1 %v1180_v1 }
 0x4c9   : > { %1277 = vrot.lane.b32.xlu1 %v9712_v60, %s9347_s12 }
 0x4cd   : > { %1355 = vrot.lane.b32.xlu1 %v9683_v45, %s9348_s8 }
 0x4d1   : > { %1433 = vrot.lane.b32.xlu1 %v9692_v52, %s9348_s8 }
 0x4d5   : > { %1431 = vrot.lane.b32.xlu1 %v9700_v56, %s9348_s8 }
 0x534   : > { %v1191_v9 = vpop.xlane.xlu0 %1190 }
 0x541   : > { %v1182_v2 = vpop.xlane.xlu1 %1181 }
 0x542   : > { %v1184_v3 = vsub.f32 %v1176_v62, %v1182_v2 }
 0x544   : > { %v1187_v4 = vmul.f32 1.442695, %v1184_v3 }
 0x545   : > { %v1278_v5 = vpop.permute.xlu1 %1277 }
 0x546   : > { %9093 = vpow2.f32 %v1187_v4  ;;  %8433 = vmatpush3.msra.mxu1 %v1278_v5 }
 0x547   : > { %8442 = vmatprep.subr.mxu1 %v9345_v0  ;;  %9095 = vrcp.f32 %v1191_v9 }
 0x549   : > { %v1356_v15 = vpop.permute.xlu1 %1355 }
 0x54d   : > { %v1434_v22 = vpop.permute.xlu1 %1433 }
 0x551   : > { %v1432_v24 = vpop.permute.xlu1 %1431 }
 0x553   : > { %v9094_v6 = vpop.eup %9093 }
 0x554   : > { %v1192_v7 = vsel %vm696_vm2, %v9094_v6, 0.0  ;;  %v9096_v12 = vpop.eup %9095 }
 0x555   : > { %1193 = vadd.xlane.f32.xlu0 %v1192_v7  ;;  %v1197_v14 = vmul.f32 %v9096_v12, %v9092_v51 }
 0x56b   : > { %1200 = vrot.lane.b32.xlu0 %v9702_v57, %s9347_s12 }
 0x56f   : > { %1353 = vrot.lane.b32.xlu0 %v9687_v49, %s9348_s8 }
 0x5de   : > { %v1194_v11 = vpop.xlane.xlu0 %1193 }
 0x5df   : > { %9097 = vrcp.f32 %v1194_v11 }
 0x5e2   : > { %v1201_v13 = vpop.permute.xlu0 %1200 }
 0x5e3   : > { %8428 = vmatpush3.msra.mxu0 %v1201_v13 }
 0x5e4   : > { %8430 = vmatmul.mubr.msk.f32.vlgmr.msra.gmra.mxu0 %vm696_vm2, %v1197_v14  ;;  %8437 = vmatprep.subr.mxu0 %v9345_v0 }
 0x5e5   : > { %8438 = vmatpush3.xpose.msk.msra.mxu0 %vm696_vm2, %v1356_v15  ;;  %8439 = vmatprep.mubr.msk.f32.mxu0 %vm9346_vm0, %v9345_v0 }
 0x5e6   : > { %v1354_v20 = vpop.permute.xlu0 %1353  ;;  %8447 = vmatprep.subr.mxu0 %v9345_v0 }
 0x5e8   : > { %8440 = vmatmul.mubr.msk.f32.vlgmr.msra.gmra.mxu0 %vm696_vm2, %v1354_v20 }
 0x5e9   : > { %8449 = vmatprep.mubr.msk.f32.mxu0 %vm9346_vm0, %v9345_v0 }
 0x5ec   : > { %v9098_v21 = vpop.eup %9097 }
 0x5ed   : > { %v1198_v23 = vmul.f32 %v9098_v21, %v9094_v6 }
 0x5ef   : > { %8435 = vmatmul.mubr.msk.f32.vlgmr.msra.gmra.mxu1 %vm696_vm2, %v1198_v23 }
 0x5f0   : > { %8443 = vmatpush3.xpose.msk.msra.mxu1 %vm696_vm2, %v1434_v22  ;;  %8444 = vmatprep.mubr.msk.f32.mxu1 %vm9346_vm0, %v9345_v0 }
 0x5f1   : > { %8452 = vmatprep.subr.mxu1 %v9345_v0 }
 0x5f3   : > { %8445 = vmatmul.mubr.msk.f32.vlgmr.msra.gmra.mxu1 %vm696_vm2, %v1432_v24 }
 0x5f4   : > { %8454 = vmatprep.mubr.msk.f32.mxu1 %vm9346_vm0, %v9345_v0 }
 0x6a4   : > { %v9781_v26 = vpop.f32.mrf.mxu0 }
 0x6a6   : > { %v8431_v27 = vpop.f32.mrf.mxu0 }
 0x6a8   : > { %v1427_v29 = vpop.f32.mrf.mxu0 }
 0x6a9   : > { %v1509_v32 = vmul.f32 0.35355338, %v1427_v29 }
 0x6aa   : > { %v8441_v33 = vpop.f32.mrf.mxu0 }
 0x6ab   : > { %v1511_v35 = vsel %vm696_vm2, %v1509_v32, -inf }
 0x6ac   : > { %1512 = vmax.xlane.f32.xlu0 %v1511_v35 }
 0x6af   : > { %v9784_v37 = vpop.f32.mrf.mxu1 }
 0x6b0   : > { %v8967_v40 = vpack.i.bf16 %v9784_v37, %v9781_v26 }
 0x6b1   : > { %v8436_v41 = vpop.f32.mrf.mxu1 }
 0x6b3   : > { %v1505_v42 = vpop.f32.mrf.mxu1 }
 0x6b4   : > { %v1510_v43 = vmul.f32 0.35355338, %v1505_v42 }
 0x6b5   : > { %v8446_v46 = vpop.f32.mrf.mxu1 }
 0x6b6   : > { %v1514_v47 = vsel %vm696_vm2, %v1510_v43, -inf }
 0x6b7   : > { %1515 = vmax.xlane.f32.xlu1 %v1514_v47 }
 0x6c8   : > { %1609 = vrot.lane.b32.xlu1 %v9712_v60, %s9348_s8 }
 0x6cc   : > { %1687 = vrot.lane.b32.xlu1 %v9683_v45, %s9349_s7 }
 0x6d0   : > { %1765 = vrot.lane.b32.xlu1 %v9692_v52, %s9349_s7 }
 0x6d4   : > { %1763 = vrot.lane.b32.xlu1 %v9700_v56, %s9349_s7 }
 0x735   : > { %v1513_v48 = vpop.xlane.xlu0 %1512 }
 0x736   : > { %v1517_v50 = vsub.f32 %v1509_v32, %v1513_v48 }
 0x738   : > { %v1519_v51 = vmul.f32 1.442695, %v1517_v50 }
 0x73a   : > { %9099 = vpow2.f32 %v1519_v51 }
 0x740   : > { %v1516_v53 = vpop.xlane.xlu1 %1515 }
 0x741   : > { %v1518_v55 = vsub.f32 %v1510_v43, %v1516_v53 }
 0x743   : > { %v1521_v59 = vmul.f32 1.442695, %v1518_v55 }
 0x744   : > { %v1610_v61 = vpop.permute.xlu1 %1609 }
 0x745   : > { %9101 = vpow2.f32 %v1521_v59  ;;  %8453 = vmatpush3.msra.mxu1 %v1610_v61 }
 0x746   : > { %8462 = vmatprep.subr.mxu1 %v9345_v0 }
 0x747   : > { %v9100_v62 = vpop.eup %9099 }
 0x748   : > { %v1523_v45 = vsel %vm696_vm2, %v9100_v62, 0.0  ;;  %v1688_v5 = vpop.permute.xlu1 %1687 }
 0x749   : > { %1524 = vadd.xlane.f32.xlu0 %v1523_v45  ;;  %v9038_v45 = vld [vmem:[%s9553_s29 + $0x40] sm:$0xff]  }
 0x74c   : > { %v1766_v7 = vpop.permute.xlu1 %1765 }
 0x750   : > { %v1764_v11 = vpop.permute.xlu1 %1763 }
 0x752   : > { %v9102_v52 = vpop.eup %9101 }
 0x753   : > { %v1526_v63 = vsel %vm696_vm2, %v9102_v52, 0.0 }
 0x754   : > { %1527 = vadd.xlane.f32.xlu0 %v1526_v63  ;;  %v9040_v63 = vld [vmem:[%s9553_s29 + $0x60] sm:$0xff]  }
 0x76a   : > { %1533 = vrot.lane.b32.xlu0 %v9702_v57, %s9348_s8 }
 0x76e   : > { %1685 = vrot.lane.b32.xlu0 %v9687_v49, %s9349_s7 }
 0x7d2   : > { %v1525_v56 = vpop.xlane.xlu0 %1524 }
 0x7d3   : > { %9103 = vrcp.f32 %v1525_v56  ;;  %v9041_v56 = vld [vmem:[%s9553_s29 + $0x38] sm:$0xff]  }
 0x7dd   : > { %v1528_v1 = vpop.xlane.xlu0 %1527 }
 0x7de   : > { %9105 = vrcp.f32 %v1528_v1 }
 0x7e0   : > { %v9104_v2 = vpop.eup %9103 }
 0x7e1   : > { %v1534_v3 = vpop.permute.xlu0 %1533  ;;  %v1531_v4 = vmul.f32 %v9104_v2, %v9100_v62  ;;  %v9042_v2 = vld [vmem:[%s9553_s29 + $0x30] sm:$0xff]  }
 0x7e2   : > { %8448 = vmatpush3.msra.mxu0 %v1534_v3 }
 0x7e3   : > { %8450 = vmatmul.mubr.msk.f32.vlgmr.msra.gmra.mxu0 %vm696_vm2, %v1531_v4  ;;  %8457 = vmatprep.subr.mxu0 %v9345_v0 }
 0x7e4   : > { %8458 = vmatpush3.xpose.msk.msra.mxu0 %vm696_vm2, %v1688_v5  ;;  %8459 = vmatprep.mubr.msk.f32.mxu0 %vm9346_vm0, %v9345_v0 }
 0x7e5   : > { %v1686_v6 = vpop.permute.xlu0 %1685  ;;  %8467 = vmatprep.subr.mxu0 %v9345_v0 }
 0x7e7   : > { %8460 = vmatmul.mubr.msk.f32.vlgmr.msra.gmra.mxu0 %vm696_vm2, %v1686_v6 }
 0x7e8   : > { %8469 = vmatprep.mubr.msk.f32.mxu0 %vm9346_vm0, %v9345_v0 }
 0x7eb   : > { %v9106_v49 = vpop.eup %9105 }
 0x7ec   : > { %v1532_v9 = vmul.f32 %v9106_v49, %v9102_v52  ;;  %v9039_v52 = vld [vmem:[%s9553_s29 + $0x68] sm:$0xff]  }
 0x7ee   : > { %8455 = vmatmul.mubr.msk.f32.vlgmr.msra.gmra.mxu1 %vm696_vm2, %v1532_v9 }
 0x7ef   : > { %8463 = vmatpush3.xpose.msk.msra.mxu1 %vm696_vm2, %v1766_v7  ;;  %8464 = vmatprep.mubr.msk.f32.mxu1 %vm9346_vm0, %v9345_v0 }
 0x7f0   : > { %8472 = vmatprep.subr.mxu1 %v9345_v0 }
 0x7f2   : > { %8465 = vmatmul.mubr.msk.f32.vlgmr.msra.gmra.mxu1 %vm696_vm2, %v1764_v11 }
 0x7f3   : > { %8474 = vmatprep.mubr.msk.f32.mxu1 %vm9346_vm0, %v9345_v0 }
 0x8a3   : > { %v1605_v12 = vpop.f32.mrf.mxu0 }
 0x8a5   : > { %v8451_v13 = vpop.f32.mrf.mxu0 }
 0x8a7   : > { %v1759_v14 = vpop.f32.mrf.mxu0 }
 0x8a8   : > { %v1841_v15 = vmul.f32 0.35355338, %v1759_v14 }
 0x8a9   : > { %v8461_v20 = vpop.f32.mrf.mxu0 }
 0x8aa   : > { %v1843_v21 = vsel %vm696_vm2, %v1841_v15, -inf }
 0x8ab   : > { %1844 = vmax.xlane.f32.xlu0 %v1843_v21 }
 0x8ae   : > { %v1681_v22 = vpop.f32.mrf.mxu1 }
 0x8af   : > { %v8972_v33 = vpack.i.bf16 %v1681_v22, %v1605_v12 }
 0x8b0   : > { %v8456_v23 = vpop.f32.mrf.mxu1 }
 0x8b2   : > { %v1837_v24 = vpop.f32.mrf.mxu1 }
 0x8b3   : > { %v1842_v27 = vmul.f32 0.35355338, %v1837_v24 }
 0x8b4   : > { %v8466_v29 = vpop.f32.mrf.mxu1 }
 0x8b5   : > { %v1846_v32 = vsel %vm696_vm2, %v1842_v27, -inf }
 0x8b6   : > { %1847 = vmax.xlane.f32.xlu1 %v1846_v32 }
 0x8c7   : > { %1941 = vrot.lane.b32.xlu1 %v9712_v60, %s9349_s7 }
 0x8cb   : > { %8968 = vrot.lane.b32.xlu1 %v8967_v40, %s9350_s28 }
 0x8cf   : > { %8973 = vrot.lane.b32.xlu1 %v8972_v33, %s9351_s18 }
 0x934   : > { %v1845_v35 = vpop.xlane.xlu0 %1844 }
 0x935   : > { %v1849_v41 = vsub.f32 %v1841_v15, %v1845_v35 }
 0x937   : > { %v1851_v42 = vmul.f32 1.442695, %v1849_v41 }
 0x939   : > { %9107 = vpow2.f32 %v1851_v42 }
 0x93f   : > { %v1848_v43 = vpop.xlane.xlu1 %1847 }
 0x940   : > { %v1850_v46 = vsub.f32 %v1842_v27, %v1848_v43 }
 0x942   : > { %v1853_v47 = vmul.f32 1.442695, %v1850_v46 }
 0x943   : > { %v1942_v48 = vpop.permute.xlu1 %1941 }
 0x944   : > { %9109 = vpow2.f32 %v1853_v47  ;;  %8473 = vmatpush3.msra.mxu1 %v1942_v48  ;;  %v9043_v47 = vld [vmem:[%s9553_s29 + $0x58] sm:$0xff]  }
 0x945   : > { %8485 = vmatprep.subr.bf16.mxu1 %v9345_v0 }
 0x946   : > { %v9108_v60 = vpop.eup %9107 }
 0x947   : > { %v1855_v26 = vsel %vm696_vm2, %v9108_v60, 0.0  ;;  %v8969_v15 = vpop.permute.xlu1 %8968 }
 0x948   : > { %1856 = vadd.xlane.f32.xlu0 %v1855_v26  ;;  %v8971_v21 = vunpack.i.h.bf16 %v8969_v15  ;;  %v8970_v22 = vunpack.i.l.bf16 %v8969_v15 }
 0x94a   : > { %v2042_v29 = vsel %vm696_vm2, %v9747_v58, %v8971_v21  ;;  %v2041_v32 = vsel %vm696_vm2, %v9745_v54, %v8970_v22  ;;  %v9891_v54 = vsub.s32 5, %v9616_v16 }
 0x94b   : > { %v8974_v20 = vpop.permute.xlu1 %8973 }
 0x94c   : > { %v8976_v23 = vunpack.i.h.bf16 %v8974_v20  ;;  %v8975_v24 = vunpack.i.l.bf16 %v8974_v20  ;;  %v2058_v58 = vrot.slane %v9629_v18, %v9891_v54 }
 0x94e   : > { %v2045_v41 = vsel %vm2043_vm3, %v2042_v29, %v8976_v23  ;;  %v2044_v42 = vsel %vm2043_vm3, %v2041_v32, %v8975_v24  ;;  %v2059_v26 = vadd.f32 %v2058_v58, %v9638_v25 }
 0x951   : > { %v9110_v37 = vpop.eup %9109 }
 0x952   : > { %v1858_v40 = vsel %vm696_vm2, %v9110_v37, 0.0 }
 0x953   : > { %1859 = vadd.xlane.f32.xlu0 %v1858_v40 }
 0x969   : > { %1865 = vrot.lane.b32.xlu0 %v9702_v57, %s9349_s7  ;;  %v9037_v57 = vld [vmem:[%s9553_s29 + $0x48] sm:$0xff]  }
 0x9d1   : > { %v1857_v50 = vpop.xlane.xlu0 %1856 }
 0x9d2   : > { %9111 = vrcp.f32 %v1857_v50  ;;  %v2186_v50 = vsub.s32 7, %v9616_v16 }
 0x9dc   : > { %v1860_v51 = vpop.xlane.xlu0 %1859 }
 0x9dd   : > { %9113 = vrcp.f32 %v1860_v51 }
 0x9df   : > { %v9112_v53 = vpop.eup %9111 }
 0x9e0   : > { %v1866_v55 = vpop.permute.xlu0 %1865  ;;  %v1863_v59 = vmul.f32 %v9112_v53, %v9108_v60  ;;  %v9044_v60 = vld [vmem:[%s9553_s29 + $0x50] sm:$0xff]  }
 0x9e1   : > { %8468 = vmatpush3.msra.mxu0 %v1866_v55  ;;  %v2124_v55 = vsub.s32 6, %v9616_v16 }
 0x9e2   : > { %8470 = vmatmul.mubr.msk.f32.vlgmr.msra.gmra.mxu0 %vm696_vm2, %v1863_v59  ;;  %8477 = vmatprep.subr.bf16.mxu0 %v9345_v0 }
 0x9e3   : > { %8481 = vmatprep.mubr.msk.bf16.mxu0 %vm9346_vm0, %v9345_v0  ;;  %8478 = vmatpush3.bf16.msra.mxu0 %v9041_v56  ;;  %v9908_v56 = vld [vmem:[%s9623_s26 + $0x8] sm:$0x3f] }
 0x9e4   : > { %8479 = vmatprep.subr.bf16.mxu0 %v9345_v0 }
 0x9e7   : > { %8480 = vmatpush3.bf16.msra.mxu0 %v9042_v2  ;;  %v2249_v2 = vrot.slane %v9908_v56, %v9626_v17 }
 0x9e8   : > { %8493 = vmatprep.subr.bf16.mxu0 %v9345_v0 }
 0x9ea   : > { %v9114_v61 = vpop.eup %9113 }
 0x9eb   : > { %v1864_v62 = vmul.f32 %v9114_v61, %v9110_v37 }
 0x9ed   : > { %8475 = vmatmul.mubr.msk.f32.vlgmr.msra.gmra.mxu1 %vm696_vm2, %v1864_v62  ;;  %v2187_v62 = vrot.slane %v9629_v18, %v2186_v50 }
 0x9ee   : > { %8486 = vmatpush3.bf16.msra.mxu1 %v9037_v57  ;;  %8489 = vmatprep.mubr.msk.bf16.mxu1 %vm9346_vm0, %v9345_v0 }
 0x9ef   : > { %8487 = vmatprep.subr.bf16.mxu1 %v9345_v0 }
 0x9f2   : > { %8488 = vmatpush3.bf16.msra.mxu1 %v9038_v45 }
 0x9f3   : > { %8501 = vmatprep.subr.bf16.mxu1 %v9345_v0 }
 0x9f5   : > { %8490 = vmatmul.mubr.msk.bf16.vlgmr.msra.gmra.mxu1 %vm393_vm1, %v9653_v36 }
 0x9f6   : > { %8502 = vmatpush3.bf16.msra.mxu1 %v9039_v52  ;;  %8505 = vmatprep.mubr.msk.bf16.mxu1 %vm9346_vm0, %v9345_v0 }
 0x9f7   : > { %8503 = vmatprep.subr.bf16.mxu1 %v9345_v0 }
 0x9fa   : > { %8504 = vmatpush3.bf16.msra.mxu1 %v9040_v63  ;;  %v2125_v63 = vrot.slane %v9629_v18, %v2124_v55 }
 0x9fb   : > { %8514 = vmatprep.subr.mxu1 %v9345_v0 }
 0x9fd   : > { %8506 = vmatmul.mubr.msk.bf16.vlgmr.msra.gmra.mxu1 %vm393_vm1, %v9649_v34 }
 0x9fe   : > { %8516 = vmatprep.mubr.msk.f32.mxu1 %vm9346_vm0, %v9345_v0 }
 0xaa2   : > { %v1937_v36 = vpop.f32.mrf.mxu0 }
 0xaa4   : > { %v8471_v1 = vpop.f32.mrf.mxu0 }
 0xaad   : > { %v2013_v3 = vpop.f32.mrf.mxu1 }
 0xaae   : > { %v8977_v4 = vpack.i.bf16 %v2013_v3, %v1937_v36 }
 0xaaf   : > { %v8476_v5 = vpop.f32.mrf.mxu1 }
 0xab0   : > { %8978 = vrot.lane.b32.xlu0 %v8977_v4, %s9352_s14 }
 0xab5   : > { %v9863_v6 = vpop.f32.mrf.mxu1 }
 0xab7   : > { %v8491_v49 = vpop.f32.mrf.mxu1 }
 0xab9   : > { %v9865_v7 = vpop.f32.mrf.mxu1 }
 0xabb   : > { %v8492_v9 = vpop.f32.mrf.mxu1 }
 0xabc   : > { %v9917_v9 = vadd.f32 %v9863_v6, %v2125_v63  ;;  %v9931_v6 = vadd.f32 %v9865_v7, %v2125_v63 }
 0xabd   : > { %v9867_v11 = vpop.f32.mrf.mxu1 }
 0xabe   : > { %v9921_v15 = vadd.f32 %v9867_v11, %v2249_v2 }
 0xabf   : > { %v8507_v12 = vpop.f32.mrf.mxu1 }
 0xac1   : > { %v9869_v13 = vpop.f32.mrf.mxu1 }
 0xac2   : > { %v9937_v11 = vadd.f32 %v9869_v13, %v2249_v2 }
 0xac3   : > { %v8508_v14 = vpop.f32.mrf.mxu1 }
 0xb22   : > { %v8979_v27 = vpop.permute.xlu0 %8978 }
 0xb23   : > { %v8981_v33 = vunpack.i.h.bf16 %v8979_v27  ;;  %v8980_v35 = vunpack.i.l.bf16 %v8979_v27 }
 0xb25   : > { %v2048_v43 = vsel %vm2046_vm4, %v2045_v41, %v8981_v33  ;;  %v2047_v46 = vsel %vm2046_vm4, %v2044_v42, %v8980_v35 }
 0xb26   : > { %v2054_v48 = vpack.c.bf16 %v2048_v43, %v2047_v46 }
 0xb28   : > { %8482 = vmatmul.mubr.msk.bf16.vlgmr.msra.gmra.mxu0 %vm393_vm1, %v2054_v48 }
 0xb29   : > { %8494 = vmatpush3.bf16.msra.mxu0 %v9043_v47  ;;  %8497 = vmatprep.mubr.msk.bf16.mxu0 %vm9346_vm0, %v9345_v0 }
 0xb2a   : > { %8495 = vmatprep.subr.bf16.mxu0 %v9345_v0 }
 0xb2d   : > { %8496 = vmatpush3.bf16.msra.mxu0 %v9044_v60 }
 0xb2e   : > { %8509 = vmatprep.subr.mxu0 %v9345_v0 }
 0xb30   : > { %8498 = vmatmul.mubr.msk.bf16.vlgmr.msra.gmra.mxu0 %vm393_vm1, %v9649_v34  ;;  %v2060_v34 = vadd.f32 %v2058_v58, %v9640_v28 }
 0xb31   : > { %8511 = vmatprep.mubr.msk.f32.mxu0 %vm9346_vm0, %v9345_v0 }
 0xbe8   : > { %v2110_v37 = vpop.f32.mrf.mxu0 }
 0xbe9   : > { %v2111_v40 = vadd.f32 %v2110_v37, %v2059_v26 }
 0xbea   : > { %v8483_v51 = vpop.f32.mrf.mxu0 }
 0xbeb   : > { %v3721_v53 = vsel %vm393_vm1, %v2111_v40, 0.0 }
 0xbec   : > { %v3722_v59 = vrot.slane %v3721_v53, 4  ;;  %v2113_v61 = vpop.f32.mrf.mxu0 }
 0xbed   : > { %v2114_v57 = vadd.f32 %v2113_v61, %v2060_v34 }
 0xbee   : > { %v3723_v25 = vadd.f32 %v3722_v59, %v3721_v53  ;;  %v8484_v45 = vpop.f32.mrf.mxu0 }
 0xbef   : > { %v3728_v52 = vsel %vm393_vm1, %v2114_v57, 0.0 }
 0xbf0   : > { %v3724_v28 = vrot.slane %v3723_v25, 2  ;;  %v3729_v36 = vrot.slane %v3728_v52, 4  ;;  %v2234_v1 = vpop.f32.mrf.mxu0 }
 0xbf1   : > { %v9912_v3 = vadd.f32 %v2234_v1, %v2187_v62 }
 0xbf2   : > { %v3725_v4 = vadd.f32 %v3724_v28, %v3723_v25  ;;  %v3730_v5 = vadd.f32 %v3729_v36, %v3728_v52  ;;  %v8499_v49 = vpop.f32.mrf.mxu0 }
 0xbf3   : > { %8510 = vmatpush3.xpose.msk.msra.mxu0 %vm696_vm2, %v9912_v3 }
 0xbf4   : > { %v3726_v18 = vrot.slane %v3725_v4, 1  ;;  %v3731_v12 = vrot.slane %v3730_v5, 2  ;;  %v2237_v14 = vpop.f32.mrf.mxu0  ;;  %8519 = vmatprep.subr.mxu0 %v9345_v0 }
 0xbf5   : > { %v9923_v20 = vadd.f32 %v2237_v14, %v2187_v62 }
 0xbf6   : > { %v3732_v21 = vadd.f32 %v3731_v12, %v3730_v5  ;;  %v8500_v22 = vpop.f32.mrf.mxu0  ;;  %8512 = vmatmul.mubr.msk.f32.vlgmr.msra.gmra.mxu0 %vm696_vm2, %v9917_v9  ;;  %v3727_v23 = vadd.f32 %v3726_v18, %v3725_v4 }
 0xbf7   : > { %8515 = vmatpush3.xpose.msk.msra.mxu1 %vm696_vm2, %v9923_v20  ;;  %8520 = vmatpush3.msra.mxu0 %v9921_v15 }
 0xbf8   : > { %v3733_v24 = vrot.slane %v3732_v21, 1  ;;  %8524 = vmatprep.subr.mxu1 %v9345_v0  ;;  %8521 = vmatprep.mubr.msk.f32.mxu0 %vm9346_vm0, %v9345_v0  ;;  %v3736_v7 = vmul.f32 0.125, %v3727_v23 }
 0xbf9   : > { %8529 = vmatprep.subr.mxu0 %v9345_v0 }
 0xbfa   : > { %v3734_v27 = vadd.f32 %v3733_v24, %v3732_v21  ;;  %8517 = vmatmul.mubr.msk.f32.vlgmr.msra.gmra.mxu1 %vm696_vm2, %v9931_v6 }
 0xbfb   : > { %8525 = vmatpush3.msra.mxu1 %v9937_v11  ;;  %8526 = vmatprep.mubr.msk.f32.mxu1 %vm9346_vm0, %v9345_v0 }
 0xbfc   : > { %8534 = vmatprep.subr.mxu1 %v9345_v0  ;;  %v3737_v29 = vmul.f32 0.125, %v3734_v27 }
 0xbfe   : > { %v9947_v32 = vsel %vm3769_vm5, %v3737_v29, %v3736_v7 }
 0xcb6   : > { %v2375_v13 = vpop.f32.mrf.mxu0 }
 0xcb7   : > { %v2455_v33 = vmul.f32 0.35355338, %v2375_v13 }
 0xcb8   : > { %v8513_v35 = vpop.f32.mrf.mxu0 }
 0xcb9   : > { %v2457_v41 = vsel %vm696_vm2, %v2455_v33, -inf }
 0xcba   : > { %v2451_v42 = vpop.f32.mrf.mxu1  ;;  %2458 = vmax.xlane.f32.xlu1 %v2457_v41 }
 0xcbb   : > { %v2456_v43 = vmul.f32 0.35355338, %v2451_v42 }
 0xcbc   : > { %v8518_v46 = vpop.f32.mrf.mxu1 }
 0xcbd   : > { %v2460_v47 = vsel %vm696_vm2, %v2456_v43, -inf }
 0xcbe   : > { %2461 = vmax.xlane.f32.xlu0 %v2460_v47 }
 0xccb   : > { %2627 = vrot.lane.b32.xlu1 %v9912_v3, %s9347_s12 }
 0xccf   : > { %2625 = vrot.lane.b32.xlu1 %v9917_v9, %s9347_s12 }
 0xcd3   : > { %2703 = vrot.lane.b32.xlu1 %v9931_v6, %s9347_s12 }
 0xd43   : > { %v2459_v48 = vpop.xlane.xlu1 %2458 }
 0xd44   : > { %v2463_v60 = vsub.f32 %v2455_v33, %v2459_v48 }
 0xd46   : > { %v2465_v58 = vmul.f32 1.442695, %v2463_v60 }
 0xd47   : > { %v2462_v26 = vpop.xlane.xlu0 %2461  ;;  %v2628_v62 = vpop.permute.xlu1 %2627 }
 0xd48   : > { %9115 = vpow2.f32 %v2465_v58  ;;  %v2464_v37 = vsub.f32 %v2456_v43, %v2462_v26 }
 0xd4a   : > { %v2467_v40 = vmul.f32 1.442695, %v2464_v37 }
 0xd4b   : > { %v2626_v63 = vpop.permute.xlu1 %2625 }
 0xd4c   : > { %9117 = vpow2.f32 %v2467_v40 }
 0xd4f   : > { %v2704_v1 = vpop.permute.xlu1 %2703 }
 0xd55   : > { %v9116_v51 = vpop.eup %9115 }
 0xd56   : > { %v2469_v53 = vsel %vm696_vm2, %v9116_v51, 0.0 }
 0xd57   : > { %2470 = vadd.xlane.f32.xlu0 %v2469_v53 }
 0xd59   : > { %v9118_v34 = vpop.eup %9117 }
 0xd5a   : > { %v2472_v59 = vsel %vm696_vm2, %v9118_v34, 0.0 }
 0xd5b   : > { %2473 = vadd.xlane.f32.xlu0 %v2472_v59 }
 0xd71   : > { %2705 = vrot.lane.b32.xlu0 %v9923_v20, %s9347_s12 }
 0xde0   : > { %v2471_v61 = vpop.xlane.xlu0 %2470 }
 0xde1   : > { %9119 = vrcp.f32 %v2471_v61 }
 0xde4   : > { %v2474_v57 = vpop.xlane.xlu0 %2473 }
 0xde5   : > { %9121 = vrcp.f32 %v2474_v57 }
 0xde8   : > { %v2706_v36 = vpop.permute.xlu0 %2705 }
 0xdee   : > { %v9120_v25 = vpop.eup %9119 }
 0xdef   : > { %v2477_v45 = vmul.f32 %v9120_v25, %v9116_v51 }
 0xdf1   : > { %8522 = vmatmul.mubr.msk.f32.vlgmr.msra.gmra.mxu0 %vm696_vm2, %v2477_v45 }
 0xdf2   : > { %v9122_v52 = vpop.eup %9121  ;;  %8530 = vmatpush3.xpose.msk.msra.mxu0 %vm696_vm2, %v2628_v62  ;;  %8531 = vmatprep.mubr.msk.f32.mxu0 %vm9346_vm0, %v9345_v0 }
 0xdf3   : > { %v2478_v28 = vmul.f32 %v9122_v52, %v9118_v34  ;;  %8539 = vmatprep.subr.mxu0 %v9345_v0 }
 0xdf5   : > { %8527 = vmatmul.mubr.msk.f32.vlgmr.msra.gmra.mxu1 %vm696_vm2, %v2478_v28  ;;  %8532 = vmatmul.mubr.msk.f32.vlgmr.msra.gmra.mxu0 %vm696_vm2, %v2626_v63 }
 0xdf6   : > { %8535 = vmatpush3.xpose.msk.msra.mxu1 %vm696_vm2, %v2706_v36  ;;  %8536 = vmatprep.mubr.msk.f32.mxu1 %vm9346_vm0, %v9345_v0 }
 0xdf7   : > { %8544 = vmatprep.subr.mxu1 %v9345_v0  ;;  %8541 = vmatprep.mubr.msk.f32.mxu0 %vm9346_vm0, %v9345_v0 }
 0xdf9   : > { %8537 = vmatmul.mubr.msk.f32.vlgmr.msra.gmra.mxu1 %vm696_vm2, %v2704_v1 }
 0xdfa   : > { %8546 = vmatprep.mubr.msk.f32.mxu1 %vm9346_vm0, %v9345_v0 }
 0xeb1   : > { %v9977_v2 = vpop.f32.mrf.mxu0 }
 0xeb3   : > { %v8523_v4 = vpop.f32.mrf.mxu0 }
 0xeb5   : > { %v9979_v5 = vpop.f32.mrf.mxu1  ;;  %v2699_v49 = vpop.f32.mrf.mxu0 }
 0xeb6   : > { %v2781_v18 = vmul.f32 0.35355338, %v2699_v49 }
 0xeb7   : > { %v8528_v12 = vpop.f32.mrf.mxu1  ;;  %v8533_v14 = vpop.f32.mrf.mxu0 }
 0xeb8   : > { %v2783_v21 = vsel %vm696_vm2, %v2781_v18, -inf }
 0xeb9   : > { %v2777_v22 = vpop.f32.mrf.mxu1  ;;  %2784 = vmax.xlane.f32.xlu1 %v2783_v21 }
 0xeba   : > { %v2782_v23 = vmul.f32 0.35355338, %v2777_v22 }
 0xebb   : > { %v8538_v24 = vpop.f32.mrf.mxu1 }
 0xebc   : > { %v2786_v27 = vsel %vm696_vm2, %v2782_v23, -inf }
 0xebd   : > { %2787 = vmax.xlane.f32.xlu0 %v2786_v27 }
 0xeca   : > { %2806 = vrot.lane.b32.xlu1 %v9921_v15, %s9347_s12 }
 0xece   : > { %2961 = vrot.lane.b32.xlu1 %v9912_v3, %s9348_s8 }
 0xed2   : > { %3039 = vrot.lane.b32.xlu1 %v9923_v20, %s9348_s8 }
 0xed6   : > { %2959 = vrot.lane.b32.xlu1 %v9917_v9, %s9348_s8 }
 0xf42   : > { %v2785_v7 = vpop.xlane.xlu1 %2784 }
 0xf43   : > { %v2789_v29 = vsub.f32 %v2781_v18, %v2785_v7 }
 0xf45   : > { %v2791_v13 = vmul.f32 1.442695, %v2789_v29 }
 0xf46   : > { %v2788_v33 = vpop.xlane.xlu0 %2787  ;;  %v2807_v35 = vpop.permute.xlu1 %2806 }
 0xf47   : > { %9123 = vpow2.f32 %v2791_v13  ;;  %v2790_v41 = vsub.f32 %v2782_v23, %v2788_v33  ;;  %8540 = vmatpush3.msra.mxu0 %v2807_v35 }
 0xf48   : > { %8549 = vmatprep.subr.mxu0 %v9345_v0 }
 0xf49   : > { %v2793_v42 = vmul.f32 1.442695, %v2790_v41 }
 0xf4a   : > { %v2962_v26 = vpop.permute.xlu1 %2961 }
 0xf4b   : > { %9125 = vpow2.f32 %v2793_v42 }
 0xf4e   : > { %v3040_v51 = vpop.permute.xlu1 %3039 }
 0xf52   : > { %v2960_v61 = vpop.permute.xlu1 %2959 }
 0xf54   : > { %v9124_v43 = vpop.eup %9123 }
 0xf55   : > { %v2795_v46 = vsel %vm696_vm2, %v9124_v43, 0.0 }
 0xf56   : > { %2796 = vadd.xlane.f32.xlu0 %v2795_v46 }
 0xf58   : > { %v9126_v47 = vpop.eup %9125 }
 0xf59   : > { %v2798_v48 = vsel %vm696_vm2, %v9126_v47, 0.0 }
 0xf5a   : > { %2799 = vadd.xlane.f32.xlu0 %v2798_v48 }
 0xf70   : > { %2883 = vrot.lane.b32.xlu0 %v9937_v11, %s9347_s12 }
 0xf74   : > { %3037 = vrot.lane.b32.xlu0 %v9931_v6, %s9348_s8 }
 0xfdf   : > { %v2797_v60 = vpop.xlane.xlu0 %2796 }
 0xfe0   : > { %9127 = vrcp.f32 %v2797_v60 }
 0xfe3   : > { %v2800_v58 = vpop.xlane.xlu0 %2799 }
 0xfe4   : > { %9129 = vrcp.f32 %v2800_v58 }
 0xfe7   : > { %v2884_v37 = vpop.permute.xlu0 %2883 }
 0xfe8   : > { %8545 = vmatpush3.msra.mxu1 %v2884_v37 }
 0xfe9   : > { %8554 = vmatprep.subr.mxu1 %v9345_v0 }
 0xfeb   : > { %v3038_v57 = vpop.permute.xlu0 %3037 }
 0xfed   : > { %v9128_v40 = vpop.eup %9127 }
 0xfee   : > { %v2803_v53 = vmul.f32 %v9128_v40, %v9124_v43 }
 0xff0   : > { %8542 = vmatmul.mubr.msk.f32.vlgmr.msra.gmra.mxu0 %vm696_vm2, %v2803_v53 }
 0xff1   : > { %v9130_v34 = vpop.eup %9129  ;;  %8550 = vmatpush3.xpose.msk.msra.mxu0 %vm696_vm2, %v2962_v26  ;;  %8551 = vmatprep.mubr.msk.f32.mxu0 %vm9346_vm0, %v9345_v0 }
 0xff2   : > { %v2804_v59 = vmul.f32 %v9130_v34, %v9126_v47  ;;  %8559 = vmatprep.subr.mxu0 %v9345_v0 }
 0xff4   : > { %8547 = vmatmul.mubr.msk.f32.vlgmr.msra.gmra.mxu1 %vm696_vm2, %v2804_v59  ;;  %8552 = vmatmul.mubr.msk.f32.vlgmr.msra.gmra.mxu0 %vm696_vm2, %v2960_v61 }
 0xff5   : > { %8555 = vmatpush3.xpose.msk.msra.mxu1 %vm696_vm2, %v3040_v51  ;;  %8556 = vmatprep.mubr.msk.f32.mxu1 %vm9346_vm0, %v9345_v0 }
 0xff6   : > { %8564 = vmatprep.subr.mxu1 %v9345_v0  ;;  %8561 = vmatprep.mubr.msk.f32.mxu0 %vm9346_vm0, %v9345_v0 }
 0xff8   : > { %8557 = vmatmul.mubr.msk.f32.vlgmr.msra.gmra.mxu1 %vm696_vm2, %v3038_v57 }
 0xff9   : > { %8566 = vmatprep.mubr.msk.f32.mxu1 %vm9346_vm0, %v9345_v0 }
0x10b0   : > { %v10015_v62 = vpop.f32.mrf.mxu0 }
0x10b2   : > { %v8543_v25 = vpop.f32.mrf.mxu0 }
0x10b4   : > { %v10017_v45 = vpop.f32.mrf.mxu1  ;;  %v3033_v52 = vpop.f32.mrf.mxu0 }
0x10b5   : > { %v8982_v63 = vpack.i.bf16 %v10017_v45, %v10015_v62  ;;  %v3115_v28 = vmul.f32 0.35355338, %v3033_v52 }
0x10b6   : > { %v8548_v36 = vpop.f32.mrf.mxu1  ;;  %v8553_v1 = vpop.f32.mrf.mxu0 }
0x10b7   : > { %v3117_v4 = vsel %vm696_vm2, %v3115_v28, -inf }
0x10b8   : > { %v3111_v49 = vpop.f32.mrf.mxu1  ;;  %3118 = vmax.xlane.f32.xlu1 %v3117_v4 }
0x10b9   : > { %v3116_v18 = vmul.f32 0.35355338, %v3111_v49 }
0x10ba   : > { %v8558_v12 = vpop.f32.mrf.mxu1 }
0x10bb   : > { %v3120_v14 = vsel %vm696_vm2, %v3116_v18, -inf }
0x10bc   : > { %3121 = vmax.xlane.f32.xlu0 %v3120_v14 }
0x10c9   : > { %3139 = vrot.lane.b32.xlu1 %v9921_v15, %s9348_s8 }
0x10cd   : > { %3293 = vrot.lane.b32.xlu1 %v9912_v3, %s9349_s7 }
0x10d1   : > { %3371 = vrot.lane.b32.xlu1 %v9923_v20, %s9349_s7 }
0x10d5   : > { %3291 = vrot.lane.b32.xlu1 %v9917_v9, %s9349_s7 }
0x1141   : > { %v3119_v21 = vpop.xlane.xlu1 %3118 }
0x1142   : > { %v3123_v22 = vsub.f32 %v3115_v28, %v3119_v21 }
0x1144   : > { %v3125_v23 = vmul.f32 1.442695, %v3123_v22 }
0x1145   : > { %v3122_v24 = vpop.xlane.xlu0 %3121  ;;  %v3140_v27 = vpop.permute.xlu1 %3139 }
0x1146   : > { %9131 = vpow2.f32 %v3125_v23  ;;  %v3124_v7 = vsub.f32 %v3116_v18, %v3122_v24  ;;  %8560 = vmatpush3.msra.mxu0 %v3140_v27 }
0x1147   : > { %8569 = vmatprep.subr.mxu0 %v9345_v0 }
0x1148   : > { %v3127_v29 = vmul.f32 1.442695, %v3124_v7 }
0x1149   : > { %v3294_v41 = vpop.permute.xlu1 %3293 }
0x114a   : > { %9133 = vpow2.f32 %v3127_v29 }
0x114d   : > { %v3372_v46 = vpop.permute.xlu1 %3371 }
0x1151   : > { %v3292_v60 = vpop.permute.xlu1 %3291 }
0x1153   : > { %v9132_v13 = vpop.eup %9131 }
0x1154   : > { %v3129_v3 = vsel %vm696_vm2, %v9132_v13, 0.0 }
0x1155   : > { %3130 = vadd.xlane.f32.xlu0 %v3129_v3  ;;  %v9046_v3 = vld [vmem:[%s9553_s29 + $0x70] sm:$0xff]  }
0x1157   : > { %v9134_v20 = vpop.eup %9133 }
0x1158   : > { %v3132_v33 = vsel %vm696_vm2, %v9134_v20, 0.0 }
0x1159   : > { %3133 = vadd.xlane.f32.xlu0 %v3132_v33 }
0x116f   : > { %3215 = vrot.lane.b32.xlu0 %v9937_v11, %s9348_s8 }
0x1173   : > { %3369 = vrot.lane.b32.xlu0 %v9931_v6, %s9349_s7 }
0x11de   : > { %v3131_v9 = vpop.xlane.xlu0 %3130 }
0x11df   : > { %9135 = vrcp.f32 %v3131_v9 }
0x11e2   : > { %v3134_v35 = vpop.xlane.xlu0 %3133 }
0x11e3   : > { %9137 = vrcp.f32 %v3134_v35 }
0x11e6   : > { %v3216_v42 = vpop.permute.xlu0 %3215 }
0x11e7   : > { %8565 = vmatpush3.msra.mxu1 %v3216_v42 }
0x11e8   : > { %8574 = vmatprep.subr.mxu1 %v9345_v0 }
0x11ea   : > { %v3370_v58 = vpop.permute.xlu0 %3369 }
0x11ec   : > { %v9136_v43 = vpop.eup %9135 }
0x11ed   : > { %v3137_v47 = vmul.f32 %v9136_v43, %v9132_v13 }
0x11ef   : > { %8562 = vmatmul.mubr.msk.f32.vlgmr.msra.gmra.mxu0 %vm696_vm2, %v3137_v47 }
0x11f0   : > { %v9138_v48 = vpop.eup %9137  ;;  %8570 = vmatpush3.xpose.msk.msra.mxu0 %vm696_vm2, %v3294_v41  ;;  %8571 = vmatprep.mubr.msk.f32.mxu0 %vm9346_vm0, %v9345_v0 }
0x11f1   : > { %v3138_v6 = vmul.f32 %v9138_v48, %v9134_v20  ;;  %8579 = vmatprep.subr.mxu0 %v9345_v0 }
0x11f3   : > { %8567 = vmatmul.mubr.msk.f32.vlgmr.msra.gmra.mxu1 %vm696_vm2, %v3138_v6  ;;  %8572 = vmatmul.mubr.msk.f32.vlgmr.msra.gmra.mxu0 %vm696_vm2, %v3292_v60 }
0x11f4   : > { %8575 = vmatpush3.xpose.msk.msra.mxu1 %vm696_vm2, %v3372_v46  ;;  %8576 = vmatprep.mubr.msk.f32.mxu1 %vm9346_vm0, %v9345_v0 }
0x11f5   : > { %8584 = vmatprep.subr.mxu1 %v9345_v0  ;;  %8581 = vmatprep.mubr.msk.f32.mxu0 %vm9346_vm0, %v9345_v0 }
0x11f7   : > { %8577 = vmatmul.mubr.msk.f32.vlgmr.msra.gmra.mxu1 %vm696_vm2, %v3370_v58 }
0x11f8   : > { %8586 = vmatprep.mubr.msk.f32.mxu1 %vm9346_vm0, %v9345_v0 }
0x12af   : > { %v3211_v26 = vpop.f32.mrf.mxu0 }
0x12b1   : > { %v8563_v37 = vpop.f32.mrf.mxu0 }
0x12b3   : > { %v3287_v40 = vpop.f32.mrf.mxu1  ;;  %v3365_v51 = vpop.f32.mrf.mxu0 }
0x12b4   : > { %v3447_v53 = vmul.f32 0.35355338, %v3365_v51  ;;  %v8987_v36 = vpack.i.bf16 %v3287_v40, %v3211_v26 }
0x12b5   : > { %v8568_v34 = vpop.f32.mrf.mxu1  ;;  %v8573_v59 = vpop.f32.mrf.mxu0 }
0x12b6   : > { %v3449_v61 = vsel %vm696_vm2, %v3447_v53, -inf }
0x12b7   : > { %v3443_v57 = vpop.f32.mrf.mxu1  ;;  %3450 = vmax.xlane.f32.xlu1 %v3449_v61 }
0x12b8   : > { %v3448_v25 = vmul.f32 0.35355338, %v3443_v57  ;;  %v9049_v57 = vld [vmem:[%s9553_s29 + $0x80] sm:$0xff]  }
0x12b9   : > { %v8578_v52 = vpop.f32.mrf.mxu1 }
0x12ba   : > { %v3452_v28 = vsel %vm696_vm2, %v3448_v25, -inf  ;;  %v3662_v52 = vrot.slane %v9908_v56, %v9632_v19 }
0x12bb   : > { %3453 = vmax.xlane.f32.xlu0 %v3452_v28 }
0x12bc   : > { %v3663_v28 = vadd.f32 %v3662_v52, %v9642_v30 }
0x12c8   : > { %3471 = vrot.lane.b32.xlu1 %v9921_v15, %s9349_s7 }
0x12cc   : > { %8983 = vrot.lane.b32.xlu1 %v8982_v63, %s9350_s28 }
0x12d0   : > { %8988 = vrot.lane.b32.xlu1 %v8987_v36, %s9351_s18 }
0x1340   : > { %v3451_v1 = vpop.xlane.xlu1 %3450 }
0x1341   : > { %v3455_v4 = vsub.f32 %v3447_v53, %v3451_v1 }
0x1343   : > { %v3457_v49 = vmul.f32 1.442695, %v3455_v4 }
0x1344   : > { %v3454_v18 = vpop.xlane.xlu0 %3453  ;;  %v3472_v12 = vpop.permute.xlu1 %3471 }
0x1345   : > { %9139 = vpow2.f32 %v3457_v49  ;;  %v3456_v14 = vsub.f32 %v3448_v25, %v3454_v18  ;;  %8580 = vmatpush3.msra.mxu0 %v3472_v12  ;;  %v9050_v25 = vld [vmem:[%s9553_s29 + $0x90] sm:$0xff]   ;;  %v3664_v18 = vadd.f32 %v3662_v52, %v9644_v31 }
0x1346   : > { %8589 = vmatprep.subr.bf16.mxu0 %v9345_v0 }
0x1347   : > { %v3459_v21 = vmul.f32 1.442695, %v3456_v14 }
0x1348   : > { %v8984_v42 = vpop.permute.xlu1 %8983 }
0x1349   : > { %9141 = vpow2.f32 %v3459_v21  ;;  %v8986_v46 = vunpack.i.h.bf16 %v8984_v42  ;;  %v8985_v47 = vunpack.i.l.bf16 %v8984_v42 }
0x134b   : > { %v3648_v58 = vsel %vm696_vm2, %v9979_v5, %v8986_v46  ;;  %v3647_v26 = vsel %vm696_vm2, %v9977_v2, %v8985_v47  ;;  %v9047_v5 = vld [vmem:[%s9553_s29 + $0x88] sm:$0xff]   ;;  %v9048_v2 = vld [vmem:[%s9553_s29 + $0x98] sm:$0xff]   ;;  %v9052_v46 = vld [vmem:[%s9553_s29 + $0xa0] sm:$0xff]  }
0x134c   : > { %v8989_v43 = vpop.permute.xlu1 %8988  ;;  %v9053_v47 = vld [vmem:[%s9553_s29 + $0xb8] sm:$0xff]  }
0x134d   : > { %v8991_v48 = vunpack.i.h.bf16 %v8989_v43  ;;  %v8990_v6 = vunpack.i.l.bf16 %v8989_v43  ;;  %v9051_v43 = vld [vmem:[%s9553_s29 + $0xa8] sm:$0xff]  }
0x134f   : > { %v3649_v51 = vsel %vm2043_vm3, %v3647_v26, %v8990_v6  ;;  %v3650_v53 = vsel %vm2043_vm3, %v3648_v58, %v8991_v48  ;;  %v3764_v48 = vrot.slane %v9908_v56, %v9674_v39  ;;  %v3835_v6 = vrot.slane %v9908_v56, %v9671_v38 }
0x1352   : > { %v9140_v15 = vpop.eup %9139 }
0x1353   : > { %v3461_v22 = vsel %vm696_vm2, %v9140_v15, 0.0 }
0x1354   : > { %3462 = vadd.xlane.f32.xlu0 %v3461_v22 }
0x1356   : > { %v9142_v62 = vpop.eup %9141 }
0x1357   : > { %v3464_v45 = vsel %vm696_vm2, %v9142_v62, 0.0 }
0x1358   : > { %3465 = vadd.xlane.f32.xlu0 %v3464_v45 }
0x136e   : > { %3547 = vrot.lane.b32.xlu0 %v9937_v11, %s9349_s7  ;;  %v9045_v11 = vld [vmem:[%s9553_s29 + $0x78] sm:$0xff]  }
0x13dd   : > { %v3463_v63 = vpop.xlane.xlu0 %3462 }
0x13de   : > { %9143 = vrcp.f32 %v3463_v63 }
0x13e1   : > { %v3466_v23 = vpop.xlane.xlu0 %3465 }
0x13e2   : > { %9145 = vrcp.f32 %v3466_v23 }
0x13e5   : > { %v3548_v24 = vpop.permute.xlu0 %3547 }
0x13e6   : > { %8585 = vmatpush3.msra.mxu1 %v3548_v24 }
0x13e7   : > { %8597 = vmatprep.subr.bf16.mxu1 %v9345_v0 }
0x13eb   : > { %v9144_v27 = vpop.eup %9143 }
0x13ec   : > { %v3469_v7 = vmul.f32 %v9144_v27, %v9140_v15 }
0x13ee   : > { %8582 = vmatmul.mubr.msk.f32.vlgmr.msra.gmra.mxu0 %vm696_vm2, %v3469_v7 }
0x13ef   : > { %v9146_v29 = vpop.eup %9145  ;;  %8593 = vmatprep.mubr.msk.bf16.mxu0 %vm9346_vm0, %v9345_v0  ;;  %8590 = vmatpush3.bf16.msra.mxu0 %v9045_v11 }
0x13f0   : > { %v3470_v13 = vmul.f32 %v9146_v29, %v9142_v62  ;;  %8591 = vmatprep.subr.bf16.mxu0 %v9345_v0 }
0x13f2   : > { %8587 = vmatmul.mubr.msk.f32.vlgmr.msra.gmra.mxu1 %vm696_vm2, %v3470_v13 }
0x13f3   : > { %8601 = vmatprep.mubr.msk.bf16.mxu1 %vm9346_vm0, %v9345_v0  ;;  %8592 = vmatpush3.bf16.msra.mxu0 %v9046_v3 }
0x13f4   : > { %8605 = vmatprep.subr.bf16.mxu0 %v9345_v0  ;;  %8598 = vmatpush3.bf16.msra.mxu1 %v9047_v5 }
0x13f5   : > { %8599 = vmatprep.subr.bf16.mxu1 %v9345_v0 }
0x13f8   : > { %8600 = vmatpush3.bf16.msra.mxu1 %v9049_v57 }
0x13f9   : > { %8613 = vmatprep.subr.bf16.mxu1 %v9345_v0 }
0x14ae   : > { %v3543_v20 = vpop.f32.mrf.mxu0 }
0x14b0   : > { %v8583_v33 = vpop.f32.mrf.mxu0 }
0x14b2   : > { %v3619_v9 = vpop.f32.mrf.mxu1 }
0x14b3   : > { %v8992_v35 = vpack.i.bf16 %v3619_v9, %v3543_v20 }
0x14b4   : > { %v8588_v41 = vpop.f32.mrf.mxu1 }
0x14b5   : > { %8993 = vrot.lane.b32.xlu1 %v8992_v35, %s9352_s14 }
0x1527   : > { %v8994_v60 = vpop.permute.xlu1 %8993 }
0x1528   : > { %v8996_v37 = vunpack.i.h.bf16 %v8994_v60  ;;  %v8995_v40 = vunpack.i.l.bf16 %v8994_v60 }
0x152a   : > { %v3652_v34 = vsel %vm2046_vm4, %v3650_v53, %v8996_v37  ;;  %v3651_v59 = vsel %vm2046_vm4, %v3649_v51, %v8995_v40 }
0x152b   : > { %v3658_v61 = vpack.c.bf16 %v3652_v34, %v3651_v59 }
0x152d   : > { %8594 = vmatmul.mubr.msk.bf16.vlgmr.msra.gmra.mxu0 %vm393_vm1, %v3658_v61 }
0x152e   : > { %8609 = vmatprep.mubr.msk.bf16.mxu0 %vm9346_vm0, %v9345_v0  ;;  %8606 = vmatpush3.bf16.msra.mxu0 %v9048_v2 }
0x152f   : > { %8607 = vmatprep.subr.bf16.mxu0 %v9345_v0 }
0x1532   : > { %8608 = vmatpush3.bf16.msra.mxu0 %v9050_v25 }
0x1533   : > { %8621 = vmatprep.subr.bf16.mxu0 %v9345_v0 }
0x15ed   : > { %v3714_v36 = vpop.f32.mrf.mxu0 }
0x15ee   : > { %v3715_v1 = vadd.f32 %v3714_v36, %v3663_v28 }
0x15ef   : > { %v8595_v4 = vpop.f32.mrf.mxu0 }
0x15f0   : > { %v3738_v49 = vsel %vm393_vm1, %v3715_v1, 0.0 }
0x15f1   : > { %v3739_v12 = vrot.slane %v3738_v49, 4  ;;  %v3717_v14 = vpop.f32.mrf.mxu0 }
0x15f2   : > { %v3718_v21 = vadd.f32 %v3717_v14, %v3664_v18  ;;  %v9055_v14 = vld [vmem:[%s9553_s29 + $0xb0] sm:$0xff]  }
0x15f3   : > { %v3740_v15 = vadd.f32 %v3739_v12, %v3738_v49  ;;  %v8596_v22 = vpop.f32.mrf.mxu0 }
0x15f4   : > { %v3745_v62 = vsel %vm393_vm1, %v3718_v21, 0.0  ;;  %v9056_v21 = vld [vmem:[%s9574_s11 + $0x10] sm:$0xff]  }
0x15f5   : > { %v3741_v45 = vrot.slane %v3740_v15, 2  ;;  %v3746_v63 = vrot.slane %v3745_v62, 4 }
0x15f7   : > { %v3742_v23 = vadd.f32 %v3741_v45, %v3740_v15  ;;  %v3747_v24 = vadd.f32 %v3746_v63, %v3745_v62  ;;  %v3912_v15 = vrot.slane %v9908_v56, %v9681_v44  ;;  %v9057_v63 = vld [vmem:[%s9545_s15 + $0x18] sm:$0xff]  }
0x15f9   : > { %v3743_v27 = vrot.slane %v3742_v23, 1  ;;  %v3748_v30 = vrot.slane %v3747_v24, 2 }
0x15fb   : > { %v3744_v7 = vadd.f32 %v3743_v27, %v3742_v23  ;;  %v3749_v29 = vadd.f32 %v3748_v30, %v3747_v24 }
0x15fd   : > { %v3752_v13 = vmul.f32 0.125, %v3744_v7  ;;  %v3750_v11 = vrot.slane %v3749_v29, 1  ;;  %v9059_v7 = vld [vmem:[%s9553_s29 + $0xc8] sm:$0xff]  }
0x15ff   : > { %v3751_v31 = vadd.f32 %v3750_v11, %v3749_v29  ;;  %v3759_v3 = vpack.c.bf16 %v3752_v13, %v3752_v13  ;;  %v10152_v29 = vld [vmem:[%s9623_s26 + $0x10] sm:$0xff] }
0x1600   : > { %v4051_v11 = vrot.slane %v10152_v29, %v9626_v17 }
0x1601   : > { %v3753_v20 = vmul.f32 0.125, %v3751_v31  ;;  %v3767_v9 = vunpack.c.l.b16 %v3759_v3 }
0x1603   : > { %v3760_v33 = vpack.c.bf16 %v3753_v20, %v3753_v20 }
0x1605   : > { %v3768_v35 = vunpack.c.l.b16 %v3760_v33 }
0x1607   : > { %v3770_v41 = vsel %vm3769_vm5, %v3768_v35, %v3767_v9  ;;  %v9061_v35 = vld [vmem:[%s9553_s29 + $0xd8] sm:$0xff]  }
0x1608   : > { %v3771_v42 = vpack.c.b16 %v3770_v41, %v3770_v41  ;;  %v9062_v41 = vld [vmem:[%s9553_s29 + $0xe8] sm:$0xff]  }
0x160a   : > { %8602 = vmatmul.mubr.msk.bf16.vlgmr.msra.gmra.mxu1 %vm393_vm1, %v3771_v42  ;;  %8610 = vmatmul.mubr.msk.bf16.vlgmr.msra.gmra.mxu0 %vm393_vm1, %v3771_v42  ;;  %v9063_v42 = vld [vmem:[%s9553_s29 + $0xd0] sm:$0xff]  }
0x160b   : > { %8617 = vmatprep.mubr.msk.bf16.mxu1 %vm9346_vm0, %v9345_v0  ;;  %8625 = vmatprep.mubr.msk.bf16.mxu0 %vm9346_vm0, %v9345_v0 }
0x160c   : > { %8614 = vmatpush3.bf16.msra.mxu1 %v9051_v43  ;;  %8622 = vmatpush3.bf16.msra.mxu0 %v9053_v47  ;;  %v9064_v43 = vld [vmem:[%s9553_s29 + $0xe0] sm:$0xff]  }
0x160d   : > { %8615 = vmatprep.subr.bf16.mxu1 %v9345_v0  ;;  %8623 = vmatprep.subr.bf16.mxu0 %v9345_v0 }
0x1610   : > { %8616 = vmatpush3.bf16.msra.mxu1 %v9052_v46  ;;  %8624 = vmatpush3.bf16.msra.mxu0 %v9055_v14  ;;  %v3977_v46 = vrot.slane %v9908_v56, %v9891_v54  ;;  %v4113_v56 = vrot.slane %v10152_v29, %v9632_v19 }
0x1611   : > { %8629 = vmatprep.subr.bf16.mxu1 %v9345_v0  ;;  %8637 = vmatprep.subr.bf16.mxu0 %v9345_v0 }
0x16ca   : > { %v3821_v60 = vpop.f32.mrf.mxu1  ;;  %v3882_v58 = vpop.f32.mrf.mxu0 }
0x16cb   : > { %v3822_v26 = vadd.f32 %v3821_v60, %v3764_v48  ;;  %v3883_v53 = vadd.f32 %v3882_v58, %v3835_v6 }
0x16cc   : > { %v8603_v37 = vpop.f32.mrf.mxu1  ;;  %v8611_v40 = vpop.f32.mrf.mxu0 }
0x16cd   : > { %v3892_v51 = vmul.f32 %v9947_v32, %v3822_v26  ;;  %v9054_v32 = vld [vmem:[%s9574_s11 + $0x18] sm:$0xff]  }
0x16ce   : > { %v3824_v34 = vpop.f32.mrf.mxu1  ;;  %v3885_v59 = vpop.f32.mrf.mxu0 }
0x16cf   : > { %v3893_v61 = vadd.f32 %v3892_v51, %v3883_v53 }
0x16d0   : > { %v8604_v5 = vpop.f32.mrf.mxu1  ;;  %v8612_v2 = vpop.f32.mrf.mxu0 }
0x16d1   : > { %v3894_v57 = vmul.f32 %v3893_v61, %v3893_v61 }
0x16d3   : > { %v3895_v25 = vmul.f32 %v3894_v57, %v3893_v61 }
0x16d5   : > { %v3896_v52 = vmul.f32 0.044715, %v3895_v25 }
0x16d7   : > { %v3897_v28 = vadd.f32 %v3896_v52, %v3893_v61 }
0x16d9   : > { %v3898_v36 = vmul.f32 0.7978846, %v3897_v28  ;;  %v4242_v28 = vrot.slane %v10152_v29, %v9671_v38 }
0x16db   : > { %9147 = vtanh.f32 %v3898_v36  ;;  %v4176_v36 = vrot.slane %v10152_v29, %v9674_v39 }
0x16e8   : > { %v9148_v1 = vpop.eup %9147 }
0x16e9   : > { %v3900_v4 = vadd.f32 1.0, %v9148_v1 }
0x16eb   : > { %v3901_v49 = vmul.f32 0.5, %v3900_v4 }
0x16ed   : > { %v3902_v18 = vmul.f32 %v3901_v49, %v3893_v61 }
0x16ef   : > { %v3908_v12 = vpack.c.bf16 %v3902_v18, %v3902_v18  ;;  %v4307_v18 = vrot.slane %v10152_v29, %v9681_v44 }
0x16f1   : > { %8618 = vmatmul.mubr.msk.bf16.vlgmr.msra.gmra.mxu1 %vm393_vm1, %v3908_v12 }
0x16f2   : > { %8630 = vmatpush3.bf16.msra.mxu1 %v9054_v32  ;;  %8633 = vmatprep.mubr.msk.bf16.mxu1 %vm9346_vm0, %v9345_v0 }
0x16f3   : > { %8631 = vmatprep.subr.bf16.mxu1 %v9345_v0 }
0x16f6   : > { %8632 = vmatpush3.bf16.msra.mxu1 %v9056_v21 }
0x16f7   : > { %8645 = vmatprep.subr.bf16.mxu1 %v9345_v0 }
0x16f9   : > { %8634 = vmatmul.mubr.msk.bf16.vlgmr.msra.gmra.mxu1 %vm393_vm1, %v9591_v8  ;;  %v9058_v8 = vld [vmem:[%s9545_s15 + $0x10] sm:$0xff]   ;;  %s7845_s15 = sshll.u32 %s9541_s20, 3 }
0x16fa   : > { %8649 = vmatprep.mubr.msk.bf16.mxu1 %vm9346_vm0, %v9345_v0  ;;  %8646 = vmatpush3.bf16.msra.mxu1 %v9059_v7  ;;  %s10183_s11 = scalar_lea.vmem [#allocation7], %s7845_s15 }
0x16fb   : > { %8647 = vmatprep.subr.bf16.mxu1 %v9345_v0  ;;  %s7713_s13 = sshll.u32 %s10183_s11, 4  ;;  %s10652_s13 = int_to_ptr.vmem [resolvable:$true] %s7713_s13 }
0x16fc   : > { %s9271_s16 = scalar_lea.vmem %s10652_s13, 128 }
0x16fd   : > { %p9272_p1 = scmp.ne.s32.totalorder %s10652_s13, %s9271_s16 }
0x16ff   : > { %p9273_p7 = pnand %p9272_p1, %p10718_p12 }
0x1701   : > { %p9274_p10 = pneg %p9273_p7 }
0x17b1   : > { %v3962_v22 = vpop.f32.mrf.mxu1 }
0x17b2   : > { %v3963_v62 = vadd.f32 %v3962_v22, %v3912_v15 }
0x17b3   : > { %v8619_v45 = vpop.f32.mrf.mxu1 }
0x17b4   : > { %v3973_v23 = vpack.c.bf16 %v3963_v62, %v3963_v62 }
0x17b5   : > { %v3965_v24 = vpop.f32.mrf.mxu1 }
0x17b6   : > { %8626 = vmatmul.mubr.msk.bf16.vlgmr.msra.gmra.mxu0 %vm393_vm1, %v3973_v23 }
0x17b7   : > { %v8620_v27 = vpop.f32.mrf.mxu1  ;;  %8638 = vmatpush3.bf16.msra.mxu0 %v9057_v63  ;;  %8641 = vmatprep.mubr.msk.bf16.mxu0 %vm9346_vm0, %v9345_v0 }
0x17b8   : > { %8639 = vmatprep.subr.bf16.mxu0 %v9345_v0 }
0x17b9   : > { %v4098_v30 = vpop.f32.mrf.mxu1 }
0x17ba   : > { %v10158_v3 = vadd.f32 %v4098_v30, %v4051_v11 }
0x17bb   : > { %8640 = vmatpush3.bf16.msra.mxu0 %v9058_v8  ;;  %v8635_v13 = vpop.f32.mrf.mxu1 }
0x17bc   : > { %8653 = vmatprep.subr.bf16.mxu0 %v9345_v0 }
0x17bd   : > { %v4101_v31 = vpop.f32.mrf.mxu1 }
0x17be   : > { %8642 = vmatmul.mubr.msk.bf16.vlgmr.msra.gmra.mxu0 %vm393_vm1, %v9596_v10  ;;  %v9060_v10 = vld [vmem:[%s9553_s29 + $0xc0] sm:$0xff]   ;;  %v10160_v20 = vadd.f32 %v4101_v31, %v4051_v11 }
0x17bf   : > { %8657 = vmatprep.mubr.msk.bf16.mxu0 %vm9346_vm0, %v9345_v0  ;;  %8648 = vmatpush3.bf16.msra.mxu1 %v9060_v10  ;;  %v8636_v33 = vpop.f32.mrf.mxu1 }
0x17c0   : > { %v10164_v9 = vpack.c.bf16 %v10160_v20, %v10158_v3  ;;  %8661 = vmatprep.subr.bf16.mxu1 %v9345_v0  ;;  %8654 = vmatpush3.bf16.msra.mxu0 %v9061_v35 }
0x17c1   : > { %8655 = vmatprep.subr.bf16.mxu0 %v9345_v0 }
0x17c2   : > { %8650 = vmatmul.mubr.msk.bf16.vlgmr.msra.gmra.mxu1 %vm393_vm1, %v10164_v9 }
0x17c3   : > { %8662 = vmatpush3.bf16.msra.mxu1 %v9062_v41  ;;  %8665 = vmatprep.mubr.msk.bf16.mxu1 %vm9346_vm0, %v9345_v0 }
0x17c4   : > { %8663 = vmatprep.subr.bf16.mxu1 %v9345_v0  ;;  %8656 = vmatpush3.bf16.msra.mxu0 %v9063_v42 }
0x17c5   : > { %8669 = vmatprep.subr.mxu0 %v9345_v0 }
0x17c7   : > { %8664 = vmatpush3.bf16.msra.mxu1 %v9064_v43 }
0x17c8   : > { %8674 = vmatprep.subr.mxu1 %v9345_v0 }
0x1876   : > { %v4027_v47 = vpop.f32.mrf.mxu0 }
0x1877   : > { %v4028_v48 = vadd.f32 %v4027_v47, %v3977_v46 }
0x1878   : > { %v8627_v6 = vpop.f32.mrf.mxu0 }
0x1879   : > { %v4034_v60 = vrot.slane %v4028_v48, 6 }
0x187a   : > { %v4030_v58 = vpop.f32.mrf.mxu0 }
0x187b   : > { %v4037_v26 = vsel %vm4036_vm6, %v3963_v62, %v4034_v60 }
0x187c   : > { %4039 = vst.msk [vmem:[%s10183_s11] sm:$0xf] %vm4038_vm7, %v4037_v26  ;;  %v8628_v37 = vpop.f32.mrf.mxu0 }
0x187e   : > { %v4160_v40 = vpop.f32.mrf.mxu0 }
0x187f   : > { %v10189_v34 = vadd.f32 %v4160_v40, %v4113_v56 }
0x1880   : > { %v8643_v51 = vpop.f32.mrf.mxu0 }
0x1882   : > { %v4163_v53 = vpop.f32.mrf.mxu0  ;;  %v4226_v2 = vpop.f32.mrf.mxu1 }
0x1883   : > { %v10191_v59 = vadd.f32 %v4163_v53, %v4113_v56  ;;  %v10215_v14 = vadd.f32 %v4226_v2, %v4176_v36 }
0x1884   : > { %v8644_v61 = vpop.f32.mrf.mxu0  ;;  %v8651_v57 = vpop.f32.mrf.mxu1 }
0x1885   : > { %v10195_v5 = vpack.c.bf16 %v10191_v59, %v10189_v34 }
0x1886   : > { %v4229_v25 = vpop.f32.mrf.mxu1 }
0x1887   : > { %8658 = vmatmul.mubr.msk.bf16.vlgmr.msra.gmra.mxu0 %vm393_vm1, %v10195_v5  ;;  %8666 = vmatmul.mubr.msk.bf16.vlgmr.msra.gmra.mxu1 %vm393_vm1, %v10195_v5  ;;  %v10227_v23 = vadd.f32 %v4229_v25, %v4176_v36 }
0x1888   : > { %8671 = vmatprep.mubr.msk.f32.mxu0 %vm9346_vm0, %v9345_v0  ;;  %8676 = vmatprep.mubr.msk.f32.mxu1 %vm9346_vm0, %v9345_v0  ;;  %v8652_v52 = vpop.f32.mrf.mxu1 }
0x1947   : > { %v4292_v1 = vpop.f32.mrf.mxu0  ;;  %v4354_v4 = vpop.f32.mrf.mxu1 }
0x1948   : > { %v10209_v49 = vadd.f32 %v4292_v1, %v4242_v28  ;;  %v10218_v22 = vadd.f32 %v4354_v4, %v4307_v18 }
0x1949   : > { %v8659_v32 = vpop.f32.mrf.mxu0  ;;  %v8667_v12 = vpop.f32.mrf.mxu1 }
0x194a   : > { %8670 = vmatpush3.xpose.msk.msra.mxu0 %vm696_vm2, %v10209_v49 }
0x194b   : > { %v4295_v21 = vpop.f32.mrf.mxu0  ;;  %v4357_v15 = vpop.f32.mrf.mxu1  ;;  %8679 = vmatprep.subr.mxu0 %v9345_v0 }
0x194c   : > { %v10220_v62 = vadd.f32 %v4295_v21, %v4242_v28  ;;  %v10232_v24 = vadd.f32 %v4357_v15, %v4307_v18 }
0x194d   : > { %v8660_v45 = vpop.f32.mrf.mxu0  ;;  %v8668_v63 = vpop.f32.mrf.mxu1  ;;  %8672 = vmatmul.mubr.msk.f32.vlgmr.msra.gmra.mxu0 %vm696_vm2, %v10215_v14 }
0x194e   : > { %8675 = vmatpush3.xpose.msk.msra.mxu1 %vm696_vm2, %v10220_v62  ;;  %8680 = vmatpush3.msra.mxu0 %v10218_v22 }
0x194f   : > { %8684 = vmatprep.subr.mxu1 %v9345_v0  ;;  %8681 = vmatprep.mubr.msk.f32.mxu0 %vm9346_vm0, %v9345_v0 }
0x1950   : > { %8689 = vmatprep.subr.mxu0 %v9345_v0 }
0x1951   : > { %8677 = vmatmul.mubr.msk.f32.vlgmr.msra.gmra.mxu1 %vm696_vm2, %v10227_v23 }
0x1952   : > { %8685 = vmatpush3.msra.mxu1 %v10232_v24  ;;  %8686 = vmatprep.mubr.msk.f32.mxu1 %vm9346_vm0, %v9345_v0 }
0x1953   : > { %8694 = vmatprep.subr.mxu1 %v9345_v0 }
0x1a0d   : > { %v4433_v27 = vpop.f32.mrf.mxu0 }
0x1a0e   : > { %v4513_v8 = vmul.f32 0.35355338, %v4433_v27 }
0x1a0f   : > { %v8673_v30 = vpop.f32.mrf.mxu0 }
0x1a10   : > { %v4515_v7 = vsel %vm696_vm2, %v4513_v8, -inf }
0x1a11   : > { %v4509_v13 = vpop.f32.mrf.mxu1  ;;  %4516 = vmax.xlane.f32.xlu0 %v4515_v7 }
0x1a12   : > { %v4514_v11 = vmul.f32 0.35355338, %v4509_v13 }
0x1a13   : > { %v8678_v31 = vpop.f32.mrf.mxu1 }
0x1a14   : > { %v4518_v10 = vsel %vm696_vm2, %v4514_v11, -inf }
0x1a15   : > { %4519 = vmax.xlane.f32.xlu1 %v4518_v10 }
0x1a26   : > { %4763 = vrot.lane.b32.xlu1 %v10220_v62, %s9347_s12 }
0x1a2a   : > { %4683 = vrot.lane.b32.xlu1 %v10215_v14, %s9347_s12 }
0x1a2e   : > { %4761 = vrot.lane.b32.xlu1 %v10227_v23, %s9347_s12 }
0x1a9a   : > { %v4517_v33 = vpop.xlane.xlu0 %4516 }
0x1a9b   : > { %v4521_v35 = vsub.f32 %v4513_v8, %v4517_v33 }
0x1a9d   : > { %v4523_v41 = vmul.f32 1.442695, %v4521_v35 }
0x1a9e   : > { %v4520_v42 = vpop.xlane.xlu1 %4519 }
0x1a9f   : > { %9149 = vpow2.f32 %v4523_v41  ;;  %v4522_v43 = vsub.f32 %v4514_v11, %v4520_v42 }
0x1aa1   : > { %v4525_v46 = vmul.f32 1.442695, %v4522_v43 }
0x1aa2   : > { %v4764_v37 = vpop.permute.xlu1 %4763 }
0x1aa3   : > { %9151 = vpow2.f32 %v4525_v46 }
0x1aa6   : > { %v4684_v61 = vpop.permute.xlu1 %4683 }
0x1aaa   : > { %v4762_v57 = vpop.permute.xlu1 %4761 }
0x1aac   : > { %v9150_v47 = vpop.eup %9149 }
0x1aad   : > { %v4527_v48 = vsel %vm696_vm2, %v9150_v47, 0.0 }
0x1aae   : > { %4528 = vadd.xlane.f32.xlu0 %v4527_v48 }
0x1ab0   : > { %v9152_v6 = vpop.eup %9151 }
0x1ab1   : > { %v4530_v60 = vsel %vm696_vm2, %v9152_v6, 0.0 }
0x1ab2   : > { %4531 = vadd.xlane.f32.xlu0 %v4530_v60 }
0x1ac8   : > { %4685 = vrot.lane.b32.xlu0 %v10209_v49, %s9347_s12 }
0x1b37   : > { %v4529_v58 = vpop.xlane.xlu0 %4528 }
0x1b38   : > { %9153 = vrcp.f32 %v4529_v58 }
0x1b3b   : > { %v4532_v26 = vpop.xlane.xlu0 %4531 }
0x1b3c   : > { %9155 = vrcp.f32 %v4532_v26 }
0x1b3f   : > { %v4686_v51 = vpop.permute.xlu0 %4685 }
0x1b45   : > { %v9154_v40 = vpop.eup %9153 }
0x1b46   : > { %v4535_v56 = vmul.f32 %v9154_v40, %v9150_v47 }
0x1b48   : > { %8682 = vmatmul.mubr.msk.f32.vlgmr.msra.gmra.mxu0 %vm696_vm2, %v4535_v56 }
0x1b49   : > { %v9156_v53 = vpop.eup %9155  ;;  %8690 = vmatpush3.xpose.msk.msra.mxu0 %vm696_vm2, %v4686_v51  ;;  %8691 = vmatprep.mubr.msk.f32.mxu0 %vm9346_vm0, %v9345_v0 }
0x1b4a   : > { %v4536_v2 = vmul.f32 %v9156_v53, %v9152_v6  ;;  %8699 = vmatprep.subr.mxu0 %v9345_v0 }
0x1b4c   : > { %8687 = vmatmul.mubr.msk.f32.vlgmr.msra.gmra.mxu1 %vm696_vm2, %v4536_v2  ;;  %8692 = vmatmul.mubr.msk.f32.vlgmr.msra.gmra.mxu0 %vm696_vm2, %v4684_v61 }
0x1b4d   : > { %8695 = vmatpush3.xpose.msk.msra.mxu1 %vm696_vm2, %v4764_v37  ;;  %8696 = vmatprep.mubr.msk.f32.mxu1 %vm9346_vm0, %v9345_v0 }
0x1b4e   : > { %8704 = vmatprep.subr.mxu1 %v9345_v0  ;;  %8701 = vmatprep.mubr.msk.f32.mxu0 %vm9346_vm0, %v9345_v0 }
0x1b50   : > { %8697 = vmatmul.mubr.msk.f32.vlgmr.msra.gmra.mxu1 %vm696_vm2, %v4762_v57 }
0x1b51   : > { %8706 = vmatprep.mubr.msk.f32.mxu1 %vm9346_vm0, %v9345_v0 }
0x1c08   : > { %v10269_v25 = vpop.f32.mrf.mxu0 }
0x1c0a   : > { %v8683_v52 = vpop.f32.mrf.mxu0 }
0x1c0c   : > { %v10271_v28 = vpop.f32.mrf.mxu1  ;;  %v4757_v36 = vpop.f32.mrf.mxu0 }
0x1c0d   : > { %v4839_v1 = vmul.f32 0.35355338, %v4757_v36 }
0x1c0e   : > { %v8688_v4 = vpop.f32.mrf.mxu1  ;;  %v8693_v18 = vpop.f32.mrf.mxu0 }
0x1c0f   : > { %v4841_v32 = vsel %vm696_vm2, %v4839_v1, -inf }
0x1c10   : > { %v4835_v12 = vpop.f32.mrf.mxu1  ;;  %4842 = vmax.xlane.f32.xlu0 %v4841_v32 }
0x1c11   : > { %v4840_v21 = vmul.f32 0.35355338, %v4835_v12 }
0x1c12   : > { %v8698_v15 = vpop.f32.mrf.mxu1 }
0x1c13   : > { %v4844_v45 = vsel %vm696_vm2, %v4840_v21, -inf }
0x1c14   : > { %4845 = vmax.xlane.f32.xlu1 %v4844_v45 }
0x1c25   : > { %4941 = vrot.lane.b32.xlu1 %v10232_v24, %s9347_s12 }
0x1c29   : > { %5019 = vrot.lane.b32.xlu1 %v10209_v49, %s9348_s8 }
0x1c2d   : > { %5097 = vrot.lane.b32.xlu1 %v10220_v62, %s9348_s8 }
0x1c31   : > { %5095 = vrot.lane.b32.xlu1 %v10227_v23, %s9348_s8 }
0x1c99   : > { %v4843_v63 = vpop.xlane.xlu0 %4842 }
0x1c9a   : > { %v4847_v27 = vsub.f32 %v4839_v1, %v4843_v63 }
0x1c9c   : > { %v4849_v8 = vmul.f32 1.442695, %v4847_v27 }
0x1c9d   : > { %v4846_v30 = vpop.xlane.xlu1 %4845 }
0x1c9e   : > { %9157 = vpow2.f32 %v4849_v8  ;;  %v4848_v7 = vsub.f32 %v4840_v21, %v4846_v30 }
0x1ca0   : > { %v4851_v13 = vmul.f32 1.442695, %v4848_v7 }
0x1ca1   : > { %v4942_v11 = vpop.permute.xlu1 %4941 }
0x1ca2   : > { %9159 = vpow2.f32 %v4851_v13  ;;  %8705 = vmatpush3.msra.mxu1 %v4942_v11 }
0x1ca3   : > { %8714 = vmatprep.subr.mxu1 %v9345_v0 }
0x1ca5   : > { %v5020_v46 = vpop.permute.xlu1 %5019 }
0x1ca9   : > { %v5098_v60 = vpop.permute.xlu1 %5097 }
0x1cab   : > { %v9158_v31 = vpop.eup %9157 }
0x1cac   : > { %v4853_v10 = vsel %vm696_vm2, %v9158_v31, 0.0 }
0x1cad   : > { %4854 = vadd.xlane.f32.xlu0 %v4853_v10  ;;  %v5096_v37 = vpop.permute.xlu1 %5095 }
0x1caf   : > { %v9160_v33 = vpop.eup %9159 }
0x1cb0   : > { %v4856_v35 = vsel %vm696_vm2, %v9160_v33, 0.0 }
0x1cb1   : > { %4857 = vadd.xlane.f32.xlu0 %v4856_v35 }
0x1cc7   : > { %4864 = vrot.lane.b32.xlu0 %v10218_v22, %s9347_s12 }
0x1ccb   : > { %5017 = vrot.lane.b32.xlu0 %v10215_v14, %s9348_s8 }
0x1d36   : > { %v4855_v41 = vpop.xlane.xlu0 %4854 }
0x1d37   : > { %9161 = vrcp.f32 %v4855_v41 }
0x1d3a   : > { %v4858_v42 = vpop.xlane.xlu0 %4857 }
0x1d3b   : > { %9163 = vrcp.f32 %v4858_v42 }
0x1d3e   : > { %v4865_v43 = vpop.permute.xlu0 %4864 }
0x1d3f   : > { %8700 = vmatpush3.msra.mxu0 %v4865_v43 }
0x1d40   : > { %8709 = vmatprep.subr.mxu0 %v9345_v0 }
0x1d42   : > { %v5018_v26 = vpop.permute.xlu0 %5017 }
0x1d44   : > { %v9162_v47 = vpop.eup %9161 }
0x1d45   : > { %v4861_v48 = vmul.f32 %v9162_v47, %v9158_v31 }
0x1d47   : > { %8702 = vmatmul.mubr.msk.f32.vlgmr.msra.gmra.mxu0 %vm696_vm2, %v4861_v48 }
0x1d48   : > { %v9164_v6 = vpop.eup %9163  ;;  %8710 = vmatpush3.xpose.msk.msra.mxu0 %vm696_vm2, %v5020_v46  ;;  %8711 = vmatprep.mubr.msk.f32.mxu0 %vm9346_vm0, %v9345_v0 }
0x1d49   : > { %v4862_v58 = vmul.f32 %v9164_v6, %v9160_v33  ;;  %8719 = vmatprep.subr.mxu0 %v9345_v0 }
0x1d4b   : > { %8707 = vmatmul.mubr.msk.f32.vlgmr.msra.gmra.mxu1 %vm696_vm2, %v4862_v58  ;;  %8712 = vmatmul.mubr.msk.f32.vlgmr.msra.gmra.mxu0 %vm696_vm2, %v5018_v26 }
0x1d4c   : > { %8715 = vmatpush3.xpose.msk.msra.mxu1 %vm696_vm2, %v5098_v60  ;;  %8716 = vmatprep.mubr.msk.f32.mxu1 %vm9346_vm0, %v9345_v0 }
0x1d4d   : > { %8724 = vmatprep.subr.mxu1 %v9345_v0  ;;  %8721 = vmatprep.mubr.msk.f32.mxu0 %vm9346_vm0, %v9345_v0 }
0x1d4f   : > { %8717 = vmatmul.mubr.msk.f32.vlgmr.msra.gmra.mxu1 %vm696_vm2, %v5096_v37 }
0x1d50   : > { %8726 = vmatprep.mubr.msk.f32.mxu1 %vm9346_vm0, %v9345_v0 }
0x1e07   : > { %v10307_v40 = vpop.f32.mrf.mxu0 }
0x1e09   : > { %v8703_v56 = vpop.f32.mrf.mxu0 }
0x1e0b   : > { %v10309_v51 = vpop.f32.mrf.mxu1  ;;  %v5091_v53 = vpop.f32.mrf.mxu0 }
0x1e0c   : > { %v8997_v61 = vpack.i.bf16 %v10309_v51, %v10307_v40  ;;  %v5173_v2 = vmul.f32 0.35355338, %v5091_v53 }
0x1e0d   : > { %v8708_v57 = vpop.f32.mrf.mxu1  ;;  %v8713_v52 = vpop.f32.mrf.mxu0 }
0x1e0e   : > { %v5175_v36 = vsel %vm696_vm2, %v5173_v2, -inf }
0x1e0f   : > { %v5169_v1 = vpop.f32.mrf.mxu1  ;;  %5176 = vmax.xlane.f32.xlu0 %v5175_v36 }
0x1e10   : > { %v5174_v4 = vmul.f32 0.35355338, %v5169_v1 }
0x1e11   : > { %v8718_v18 = vpop.f32.mrf.mxu1 }
0x1e12   : > { %v5178_v32 = vsel %vm696_vm2, %v5174_v4, -inf }
0x1e13   : > { %5179 = vmax.xlane.f32.xlu1 %v5178_v32 }
0x1e24   : > { %5273 = vrot.lane.b32.xlu1 %v10232_v24, %s9348_s8 }
0x1e28   : > { %5351 = vrot.lane.b32.xlu1 %v10209_v49, %s9349_s7 }
0x1e2c   : > { %5429 = vrot.lane.b32.xlu1 %v10220_v62, %s9349_s7 }
0x1e30   : > { %5427 = vrot.lane.b32.xlu1 %v10227_v23, %s9349_s7 }
0x1e98   : > { %v5177_v12 = vpop.xlane.xlu0 %5176 }
0x1e99   : > { %v5181_v21 = vsub.f32 %v5173_v2, %v5177_v12 }
0x1e9b   : > { %v5183_v15 = vmul.f32 1.442695, %v5181_v21 }
0x1e9c   : > { %v5180_v45 = vpop.xlane.xlu1 %5179 }
0x1e9d   : > { %9165 = vpow2.f32 %v5183_v15  ;;  %v5182_v63 = vsub.f32 %v5174_v4, %v5180_v45 }
0x1e9f   : > { %v5185_v27 = vmul.f32 1.442695, %v5182_v63 }
0x1ea0   : > { %v5274_v8 = vpop.permute.xlu1 %5273 }
0x1ea1   : > { %9167 = vpow2.f32 %v5185_v27  ;;  %8725 = vmatpush3.msra.mxu1 %v5274_v8 }
0x1ea2   : > { %8734 = vmatprep.subr.mxu1 %v9345_v0 }
0x1ea4   : > { %v5352_v31 = vpop.permute.xlu1 %5351 }
0x1ea8   : > { %v5430_v41 = vpop.permute.xlu1 %5429 }
0x1eaa   : > { %v9166_v30 = vpop.eup %9165 }
0x1eab   : > { %v5187_v49 = vsel %vm696_vm2, %v9166_v30, 0.0 }
0x1eac   : > { %5188 = vadd.xlane.f32.xlu0 %v5187_v49  ;;  %v5428_v43 = vpop.permute.xlu1 %5427  ;;  %v9065_v49 = vld [vmem:[%s9553_s29 + $0x108] sm:$0xff]  }
0x1eae   : > { %v9168_v62 = vpop.eup %9167 }
0x1eaf   : > { %v5190_v7 = vsel %vm696_vm2, %v9168_v62, 0.0 }
0x1eb0   : > { %5191 = vadd.xlane.f32.xlu0 %v5190_v7  ;;  %v9067_v7 = vld [vmem:[%s9553_s29 + $0x128] sm:$0xff]  }
0x1ec6   : > { %5197 = vrot.lane.b32.xlu0 %v10218_v22, %s9348_s8 }
0x1eca   : > { %5349 = vrot.lane.b32.xlu0 %v10215_v14, %s9349_s7 }
0x1f35   : > { %v5189_v23 = vpop.xlane.xlu0 %5188 }
0x1f36   : > { %9169 = vrcp.f32 %v5189_v23  ;;  %v9068_v23 = vld [vmem:[%s9553_s29 + $0x120] sm:$0xff]  }
0x1f39   : > { %v5192_v13 = vpop.xlane.xlu0 %5191 }
0x1f3a   : > { %9171 = vrcp.f32 %v5192_v13  ;;  %v9069_v13 = vld [vmem:[%s9553_s29 + $0xf8] sm:$0xff]  }
0x1f3d   : > { %v5198_v11 = vpop.permute.xlu0 %5197 }
0x1f3e   : > { %8720 = vmatpush3.msra.mxu0 %v5198_v11 }
0x1f3f   : > { %8729 = vmatprep.subr.mxu0 %v9345_v0 }
0x1f41   : > { %v5350_v42 = vpop.permute.xlu0 %5349 }
0x1f43   : > { %v9170_v10 = vpop.eup %9169 }
0x1f44   : > { %v5195_v33 = vmul.f32 %v9170_v10, %v9166_v30 }
0x1f46   : > { %8722 = vmatmul.mubr.msk.f32.vlgmr.msra.gmra.mxu0 %vm696_vm2, %v5195_v33 }
0x1f47   : > { %v9172_v35 = vpop.eup %9171  ;;  %8730 = vmatpush3.xpose.msk.msra.mxu0 %vm696_vm2, %v5352_v31  ;;  %8731 = vmatprep.mubr.msk.f32.mxu0 %vm9346_vm0, %v9345_v0 }
0x1f48   : > { %v5196_v14 = vmul.f32 %v9172_v35, %v9168_v62  ;;  %8739 = vmatprep.subr.mxu0 %v9345_v0  ;;  %v9066_v62 = vld [vmem:[%s9553_s29 + $0x100] sm:$0xff]  }
0x1f4a   : > { %8727 = vmatmul.mubr.msk.f32.vlgmr.msra.gmra.mxu1 %vm696_vm2, %v5196_v14  ;;  %8732 = vmatmul.mubr.msk.f32.vlgmr.msra.gmra.mxu0 %vm696_vm2, %v5350_v42 }
0x1f4b   : > { %8735 = vmatpush3.xpose.msk.msra.mxu1 %vm696_vm2, %v5430_v41  ;;  %8736 = vmatprep.mubr.msk.f32.mxu1 %vm9346_vm0, %v9345_v0 }
0x1f4c   : > { %8744 = vmatprep.subr.mxu1 %v9345_v0  ;;  %8741 = vmatprep.mubr.msk.f32.mxu0 %vm9346_vm0, %v9345_v0 }
0x1f4e   : > { %8737 = vmatmul.mubr.msk.f32.vlgmr.msra.gmra.mxu1 %vm696_vm2, %v5428_v43 }
0x1f4f   : > { %8746 = vmatprep.mubr.msk.f32.mxu1 %vm9346_vm0, %v9345_v0 }
0x2006   : > { %v5269_v46 = vpop.f32.mrf.mxu0 }
0x2008   : > { %v8723_v47 = vpop.f32.mrf.mxu0 }
0x200a   : > { %v5345_v48 = vpop.f32.mrf.mxu1  ;;  %v5423_v6 = vpop.f32.mrf.mxu0 }
0x200b   : > { %v5505_v60 = vmul.f32 0.35355338, %v5423_v6  ;;  %v9002_v52 = vpack.i.bf16 %v5345_v48, %v5269_v46 }
0x200c   : > { %v8728_v58 = vpop.f32.mrf.mxu1  ;;  %v8733_v26 = vpop.f32.mrf.mxu0 }
0x200d   : > { %v5507_v37 = vsel %vm696_vm2, %v5505_v60, -inf }
0x200e   : > { %v5501_v56 = vpop.f32.mrf.mxu1  ;;  %5508 = vmax.xlane.f32.xlu0 %v5507_v37 }
0x200f   : > { %v5506_v53 = vmul.f32 0.35355338, %v5501_v56 }
0x2010   : > { %v8738_v2 = vpop.f32.mrf.mxu1 }
0x2011   : > { %v5510_v57 = vsel %vm696_vm2, %v5506_v53, -inf }
0x2012   : > { %5511 = vmax.xlane.f32.xlu1 %v5510_v57 }
0x2023   : > { %5605 = vrot.lane.b32.xlu1 %v10232_v24, %s9349_s7 }
0x2027   : > { %8998 = vrot.lane.b32.xlu1 %v8997_v61, %s9350_s28 }
0x202b   : > { %9003 = vrot.lane.b32.xlu1 %v9002_v52, %s9351_s18 }
0x2097   : > { %v5509_v36 = vpop.xlane.xlu0 %5508 }
0x2098   : > { %v5513_v1 = vsub.f32 %v5505_v60, %v5509_v36 }
0x209a   : > { %v5515_v4 = vmul.f32 1.442695, %v5513_v1 }
0x209b   : > { %v5512_v18 = vpop.xlane.xlu1 %5511 }
0x209c   : > { %9173 = vpow2.f32 %v5515_v4  ;;  %v5514_v32 = vsub.f32 %v5506_v53, %v5512_v18 }
0x209e   : > { %v5517_v12 = vmul.f32 1.442695, %v5514_v32 }
0x209f   : > { %v5606_v21 = vpop.permute.xlu1 %5605 }
0x20a0   : > { %9175 = vpow2.f32 %v5517_v12  ;;  %8745 = vmatpush3.msra.mxu1 %v5606_v21  ;;  %v9071_v21 = vld [vmem:[%s9553_s29 + $0x118] sm:$0xff]  }
0x20a1   : > { %8757 = vmatprep.subr.bf16.mxu1 %v9345_v0 }
0x20a3   : > { %v8999_v60 = vpop.permute.xlu1 %8998 }
0x20a4   : > { %v9001_v26 = vunpack.i.h.bf16 %v8999_v60  ;;  %v9000_v37 = vunpack.i.l.bf16 %v8999_v60 }
0x20a6   : > { %v5706_v57 = vsel %vm696_vm2, %v10271_v28, %v9001_v26  ;;  %v5705_v52 = vsel %vm696_vm2, %v10269_v25, %v9000_v37  ;;  %v5720_v25 = vrot.slane %v10152_v29, %v9891_v54 }
0x20a7   : > { %v9004_v58 = vpop.permute.xlu1 %9003 }
0x20a8   : > { %v9006_v56 = vunpack.i.h.bf16 %v9004_v58  ;;  %v9005_v53 = vunpack.i.l.bf16 %v9004_v58  ;;  %v5721_v28 = vadd.f32 %v5720_v25, %v10158_v3  ;;  %v5787_v3 = vrot.slane %v10152_v29, %v2124_v55 }
0x20a9   : > { %v9174_v24 = vpop.eup %9173 }
0x20aa   : > { %v5519_v15 = vsel %vm696_vm2, %v9174_v24, 0.0  ;;  %v5708_v4 = vsel %vm2043_vm3, %v5706_v57, %v9006_v56  ;;  %v5707_v18 = vsel %vm2043_vm3, %v5705_v52, %v9005_v53 }
0x20ab   : > { %5520 = vadd.xlane.f32.xlu0 %v5519_v15  ;;  %v9072_v15 = vld [vmem:[%s9553_s29 + $0x110] sm:$0xff]  }
0x20ad   : > { %v9176_v40 = vpop.eup %9175 }
0x20ae   : > { %v5522_v51 = vsel %vm696_vm2, %v9176_v40, 0.0 }
0x20af   : > { %5523 = vadd.xlane.f32.xlu0 %v5522_v51 }
0x20c5   : > { %5529 = vrot.lane.b32.xlu0 %v10218_v22, %s9349_s7 }
0x2134   : > { %v5521_v61 = vpop.xlane.xlu0 %5520 }
0x2135   : > { %9177 = vrcp.f32 %v5521_v61 }
0x2138   : > { %v5524_v45 = vpop.xlane.xlu0 %5523 }
0x2139   : > { %9179 = vrcp.f32 %v5524_v45 }
0x213c   : > { %v5530_v63 = vpop.permute.xlu0 %5529 }
0x213d   : > { %8740 = vmatpush3.msra.mxu0 %v5530_v63  ;;  %v5722_v63 = vadd.f32 %v5720_v25, %v10160_v20 }
0x213e   : > { %8749 = vmatprep.subr.bf16.mxu0 %v9345_v0 }
0x2142   : > { %v9178_v27 = vpop.eup %9177 }
0x2143   : > { %v5527_v8 = vmul.f32 %v9178_v27, %v9174_v24 }
0x2145   : > { %8742 = vmatmul.mubr.msk.f32.vlgmr.msra.gmra.mxu0 %vm696_vm2, %v5527_v8 }
0x2146   : > { %v9180_v30 = vpop.eup %9179  ;;  %8753 = vmatprep.mubr.msk.bf16.mxu0 %vm9346_vm0, %v9345_v0  ;;  %8750 = vmatpush3.bf16.msra.mxu0 %v9069_v13 }
0x2147   : > { %v5528_v22 = vmul.f32 %v9180_v30, %v9176_v40  ;;  %8751 = vmatprep.subr.bf16.mxu0 %v9345_v0 }
0x2149   : > { %8747 = vmatmul.mubr.msk.f32.vlgmr.msra.gmra.mxu1 %vm696_vm2, %v5528_v22 }
0x214a   : > { %8758 = vmatpush3.bf16.msra.mxu1 %v9065_v49  ;;  %8761 = vmatprep.mubr.msk.bf16.mxu1 %vm9346_vm0, %v9345_v0 }
0x214b   : > { %8759 = vmatprep.subr.bf16.mxu1 %v9345_v0 }
0x214e   : > { %8760 = vmatpush3.bf16.msra.mxu1 %v9066_v62 }
0x214f   : > { %8773 = vmatprep.subr.bf16.mxu1 %v9345_v0 }
0x2151   : > { %8762 = vmatmul.mubr.msk.bf16.vlgmr.msra.gmra.mxu1 %vm393_vm1, %v10195_v5  ;;  %v9070_v5 = vld [vmem:[%s9553_s29 + $0xf0] sm:$0xff]  }
0x2152   : > { %8774 = vmatpush3.bf16.msra.mxu1 %v9067_v7  ;;  %8777 = vmatprep.mubr.msk.bf16.mxu1 %vm9346_vm0, %v9345_v0  ;;  %v10425_v7 = vld [vmem:[%s9623_s26 + $0x18] sm:$0x3f]  ;;  %s9353_s26 = smov [#allocation7]  }
0x2153   : > { %8775 = vmatprep.subr.bf16.mxu1 %v9345_v0  ;;  %8752 = vmatpush3.bf16.msra.mxu0 %v9070_v5  ;;  %v5911_v5 = vrot.slane %v10425_v7, %v9626_v17 }
0x2154   : > { %8765 = vmatprep.subr.bf16.mxu0 %v9345_v0 }
0x2156   : > { %8776 = vmatpush3.bf16.msra.mxu1 %v9068_v23 }
0x2157   : > { %8786 = vmatprep.subr.mxu1 %v9345_v0 }
0x2159   : > { %8778 = vmatmul.mubr.msk.bf16.vlgmr.msra.gmra.mxu1 %vm393_vm1, %v10164_v9 }
0x215a   : > { %8788 = vmatprep.mubr.msk.f32.mxu1 %vm9346_vm0, %v9345_v0 }
0x2205   : > { %v5601_v11 = vpop.f32.mrf.mxu0 }
0x2207   : > { %v8743_v31 = vpop.f32.mrf.mxu0 }
0x2209   : > { %v5677_v10 = vpop.f32.mrf.mxu1 }
0x220a   : > { %v9007_v33 = vpack.i.bf16 %v5677_v10, %v5601_v11 }
0x220b   : > { %v8748_v35 = vpop.f32.mrf.mxu1 }
0x220c   : > { %9008 = vrot.lane.b32.xlu0 %v9007_v33, %s9352_s14 }
0x2211   : > { %v5834_v41 = vpop.f32.mrf.mxu1 }
0x2212   : > { %v10433_v33 = vadd.f32 %v5834_v41, %v5787_v3 }
0x2213   : > { %v8763_v14 = vpop.f32.mrf.mxu1 }
0x2215   : > { %v10389_v42 = vpop.f32.mrf.mxu1 }
0x2216   : > { %v10446_v41 = vadd.f32 %v10389_v42, %v5787_v3 }
0x2217   : > { %v8764_v43 = vpop.f32.mrf.mxu1 }
0x2219   : > { %v5958_v46 = vpop.f32.mrf.mxu1 }
0x221a   : > { %v10436_v35 = vadd.f32 %v5958_v46, %v5911_v5 }
0x221b   : > { %v8779_v47 = vpop.f32.mrf.mxu1 }
0x221d   : > { %v10391_v48 = vpop.f32.mrf.mxu1 }
0x221e   : > { %v10452_v46 = vadd.f32 %v10391_v48, %v5911_v5 }
0x221f   : > { %v8780_v6 = vpop.f32.mrf.mxu1 }
0x227e   : > { %v9009_v2 = vpop.permute.xlu0 %9008 }
0x227f   : > { %v9011_v36 = vunpack.i.h.bf16 %v9009_v2  ;;  %v9010_v1 = vunpack.i.l.bf16 %v9009_v2 }
0x2281   : > { %v5710_v32 = vsel %vm2046_vm4, %v5708_v4, %v9011_v36  ;;  %v5709_v12 = vsel %vm2046_vm4, %v5707_v18, %v9010_v1 }
0x2282   : > { %v5716_v24 = vpack.c.bf16 %v5710_v32, %v5709_v12 }
0x2284   : > { %8754 = vmatmul.mubr.msk.bf16.vlgmr.msra.gmra.mxu0 %vm393_vm1, %v5716_v24 }
0x2285   : > { %8766 = vmatpush3.bf16.msra.mxu0 %v9071_v21  ;;  %8769 = vmatprep.mubr.msk.bf16.mxu0 %vm9346_vm0, %v9345_v0 }
0x2286   : > { %8767 = vmatprep.subr.bf16.mxu0 %v9345_v0 }
0x2289   : > { %8768 = vmatpush3.bf16.msra.mxu0 %v9072_v15 }
0x228a   : > { %8781 = vmatprep.subr.mxu0 %v9345_v0 }
0x228c   : > { %8770 = vmatmul.mubr.msk.bf16.vlgmr.msra.gmra.mxu0 %vm393_vm1, %v10164_v9  ;;  %v5849_v9 = vrot.slane %v10152_v29, %v2186_v50 }
0x228d   : > { %8783 = vmatprep.mubr.msk.f32.mxu0 %vm9346_vm0, %v9345_v0 }
0x2344   : > { %v5772_v40 = vpop.f32.mrf.mxu0 }
0x2345   : > { %v5773_v51 = vadd.f32 %v5772_v40, %v5721_v28 }
0x2346   : > { %v8755_v61 = vpop.f32.mrf.mxu0 }
0x2347   : > { %v7383_v45 = vsel %vm393_vm1, %v5773_v51, 0.0 }
0x2348   : > { %v7384_v27 = vrot.slane %v7383_v45, 4  ;;  %v5775_v8 = vpop.f32.mrf.mxu0 }
0x2349   : > { %v5776_v30 = vadd.f32 %v5775_v8, %v5722_v63 }
0x234a   : > { %v7385_v49 = vadd.f32 %v7384_v27, %v7383_v45  ;;  %v8756_v22 = vpop.f32.mrf.mxu0 }
0x234b   : > { %v7390_v62 = vsel %vm393_vm1, %v5776_v30, 0.0 }
0x234c   : > { %v7386_v23 = vrot.slane %v7385_v49, 2  ;;  %v7391_v13 = vrot.slane %v7390_v62, 4  ;;  %v5896_v20 = vpop.f32.mrf.mxu0 }
0x234d   : > { %v10429_v11 = vadd.f32 %v5896_v20, %v5849_v9 }
0x234e   : > { %v7387_v31 = vadd.f32 %v7386_v23, %v7385_v49  ;;  %v7392_v50 = vadd.f32 %v7391_v13, %v7390_v62  ;;  %v8771_v10 = vpop.f32.mrf.mxu0 }
0x234f   : > { %8782 = vmatpush3.xpose.msk.msra.mxu0 %vm696_vm2, %v10429_v11 }
0x2350   : > { %v7388_v16 = vrot.slane %v7387_v31, 1  ;;  %v7393_v55 = vrot.slane %v7392_v50, 2  ;;  %v5899_v29 = vpop.f32.mrf.mxu0  ;;  %8791 = vmatprep.subr.mxu0 %v9345_v0 }
0x2351   : > { %v10438_v14 = vadd.f32 %v5899_v29, %v5849_v9 }
0x2352   : > { %v7394_v17 = vadd.f32 %v7393_v55, %v7392_v50  ;;  %v8772_v43 = vpop.f32.mrf.mxu0  ;;  %8784 = vmatmul.mubr.msk.f32.vlgmr.msra.gmra.mxu0 %vm696_vm2, %v10433_v33  ;;  %v7389_v47 = vadd.f32 %v7388_v16, %v7387_v31 }
0x2353   : > { %8787 = vmatpush3.xpose.msk.msra.mxu1 %vm696_vm2, %v10438_v14  ;;  %8792 = vmatpush3.msra.mxu0 %v10436_v35 }
0x2354   : > { %v7395_v6 = vrot.slane %v7394_v17, 1  ;;  %8796 = vmatprep.subr.mxu1 %v9345_v0  ;;  %8793 = vmatprep.mubr.msk.f32.mxu0 %vm9346_vm0, %v9345_v0  ;;  %v7397_v42 = vmul.f32 0.125, %v7389_v47 }
0x2355   : > { %8801 = vmatprep.subr.mxu0 %v9345_v0 }
0x2356   : > { %v7396_v60 = vadd.f32 %v7395_v6, %v7394_v17  ;;  %8789 = vmatmul.mubr.msk.f32.vlgmr.msra.gmra.mxu1 %vm696_vm2, %v10446_v41 }
0x2357   : > { %8797 = vmatpush3.msra.mxu1 %v10452_v46  ;;  %8798 = vmatprep.mubr.msk.f32.mxu1 %vm9346_vm0, %v9345_v0 }
0x2358   : > { %8806 = vmatprep.subr.mxu1 %v9345_v0  ;;  %v7398_v58 = vmul.f32 0.125, %v7396_v60 }
0x235a   : > { %v10462_v26 = vsel %vm3769_vm5, %v7398_v58, %v7397_v42 }
0x2412   : > { %v6037_v48 = vpop.f32.mrf.mxu0 }
0x2413   : > { %v6117_v37 = vmul.f32 0.35355338, %v6037_v48 }
0x2414   : > { %v8785_v56 = vpop.f32.mrf.mxu0 }
0x2415   : > { %v6119_v53 = vsel %vm696_vm2, %v6117_v37, -inf }
0x2416   : > { %v6113_v2 = vpop.f32.mrf.mxu1  ;;  %6120 = vmax.xlane.f32.xlu1 %v6119_v53 }
0x2417   : > { %v6118_v57 = vmul.f32 0.35355338, %v6113_v2 }
0x2418   : > { %v8790_v52 = vpop.f32.mrf.mxu1 }
0x2419   : > { %v6122_v36 = vsel %vm696_vm2, %v6118_v57, -inf }
0x241a   : > { %6123 = vmax.xlane.f32.xlu0 %v6122_v36 }
0x2427   : > { %6289 = vrot.lane.b32.xlu1 %v10429_v11, %s9347_s12 }
0x242b   : > { %6287 = vrot.lane.b32.xlu1 %v10433_v33, %s9347_s12 }
0x242f   : > { %6365 = vrot.lane.b32.xlu1 %v10446_v41, %s9347_s12 }
0x249f   : > { %v6121_v1 = vpop.xlane.xlu1 %6120 }
0x24a0   : > { %v6125_v4 = vsub.f32 %v6117_v37, %v6121_v1 }
0x24a2   : > { %v6127_v18 = vmul.f32 1.442695, %v6125_v4 }
0x24a3   : > { %v6124_v32 = vpop.xlane.xlu0 %6123  ;;  %v6290_v61 = vpop.permute.xlu1 %6289 }
0x24a4   : > { %9181 = vpow2.f32 %v6127_v18  ;;  %v6126_v12 = vsub.f32 %v6118_v57, %v6124_v32 }
0x24a6   : > { %v6129_v21 = vmul.f32 1.442695, %v6126_v12 }
0x24a7   : > { %v6288_v8 = vpop.permute.xlu1 %6287 }
0x24a8   : > { %9183 = vpow2.f32 %v6129_v21 }
0x24ab   : > { %v6366_v49 = vpop.permute.xlu1 %6365 }
0x24b1   : > { %v9182_v24 = vpop.eup %9181 }
0x24b2   : > { %v6131_v15 = vsel %vm696_vm2, %v9182_v24, 0.0 }
0x24b3   : > { %6132 = vadd.xlane.f32.xlu0 %v6131_v15 }
0x24b5   : > { %v9184_v25 = vpop.eup %9183 }
0x24b6   : > { %v6134_v28 = vsel %vm696_vm2, %v9184_v25, 0.0 }
0x24b7   : > { %6135 = vadd.xlane.f32.xlu0 %v6134_v28 }
0x24cd   : > { %6367 = vrot.lane.b32.xlu0 %v10438_v14, %s9347_s12 }
0x253c   : > { %v6133_v40 = vpop.xlane.xlu0 %6132 }
0x253d   : > { %9185 = vrcp.f32 %v6133_v40 }
0x2540   : > { %v6136_v51 = vpop.xlane.xlu0 %6135 }
0x2541   : > { %9187 = vrcp.f32 %v6136_v51 }
0x2544   : > { %v6368_v9 = vpop.permute.xlu0 %6367 }
0x254a   : > { %v9186_v45 = vpop.eup %9185 }
0x254b   : > { %v6139_v63 = vmul.f32 %v9186_v45, %v9182_v24 }
0x254d   : > { %8794 = vmatmul.mubr.msk.f32.vlgmr.msra.gmra.mxu0 %vm696_vm2, %v6139_v63 }
0x254e   : > { %v9188_v27 = vpop.eup %9187  ;;  %8802 = vmatpush3.xpose.msk.msra.mxu0 %vm696_vm2, %v6290_v61  ;;  %8803 = vmatprep.mubr.msk.f32.mxu0 %vm9346_vm0, %v9345_v0 }
0x254f   : > { %v6140_v30 = vmul.f32 %v9188_v27, %v9184_v25  ;;  %8811 = vmatprep.subr.mxu0 %v9345_v0 }
0x2551   : > { %8799 = vmatmul.mubr.msk.f32.vlgmr.msra.gmra.mxu1 %vm696_vm2, %v6140_v30  ;;  %8804 = vmatmul.mubr.msk.f32.vlgmr.msra.gmra.mxu0 %vm696_vm2, %v6288_v8 }
0x2552   : > { %8807 = vmatpush3.xpose.msk.msra.mxu1 %vm696_vm2, %v6368_v9  ;;  %8808 = vmatprep.mubr.msk.f32.mxu1 %vm9346_vm0, %v9345_v0 }
0x2553   : > { %8816 = vmatprep.subr.mxu1 %v9345_v0  ;;  %8813 = vmatprep.mubr.msk.f32.mxu0 %vm9346_vm0, %v9345_v0 }
0x2555   : > { %8809 = vmatmul.mubr.msk.f32.vlgmr.msra.gmra.mxu1 %vm696_vm2, %v6366_v49 }
0x2556   : > { %8818 = vmatprep.mubr.msk.f32.mxu1 %vm9346_vm0, %v9345_v0 }
0x260d   : > { %v10492_v22 = vpop.f32.mrf.mxu0 }
0x260f   : > { %v8795_v62 = vpop.f32.mrf.mxu0 }
0x2611   : > { %v10494_v3 = vpop.f32.mrf.mxu1  ;;  %v6361_v23 = vpop.f32.mrf.mxu0 }
0x2612   : > { %v6443_v13 = vmul.f32 0.35355338, %v6361_v23 }
0x2613   : > { %v8800_v20 = vpop.f32.mrf.mxu1  ;;  %v8805_v5 = vpop.f32.mrf.mxu0 }
0x2614   : > { %v6445_v31 = vsel %vm696_vm2, %v6443_v13, -inf }
0x2615   : > { %v6439_v50 = vpop.f32.mrf.mxu1  ;;  %6446 = vmax.xlane.f32.xlu1 %v6445_v31 }
0x2616   : > { %v6444_v10 = vmul.f32 0.35355338, %v6439_v50 }
0x2617   : > { %v8810_v16 = vpop.f32.mrf.mxu1 }
0x2618   : > { %v6448_v55 = vsel %vm696_vm2, %v6444_v10, -inf }
0x2619   : > { %6449 = vmax.xlane.f32.xlu0 %v6448_v55 }
0x2626   : > { %6468 = vrot.lane.b32.xlu1 %v10436_v35, %s9347_s12 }
0x262a   : > { %6623 = vrot.lane.b32.xlu1 %v10429_v11, %s9348_s8 }
0x262e   : > { %6701 = vrot.lane.b32.xlu1 %v10438_v14, %s9348_s8 }
0x2632   : > { %6621 = vrot.lane.b32.xlu1 %v10433_v33, %s9348_s8 }
0x269e   : > { %v6447_v29 = vpop.xlane.xlu1 %6446 }
0x269f   : > { %v6451_v17 = vsub.f32 %v6443_v13, %v6447_v29 }
0x26a1   : > { %v6453_v43 = vmul.f32 1.442695, %v6451_v17 }
0x26a2   : > { %v6450_v47 = vpop.xlane.xlu0 %6449  ;;  %v6469_v6 = vpop.permute.xlu1 %6468 }
0x26a3   : > { %9189 = vpow2.f32 %v6453_v43  ;;  %v6452_v60 = vsub.f32 %v6444_v10, %v6450_v47  ;;  %8812 = vmatpush3.msra.mxu0 %v6469_v6 }
0x26a4   : > { %8821 = vmatprep.subr.mxu0 %v9345_v0 }
0x26a5   : > { %v6455_v42 = vmul.f32 1.442695, %v6452_v60 }
0x26a6   : > { %v6624_v57 = vpop.permute.xlu1 %6623 }
0x26a7   : > { %9191 = vpow2.f32 %v6455_v42 }
0x26aa   : > { %v6702_v1 = vpop.permute.xlu1 %6701 }
0x26ae   : > { %v6622_v12 = vpop.permute.xlu1 %6621 }
0x26b0   : > { %v9190_v58 = vpop.eup %9189 }
0x26b1   : > { %v6457_v48 = vsel %vm696_vm2, %v9190_v58, 0.0 }
0x26b2   : > { %6458 = vadd.xlane.f32.xlu0 %v6457_v48 }
0x26b4   : > { %v9192_v37 = vpop.eup %9191 }
0x26b5   : > { %v6460_v56 = vsel %vm696_vm2, %v9192_v37, 0.0 }
0x26b6   : > { %6461 = vadd.xlane.f32.xlu0 %v6460_v56 }
0x26cc   : > { %6545 = vrot.lane.b32.xlu0 %v10452_v46, %s9347_s12  ;;  %s9275_s12 = sshll.u32 %s9353_s26, 4  ;;  %s9276_s12 = int_to_ptr.vmem [resolvable:$false] %s9275_s12 }
0x26cd   : > { %p9278_p0 = scmp.lt.s32.totalorder %s10652_s13, %s9276_s12 }
0x26d0   : > { %6699 = vrot.lane.b32.xlu0 %v10446_v41, %s9348_s8 }
0x273b   : > { %v6459_v53 = vpop.xlane.xlu0 %6458 }
0x273c   : > { %9193 = vrcp.f32 %v6459_v53 }
0x273f   : > { %v6462_v2 = vpop.xlane.xlu0 %6461 }
0x2740   : > { %9195 = vrcp.f32 %v6462_v2 }
0x2743   : > { %v6546_v52 = vpop.permute.xlu0 %6545 }
0x2744   : > { %8817 = vmatpush3.msra.mxu1 %v6546_v52 }
0x2745   : > { %8826 = vmatprep.subr.mxu1 %v9345_v0 }
0x2747   : > { %v6700_v21 = vpop.permute.xlu0 %6699 }
0x2749   : > { %v9194_v36 = vpop.eup %9193 }
0x274a   : > { %v6465_v4 = vmul.f32 %v9194_v36, %v9190_v58 }
0x274c   : > { %8814 = vmatmul.mubr.msk.f32.vlgmr.msra.gmra.mxu0 %vm696_vm2, %v6465_v4 }
0x274d   : > { %v9196_v18 = vpop.eup %9195  ;;  %8822 = vmatpush3.xpose.msk.msra.mxu0 %vm696_vm2, %v6624_v57  ;;  %8823 = vmatprep.mubr.msk.f32.mxu0 %vm9346_vm0, %v9345_v0 }
0x274e   : > { %v6466_v32 = vmul.f32 %v9196_v18, %v9192_v37  ;;  %8831 = vmatprep.subr.mxu0 %v9345_v0 }
0x2750   : > { %8819 = vmatmul.mubr.msk.f32.vlgmr.msra.gmra.mxu1 %vm696_vm2, %v6466_v32  ;;  %8824 = vmatmul.mubr.msk.f32.vlgmr.msra.gmra.mxu0 %vm696_vm2, %v6622_v12 }
0x2751   : > { %8827 = vmatpush3.xpose.msk.msra.mxu1 %vm696_vm2, %v6702_v1  ;;  %8828 = vmatprep.mubr.msk.f32.mxu1 %vm9346_vm0, %v9345_v0 }
0x2752   : > { %8836 = vmatprep.subr.mxu1 %v9345_v0  ;;  %8833 = vmatprep.mubr.msk.f32.mxu0 %vm9346_vm0, %v9345_v0 }
0x2754   : > { %8829 = vmatmul.mubr.msk.f32.vlgmr.msra.gmra.mxu1 %vm696_vm2, %v6700_v21 }
0x2755   : > { %8838 = vmatprep.mubr.msk.f32.mxu1 %vm9346_vm0, %v9345_v0 }
0x280c   : > { %v10530_v24 = vpop.f32.mrf.mxu0 }
0x280e   : > { %v8815_v15 = vpop.f32.mrf.mxu0 }
0x2810   : > { %v10532_v25 = vpop.f32.mrf.mxu1  ;;  %v6695_v28 = vpop.f32.mrf.mxu0 }
0x2811   : > { %v9012_v40 = vpack.i.bf16 %v10532_v25, %v10530_v24  ;;  %v6777_v51 = vmul.f32 0.35355338, %v6695_v28 }
0x2812   : > { %v8820_v61 = vpop.f32.mrf.mxu1  ;;  %v8825_v45 = vpop.f32.mrf.mxu0 }
0x2813   : > { %v6779_v63 = vsel %vm696_vm2, %v6777_v51, -inf }
0x2814   : > { %v6773_v27 = vpop.f32.mrf.mxu1  ;;  %6780 = vmax.xlane.f32.xlu1 %v6779_v63 }
0x2815   : > { %v6778_v8 = vmul.f32 0.35355338, %v6773_v27 }
0x2816   : > { %v8830_v30 = vpop.f32.mrf.mxu1 }
0x2817   : > { %v6782_v9 = vsel %vm696_vm2, %v6778_v8, -inf }
0x2818   : > { %6783 = vmax.xlane.f32.xlu0 %v6782_v9 }
0x2825   : > { %6801 = vrot.lane.b32.xlu1 %v10436_v35, %s9348_s8 }
0x2829   : > { %6955 = vrot.lane.b32.xlu1 %v10429_v11, %s9349_s7 }
0x282d   : > { %7033 = vrot.lane.b32.xlu1 %v10438_v14, %s9349_s7 }
0x2831   : > { %6953 = vrot.lane.b32.xlu1 %v10433_v33, %s9349_s7 }
0x289d   : > { %v6781_v49 = vpop.xlane.xlu1 %6780 }
0x289e   : > { %v6785_v62 = vsub.f32 %v6777_v51, %v6781_v49 }
0x28a0   : > { %v6787_v23 = vmul.f32 1.442695, %v6785_v62 }
0x28a1   : > { %v6784_v13 = vpop.xlane.xlu0 %6783  ;;  %v6802_v20 = vpop.permute.xlu1 %6801 }
0x28a2   : > { %9197 = vpow2.f32 %v6787_v23  ;;  %v6786_v5 = vsub.f32 %v6778_v8, %v6784_v13  ;;  %8832 = vmatpush3.msra.mxu0 %v6802_v20  ;;  %v9074_v23 = vld [vmem:[%s9553_s29 + $0x130] sm:$0xff]  }
0x28a3   : > { %8841 = vmatprep.subr.mxu0 %v9345_v0 }
0x28a4   : > { %v6789_v31 = vmul.f32 1.442695, %v6786_v5 }
0x28a5   : > { %v6956_v55 = vpop.permute.xlu1 %6955 }
0x28a6   : > { %9199 = vpow2.f32 %v6789_v31 }
0x28a9   : > { %v7034_v43 = vpop.permute.xlu1 %7033 }
0x28ad   : > { %v6954_v60 = vpop.permute.xlu1 %6953 }
0x28af   : > { %v9198_v50 = vpop.eup %9197 }
0x28b0   : > { %v6791_v11 = vsel %vm696_vm2, %v9198_v50, 0.0 }
0x28b1   : > { %6792 = vadd.xlane.f32.xlu0 %v6791_v11 }
0x28b3   : > { %v9200_v14 = vpop.eup %9199 }
0x28b4   : > { %v6794_v10 = vsel %vm696_vm2, %v9200_v14, 0.0 }
0x28b5   : > { %6795 = vadd.xlane.f32.xlu0 %v6794_v10 }
0x28cb   : > { %6877 = vrot.lane.b32.xlu0 %v10452_v46, %s9348_s8  ;;  %s9277_s8 = scalar_lea.vmem %s9276_s12, 256 }
0x28cc   : > { %p9279_p2 = scmp.lt.s32.totalorder %s9277_s8, %s9271_s16 }
0x28ce   : > { %p9280_p4 = por %p9279_p2, %p9278_p0 }
0x28cf   : > { %7031 = vrot.lane.b32.xlu0 %v10446_v41, %s9349_s7 }
0x28d0   : > { %p9281_p9 = pnand %p9280_p4, %p9274_p10 }
0x293a   : > { %v6793_v33 = vpop.xlane.xlu0 %6792 }
0x293b   : > { %9201 = vrcp.f32 %v6793_v33 }
0x293e   : > { %v6796_v16 = vpop.xlane.xlu0 %6795 }
0x293f   : > { %9203 = vrcp.f32 %v6796_v16 }
0x2942   : > { %v6878_v29 = vpop.permute.xlu0 %6877 }
0x2943   : > { %8837 = vmatpush3.msra.mxu1 %v6878_v29 }
0x2944   : > { %8846 = vmatprep.subr.mxu1 %v9345_v0 }
0x2946   : > { %v7032_v42 = vpop.permute.xlu0 %7031 }
0x2948   : > { %v9202_v17 = vpop.eup %9201 }
0x2949   : > { %v6799_v47 = vmul.f32 %v9202_v17, %v9198_v50 }
0x294b   : > { %8834 = vmatmul.mubr.msk.f32.vlgmr.msra.gmra.mxu0 %vm696_vm2, %v6799_v47 }
0x294c   : > { %v9204_v6 = vpop.eup %9203  ;;  %8842 = vmatpush3.xpose.msk.msra.mxu0 %vm696_vm2, %v6956_v55  ;;  %8843 = vmatprep.mubr.msk.f32.mxu0 %vm9346_vm0, %v9345_v0 }
0x294d   : > { %v6800_v41 = vmul.f32 %v9204_v6, %v9200_v14  ;;  %8851 = vmatprep.subr.mxu0 %v9345_v0 }
0x294f   : > { %8839 = vmatmul.mubr.msk.f32.vlgmr.msra.gmra.mxu1 %vm696_vm2, %v6800_v41  ;;  %8844 = vmatmul.mubr.msk.f32.vlgmr.msra.gmra.mxu0 %vm696_vm2, %v6954_v60 }
0x2950   : > { %8847 = vmatpush3.xpose.msk.msra.mxu1 %vm696_vm2, %v7034_v43  ;;  %8848 = vmatprep.mubr.msk.f32.mxu1 %vm9346_vm0, %v9345_v0 }
0x2951   : > { %8856 = vmatprep.subr.mxu1 %v9345_v0  ;;  %8853 = vmatprep.mubr.msk.f32.mxu0 %vm9346_vm0, %v9345_v0 }
0x2953   : > { %8849 = vmatmul.mubr.msk.f32.vlgmr.msra.gmra.mxu1 %vm696_vm2, %v7032_v42 }
0x2954   : > { %8858 = vmatprep.mubr.msk.f32.mxu1 %vm9346_vm0, %v9345_v0 }
0x2a0b   : > { %v6873_v58 = vpop.f32.mrf.mxu0 }
0x2a0d   : > { %v8835_v48 = vpop.f32.mrf.mxu0 }
0x2a0f   : > { %v6949_v37 = vpop.f32.mrf.mxu1  ;;  %v7027_v56 = vpop.f32.mrf.mxu0 }
0x2a10   : > { %v7109_v53 = vmul.f32 0.35355338, %v7027_v56  ;;  %v9017_v32 = vpack.i.bf16 %v6949_v37, %v6873_v58  ;;  %v9077_v37 = vld [vmem:[%s9553_s29 + $0x140] sm:$0xff]   ;;  %v9078_v56 = vld [vmem:[%s9553_s29 + $0x150] sm:$0xff]  }
0x2a11   : > { %v8840_v2 = vpop.f32.mrf.mxu1  ;;  %v8845_v57 = vpop.f32.mrf.mxu0 }
0x2a12   : > { %v7111_v52 = vsel %vm696_vm2, %v7109_v53, -inf }
0x2a13   : > { %v7105_v36 = vpop.f32.mrf.mxu1  ;;  %7112 = vmax.xlane.f32.xlu1 %v7111_v52 }
0x2a14   : > { %v7110_v1 = vmul.f32 0.35355338, %v7105_v36 }
0x2a15   : > { %v8850_v4 = vpop.f32.mrf.mxu1 }
0x2a16   : > { %v7114_v18 = vsel %vm696_vm2, %v7110_v1, -inf }
0x2a17   : > { %7115 = vmax.xlane.f32.xlu0 %v7114_v18 }
0x2a24   : > { %7133 = vrot.lane.b32.xlu1 %v10436_v35, %s9349_s7 }
0x2a28   : > { %9013 = vrot.lane.b32.xlu1 %v9012_v40, %s9350_s28 }
0x2a2c   : > { %9018 = vrot.lane.b32.xlu1 %v9017_v32, %s9351_s18 }
0x2a9c   : > { %v7113_v12 = vpop.xlane.xlu1 %7112 }
0x2a9d   : > { %v7117_v21 = vsub.f32 %v7109_v53, %v7113_v12  ;;  %v7324_v53 = vrot.slane %v10425_v7, %v9632_v19 }
0x2a9f   : > { %v7119_v15 = vmul.f32 1.442695, %v7117_v21  ;;  %v7325_v2 = vadd.f32 %v7324_v53, %v10189_v34  ;;  %v7326_v4 = vadd.f32 %v7324_v53, %v10191_v59 }
0x2aa0   : > { %v7116_v28 = vpop.xlane.xlu0 %7115  ;;  %v7134_v51 = vpop.permute.xlu1 %7133 }
0x2aa1   : > { %9205 = vpow2.f32 %v7119_v15  ;;  %v7118_v61 = vsub.f32 %v7110_v1, %v7116_v28  ;;  %8852 = vmatpush3.msra.mxu0 %v7134_v51 }
0x2aa2   : > { %8861 = vmatprep.subr.bf16.mxu0 %v9345_v0 }
0x2aa3   : > { %v7121_v45 = vmul.f32 1.442695, %v7118_v61 }
0x2aa4   : > { %v9014_v11 = vpop.permute.xlu1 %9013 }
0x2aa5   : > { %9207 = vpow2.f32 %v7121_v45  ;;  %v9016_v10 = vunpack.i.h.bf16 %v9014_v11  ;;  %v9015_v33 = vunpack.i.l.bf16 %v9014_v11 }
0x2aa7   : > { %v7310_v17 = vsel %vm696_vm2, %v10494_v3, %v9016_v10  ;;  %v7309_v43 = vsel %vm696_vm2, %v10492_v22, %v9015_v33  ;;  %v9075_v3 = vld [vmem:[%s9553_s29 + $0x148] sm:$0xff]   ;;  %v9076_v22 = vld [vmem:[%s9553_s29 + $0x158] sm:$0xff]  }
0x2aa8   : > { %v9019_v14 = vpop.permute.xlu1 %9018 }
0x2aa9   : > { %v9021_v16 = vunpack.i.h.bf16 %v9019_v14  ;;  %v9020_v55 = vunpack.i.l.bf16 %v9019_v14 }
0x2aab   : > { %v7311_v41 = vsel %vm2043_vm3, %v7309_v43, %v9020_v55  ;;  %v7312_v60 = vsel %vm2043_vm3, %v7310_v17, %v9021_v16 }
0x2aae   : > { %v9206_v35 = vpop.eup %9205 }
0x2aaf   : > { %v7123_v63 = vsel %vm696_vm2, %v9206_v35, 0.0 }
0x2ab0   : > { %7124 = vadd.xlane.f32.xlu0 %v7123_v63 }
0x2ab2   : > { %v9208_v24 = vpop.eup %9207 }
0x2ab3   : > { %v7126_v25 = vsel %vm696_vm2, %v9208_v24, 0.0 }
0x2ab4   : > { %7127 = vadd.xlane.f32.xlu0 %v7126_v25 }
0x2aca   : > { %7209 = vrot.lane.b32.xlu0 %v10452_v46, %s9349_s7  ;;  %v9073_v46 = vld [vmem:[%s9553_s29 + $0x138] sm:$0xff]  }
0x2b39   : > { %v7125_v40 = vpop.xlane.xlu0 %7124 }
0x2b3a   : > { %9209 = vrcp.f32 %v7125_v40 }
0x2b3d   : > { %v7128_v27 = vpop.xlane.xlu0 %7127 }
0x2b3e   : > { %9211 = vrcp.f32 %v7128_v27 }
0x2b41   : > { %v7210_v8 = vpop.permute.xlu0 %7209 }
0x2b42   : > { %8857 = vmatpush3.msra.mxu1 %v7210_v8 }
0x2b43   : > { %8869 = vmatprep.subr.bf16.mxu1 %v9345_v0 }
0x2b47   : > { %v9210_v30 = vpop.eup %9209 }
0x2b48   : > { %v7131_v9 = vmul.f32 %v9210_v30, %v9206_v35 }
0x2b4a   : > { %8854 = vmatmul.mubr.msk.f32.vlgmr.msra.gmra.mxu0 %vm696_vm2, %v7131_v9 }
0x2b4b   : > { %v9212_v49 = vpop.eup %9211  ;;  %8865 = vmatprep.mubr.msk.bf16.mxu0 %vm9346_vm0, %v9345_v0  ;;  %8862 = vmatpush3.bf16.msra.mxu0 %v9073_v46 }
0x2b4c   : > { %v7132_v62 = vmul.f32 %v9212_v49, %v9208_v24  ;;  %8863 = vmatprep.subr.bf16.mxu0 %v9345_v0 }
0x2b4e   : > { %8859 = vmatmul.mubr.msk.f32.vlgmr.msra.gmra.mxu1 %vm696_vm2, %v7132_v62 }
0x2b4f   : > { %8873 = vmatprep.mubr.msk.bf16.mxu1 %vm9346_vm0, %v9345_v0  ;;  %8864 = vmatpush3.bf16.msra.mxu0 %v9074_v23  ;;  %v9079_v23 = vld [vmem:[%s9553_s29 + $0x168] sm:$0xff]  }
0x2b50   : > { %8877 = vmatprep.subr.bf16.mxu0 %v9345_v0  ;;  %8870 = vmatpush3.bf16.msra.mxu1 %v9075_v3 }
0x2b51   : > { %8871 = vmatprep.subr.bf16.mxu1 %v9345_v0 }
0x2b54   : > { %8872 = vmatpush3.bf16.msra.mxu1 %v9077_v37  ;;  %v7572_v37 = vrot.slane %v10425_v7, %v9681_v44 }
0x2b55   : > { %8885 = vmatprep.subr.bf16.mxu1 %v9345_v0 }
0x2c0a   : > { %v7205_v13 = vpop.f32.mrf.mxu0 }
0x2c0c   : > { %v8855_v20 = vpop.f32.mrf.mxu0 }
0x2c0d   : > { %v9081_v20 = vld [vmem:[%s9553_s29 + $0x178] sm:$0xff]  }
0x2c0e   : > { %v7281_v5 = vpop.f32.mrf.mxu1 }
0x2c0f   : > { %v9022_v31 = vpack.i.bf16 %v7281_v5, %v7205_v13  ;;  %v9080_v13 = vld [vmem:[%s9553_s29 + $0x160] sm:$0xff]   ;;  %v7425_v5 = vrot.slane %v10425_v7, %v9674_v39 }
0x2c10   : > { %v8860_v50 = vpop.f32.mrf.mxu1 }
0x2c11   : > { %9023 = vrot.lane.b32.xlu1 %v9022_v31, %s9352_s14  ;;  %v7495_v31 = vrot.slane %v10425_v7, %v9671_v38 }
0x2c83   : > { %v9024_v29 = vpop.permute.xlu1 %9023 }
0x2c84   : > { %v9026_v47 = vunpack.i.h.bf16 %v9024_v29  ;;  %v9025_v6 = vunpack.i.l.bf16 %v9024_v29 }
0x2c86   : > { %v7314_v42 = vsel %vm2046_vm4, %v7312_v60, %v9026_v47  ;;  %v7313_v58 = vsel %vm2046_vm4, %v7311_v41, %v9025_v6 }
0x2c87   : > { %v7320_v48 = vpack.c.bf16 %v7314_v42, %v7313_v58 }
0x2c89   : > { %8866 = vmatmul.mubr.msk.bf16.vlgmr.msra.gmra.mxu0 %vm393_vm1, %v7320_v48 }
0x2c8a   : > { %8881 = vmatprep.mubr.msk.bf16.mxu0 %vm9346_vm0, %v9345_v0  ;;  %8878 = vmatpush3.bf16.msra.mxu0 %v9076_v22  ;;  %v9082_v22 = vld [vmem:[%s9553_s29 + $0x170] sm:$0xff]   ;;  %s8144_s29 = sshll.u32 %s9412_s25, 7  ;;  %s7700_s25 = scalar_lea.sflag [#allocation4], %s9541_s20 }
0x2c8b   : > { %8879 = vmatprep.subr.bf16.mxu0 %v9345_v0  ;;  %s10650_s17 = scalar_lea.hbm %s10704_s6, %s8144_s29 }
0x2c8e   : > { %8880 = vmatpush3.bf16.msra.mxu0 %v9078_v56 }
0x2c8f   : > { %8893 = vmatprep.subr.bf16.mxu0 %v9345_v0 }
0x2d49   : > { %v7376_v57 = vpop.f32.mrf.mxu0 }
0x2d4a   : > { %v7377_v52 = vadd.f32 %v7376_v57, %v7325_v2 }
0x2d4b   : > { %v8867_v36 = vpop.f32.mrf.mxu0 }
0x2d4c   : > { %v7399_v1 = vsel %vm393_vm1, %v7377_v52, 0.0 }
0x2d4d   : > { %v7400_v18 = vrot.slane %v7399_v1, 4  ;;  %v7379_v32 = vpop.f32.mrf.mxu0 }
0x2d4e   : > { %v7380_v12 = vadd.f32 %v7379_v32, %v7326_v4 }
0x2d4f   : > { %v7401_v21 = vadd.f32 %v7400_v18, %v7399_v1  ;;  %v8868_v15 = vpop.f32.mrf.mxu0  ;;  %v7637_v1 = vrot.slane %v10425_v7, %v9891_v54 }
0x2d50   : > { %v7406_v28 = vsel %vm393_vm1, %v7380_v12, 0.0 }
0x2d51   : > { %v7402_v51 = vrot.slane %v7401_v21, 2  ;;  %v7407_v61 = vrot.slane %v7406_v28, 4 }
0x2d53   : > { %v7403_v45 = vadd.f32 %v7402_v51, %v7401_v21  ;;  %v7408_v19 = vadd.f32 %v7407_v61, %v7406_v28 }
0x2d55   : > { %v7404_v35 = vrot.slane %v7403_v45, 1  ;;  %v7409_v34 = vrot.slane %v7408_v19, 2 }
0x2d57   : > { %v7405_v63 = vadd.f32 %v7404_v35, %v7403_v45  ;;  %v7410_v24 = vadd.f32 %v7409_v34, %v7408_v19 }
0x2d59   : > { %v7413_v25 = vmul.f32 0.125, %v7405_v63  ;;  %v7411_v40 = vrot.slane %v7410_v24, 1 }
0x2d5b   : > { %v7412_v59 = vadd.f32 %v7411_v40, %v7410_v24  ;;  %v7420_v27 = vpack.c.bf16 %v7413_v25, %v7413_v25 }
0x2d5d   : > { %v7414_v8 = vmul.f32 0.125, %v7412_v59  ;;  %v7428_v9 = vunpack.c.l.b16 %v7420_v27 }
0x2d5f   : > { %v7421_v30 = vpack.c.bf16 %v7414_v8, %v7414_v8 }
0x2d61   : > { %v7429_v49 = vunpack.c.l.b16 %v7421_v30 }
0x2d63   : > { %v7430_v62 = vsel %vm3769_vm5, %v7429_v49, %v7428_v9 }
0x2d64   : > { %v7431_v46 = vpack.c.b16 %v7430_v62, %v7430_v62 }
0x2d66   : > { %8874 = vmatmul.mubr.msk.bf16.vlgmr.msra.gmra.mxu1 %vm393_vm1, %v7431_v46  ;;  %8882 = vmatmul.mubr.msk.bf16.vlgmr.msra.gmra.mxu0 %vm393_vm1, %v7431_v46 }
0x2d67   : > { %8889 = vmatprep.mubr.msk.bf16.mxu1 %vm9346_vm0, %v9345_v0  ;;  %8897 = vmatprep.mubr.msk.bf16.mxu0 %vm9346_vm0, %v9345_v0 }
0x2d68   : > { %8886 = vmatpush3.bf16.msra.mxu1 %v9079_v23  ;;  %8894 = vmatpush3.bf16.msra.mxu0 %v9081_v20 }
0x2d69   : > { %8887 = vmatprep.subr.bf16.mxu1 %v9345_v0  ;;  %8895 = vmatprep.subr.bf16.mxu0 %v9345_v0 }
0x2d6c   : > { %8888 = vmatpush3.bf16.msra.mxu1 %v9080_v13  ;;  %8896 = vmatpush3.bf16.msra.mxu0 %v9082_v22 }
0x2e26   : > { %v7481_v50 = vpop.f32.mrf.mxu1  ;;  %v7542_v11 = vpop.f32.mrf.mxu0 }
0x2e27   : > { %v7482_v14 = vadd.f32 %v7481_v50, %v7425_v5  ;;  %v7543_v55 = vadd.f32 %v7542_v11, %v7495_v31 }
0x2e28   : > { %v8875_v10 = vpop.f32.mrf.mxu1  ;;  %v8883_v33 = vpop.f32.mrf.mxu0 }
0x2e29   : > { %v7552_v16 = vmul.f32 %v10462_v26, %v7482_v14 }
0x2e2a   : > { %v7484_v29 = vpop.f32.mrf.mxu1  ;;  %v7545_v17 = vpop.f32.mrf.mxu0 }
0x2e2b   : > { %v7553_v43 = vadd.f32 %v7552_v16, %v7543_v55 }
0x2e2c   : > { %v8876_v47 = vpop.f32.mrf.mxu1  ;;  %v8884_v0 = vpop.f32.mrf.mxu0 }
0x2e2d   : > { %v7554_v6 = vmul.f32 %v7553_v43, %v7553_v43 }
0x2e2f   : > { %v7555_v41 = vmul.f32 %v7554_v6, %v7553_v43 }
0x2e31   : > { %v7556_v39 = vmul.f32 0.044715, %v7555_v41 }
0x2e33   : > { %v7557_v60 = vadd.f32 %v7556_v39, %v7553_v43 }
0x2e35   : > { %v7558_v42 = vmul.f32 0.7978846, %v7557_v60 }
0x2e37   : > { %9213 = vtanh.f32 %v7558_v42 }
0x2e44   : > { %v9214_v38 = vpop.eup %9213 }
0x2e45   : > { %v7560_v58 = vadd.f32 1.0, %v9214_v38 }
0x2e47   : > { %v7561_v48 = vmul.f32 0.5, %v7560_v58 }
0x2e49   : > { %v7562_v3 = vmul.f32 %v7561_v48, %v7553_v43 }
0x2e4b   : > { %v7568_v26 = vpack.c.bf16 %v7562_v3, %v7562_v3 }
0x2e4d   : > { %8890 = vmatmul.mubr.msk.bf16.vlgmr.msra.gmra.mxu1 %vm393_vm1, %v7568_v26 }
0x2f0d   : > { %v7622_v56 = vpop.f32.mrf.mxu1 }
0x2f0e   : > { %v7623_v53 = vadd.f32 %v7622_v56, %v7572_v37 }
0x2f0f   : > { %v8891_v2 = vpop.f32.mrf.mxu1 }
0x2f10   : > { %v7633_v57 = vpack.c.bf16 %v7623_v53, %v7623_v53 }
0x2f11   : > { %v7625_v52 = vpop.f32.mrf.mxu1 }
0x2f12   : > { %8898 = vmatmul.mubr.msk.bf16.vlgmr.msra.gmra.mxu0 %vm393_vm1, %v7633_v57 }
0x2f13   : > { %v8892_v36 = vpop.f32.mrf.mxu1 }
0x2fd2   : > { %v7687_v4 = vpop.f32.mrf.mxu0 }
0x2fd3   : > { %v7688_v18 = vadd.f32 %v7687_v4, %v7637_v1 }
0x2fd4   : > { %v8899_v32 = vpop.f32.mrf.mxu0 }
0x2fd5   : > { %v7694_v44 = vrot.slane %v7688_v18, 6 }
0x2fd6   : > { %v7690_v12 = vpop.f32.mrf.mxu0 }
0x2fd7   : > { %v7696_v54 = vsel %vm4036_vm6, %v7623_v53, %v7694_v44 }
0x2fd8   : > { %8134 = vst.msk [vmem:[%s10183_s11 + $0x4] sm:$0xf] %vm4038_vm7, %v7696_v54  ;;  %v8900_v7 = vpop.f32.mrf.mxu0 }
0x2fd9   : > { %9284 = shalt.err (!%p9281_p9)
}
0x2fda   : > { %s9285_s7 = scalar_lea.hbm %s10650_s17, 128  ;;  %s9289_s14 = scalar_lea.hbm %s10704_s6, 256 }
0x2fdb   : > { %p9286_p11 = scmp.ne.s32.totalorder %s10650_s17, %s9285_s7  ;;  %p9290_p8 = scmp.lt.s32.totalorder %s10650_s17, %s10704_s6 }
0x2fdc   : > { %p9291_p6 = scmp.lt.s32.totalorder %s9289_s14, %s9285_s7 }
0x2fdd   : > { %p9287_p3 = pnand %p9286_p11, %p10718_p12 }
0x2fde   : > { %p9292_p13 = por %p9291_p6, %p9290_p8 }
0x2fdf   : > { %p9288_p5 = pneg %p9287_p3 }
0x2fe1   : > { %p9293_p1 = pnand %p9292_p13, %p9288_p5 }
0x2fe3   : > { %9296 = shalt.err (!%p9293_p1)
}
0x2fe4   : > { %s9354_s29 = smov 64   ;;  %s9355_s3 = smov 4  }
0x2fe5   : > { %8908 = dma.vmem_to_hbm [thread:$0]  (%p10718_p12), %s10652_s13, 128, %s10650_s17, %s7700_s25, %s9354_s29, %s9354_s29, %s9355_s3  }
0x2fe6 PF: > { %s7728_s19 = sand.u32 1, %s9327_s21   ;;  %p10719_p7 = scmp.ne.s32.totalorder %s10712_s10, 0 }
0x2fe7   : > { %p10720_p10 = scmp.ge.s32.totalorder %s9339_s24, 2  ;;  %s7729_s16 = scalar_lea.sflag [#allocation4], %s7728_s19 }
0x2fe9   : > { %p8918_p0 = pnand %p10720_p10, %p10719_p7 }
0x2feb   : > { %p8919_p2 = pneg %p8918_p0 }
0x2fed   : > { %9322 = dma.done.wait (%p8919_p2), %s7729_s16, 128  }
0x2fee   : > { %9324 = vsyncadd (%p8919_p2), %s7729_s16, 4294967168  ;;  %p22_p4 = scmp.ge.s32.totalorder %s9416_s27, 4   ;;  %s10721_s21 = smov %s9331_s22 }
0x2fef   : > { %s10722_s22 = smov %s9335_s23  ;;  %s10723_s23 = smov %s9428_s30 }
0x2ff0   : > { %s10724_s24 = smov %s9416_s27  ;;  %24 = sbr.rel (!%p22_p4) target bundleno = 9 (0x9), region = 135 }
0x2ff5   :  { %7734 = vsyncpa [#allocation3], 1 }
0x2ff6   :  { %7736 = vsyncpa [#allocation3 + $0x1], 1 }
0x2ff7   :  { %7737 = vsyncpa [#allocation6], 1 }
0x2ff8   :  { %7739 = vsyncpa [#allocation6 + $0x1], 1 }
0x2ff9   :  { %7740 = vsyncpa [#allocation4], 1 }
0x2ffa   :  { %7742 = vsyncpa [#allocation4 + $0x1], 1 }

</bundles_post_ra>
